<compile_context>
chip_gen: v5e
topology: v5e:2x2
jax: 0.10.0
libtpu: 0.0.40
codegen_flags: <defaults>
</compile_context>

<pallas_src>
import functools

import jax
import jax.numpy as jnp
from jax.experimental import pallas as pl
from jax.experimental.pallas import tpu as pltpu

EPS = 1e-5        # PyTorch BatchNorm2d default eps
COUT_TILE = 256   # output-channel tile (matches the 256-wide MXU on v6e/v7x)


# ----------------------------------------------------------------------------
# Fused conv (+ folded BN bias + ReLU [+ 2x2 maxpool]) kernel
# ----------------------------------------------------------------------------
def _conv_kernel(x_ref, w_ref, b_ref, o_ref, acc_ref, *,
                 k, dil, wp, out_h, out_w, relu, pool):
    """One image x one Cout tile per grid step.

    x_ref:   [1, Hp*Wp, Cin]  zero-padded image, flattened, bf16
    w_ref:   [K*K, Cin, Tco]  conv weights with BN scale folded in, bf16
    b_ref:   [1, Tco]         folded bias, f32
    o_ref:   [1, OH, OW, Tco] (OH/OW already halved if pool)
    acc_ref: [L, Tco] f32 VMEM accumulator scratch, L = out_h * wp
    """
    L = acc_ref.shape[0]

    # --- K*K shifted-slice matmuls on the MXU, accumulated in f32 ----------
    for ky in range(k):
        for kx in range(k):
            off = ky * dil * wp + kx * dil                 # static offset
            lhs = x_ref[0, pl.ds(off, L), :]               # [L, Cin] bf16
            contrib = jnp.dot(lhs, w_ref[ky * k + kx],
                              preferred_element_type=jnp.float32)
            if ky == 0 and kx == 0:
                acc_ref[...] = contrib
            else:
                acc_ref[...] += contrib

    bias = b_ref[...]                                      # [1, Tco] f32

    if pool:
        # bias-add and ReLU commute with max, so pool the raw accumulator:
        # each pooled row = max of 4 strided slices of the flat accumulator.
        oh, ow = out_h // 2, out_w // 2
        for h in range(oh):
            r0 = (2 * h) * wp
            r1 = (2 * h + 1) * wp
            m = jnp.maximum(
                jnp.maximum(acc_ref[pl.ds(r0, ow, stride=2), :],
                            acc_ref[pl.ds(r0 + 1, ow, stride=2), :]),
                jnp.maximum(acc_ref[pl.ds(r1, ow, stride=2), :],
                            acc_ref[pl.ds(r1 + 1, ow, stride=2), :]))
            y = m + bias
            if relu:
                y = jnp.maximum(y, 0.0)
            o_ref[0, h, :, :] = y.astype(o_ref.dtype)
    else:
        for h in range(out_h):
            y = acc_ref[pl.ds(h * wp, out_w), :] + bias    # drop garbage cols
            if relu:
                y = jnp.maximum(y, 0.0)
            o_ref[0, h, :, :] = y.astype(o_ref.dtype)


# ----------------------------------------------------------------------------
# Layer wrapper
# ----------------------------------------------------------------------------
def conv_bn_relu(x, p, *, k, dilation, padding, relu,
                 pool=False, out_dtype=jnp.bfloat16):
    """x: [N, H, W, Cin]; p: {'w': [k,k,Cin,Cout] (BN-scale folded), 'bias': [Cout]}."""
    n, h, w, cin = x.shape
    cout = p["w"].shape[-1]
    d = dilation
    out_h = h + 2 * padding - d * (k - 1)
    out_w = w + 2 * padding - d * (k - 1)
    wp = w + 2 * padding
    extra = 1 if k > 1 else 0          # extra zero rows keep shifted slices in range
    hp = h + 2 * padding + extra
    L = out_h * wp                     # accumulator rows (incl. garbage columns)

    xpad = jnp.pad(x.astype(jnp.bfloat16),
                   ((0, 0), (padding, padding + extra), (padding, padding), (0, 0)))
    x_flat = xpad.reshape(n, hp * wp, cin)                 # metadata-only reshape

    w_flat = p["w"].reshape(k * k, cin, cout).astype(jnp.bfloat16)
    bias = p["bias"].reshape(1, cout).astype(jnp.float32)

    # Lane-dense stores for the 1-channel head: pad Cout to 128, slice outside.
    cout_p = cout
    if cout < 8:
        cout_p = 128
        w_flat = jnp.pad(w_flat, ((0, 0), (0, 0), (0, cout_p - cout)))
        bias = jnp.pad(bias, ((0, 0), (0, cout_p - cout)))

    tco = min(cout_p, COUT_TILE)
    oh = out_h // 2 if pool else out_h
    ow = out_w // 2 if pool else out_w

    kernel = functools.partial(
        _conv_kernel, k=k, dil=d, wp=wp, out_h=out_h, out_w=out_w,
        relu=relu, pool=pool)

    flops = 2 * n * L * cin * cout_p * k * k
    bytes_accessed = (x_flat.size * 2 + w_flat.size * 2 + bias.size * 4
                      + n * oh * ow * cout_p * 2)

    # TODO(synk): for CSRNet-scale resolutions add spatial (row-block) tiling
    # with a halo; at the small shapes here one image per grid step fits VMEM.
    out = pl.pallas_call(
        kernel,
        out_shape=jax.ShapeDtypeStruct((n, oh, ow, cout_p), out_dtype),
        grid=(n, cout_p // tco),
        in_specs=[
            pl.BlockSpec((1, hp * wp, cin), lambda i, j: (i, 0, 0)),
            pl.BlockSpec((k * k, cin, tco), lambda i, j: (0, 0, j)),
            pl.BlockSpec((1, tco), lambda i, j: (0, j)),
        ],
        out_specs=pl.BlockSpec((1, oh, ow, tco), lambda i, j: (i, 0, 0, j)),
        scratch_shapes=[pltpu.VMEM((L, tco), jnp.float32)],
        compiler_params=pltpu.CompilerParams(
            dimension_semantics=("parallel", "parallel")),
        cost_estimate=pl.CostEstimate(
            flops=flops, transcendentals=0, bytes_accessed=bytes_accessed),
    )(x_flat, w_flat, bias)

    if cout_p != cout:
        out = out[..., :cout]
    return out


# ----------------------------------------------------------------------------
# Parameter init (deterministic, synthetic — no checkpoint loading)
# ----------------------------------------------------------------------------
def _conv_bn_params(key, cin, cout, k, *, bn=True, w_std=None):
    kw, kg, kb, km, kv = jax.random.split(key, 5)
    if w_std is None:
        w_std = (2.0 / (cin * k * k)) ** 0.5
    w = w_std * jax.random.normal(kw, (k, k, cin, cout), dtype=jnp.float32)
    conv_b = jnp.zeros((cout,), jnp.float32)
    if bn:
        gamma = 1.0 + 0.1 * jax.random.normal(kg, (cout,), jnp.float32)
        beta = 0.1 * jax.random.normal(kb, (cout,), jnp.float32)
        mean = 0.1 * jax.random.normal(km, (cout,), jnp.float32)
        var = 0.9 + 0.1 * jnp.abs(jax.random.normal(kv, (cout,), jnp.float32))
        scale = gamma / jnp.sqrt(var + EPS)
        w = w * scale                                # fold BN scale into weights
        bias = (conv_b - mean) * scale + beta        # fold BN shift into bias
    else:
        bias = conv_b
    return {"w": w, "bias": bias}


def init_params(key):
    # front_end = vgg16_bn.features[0:33]: 10 x [conv3x3+BN+ReLU], 3 x MaxPool2d(2,2)
    front_cfg = [64, 64, "M", 128, 128, "M", 256, 256, 256, "M", 512, 512, 512]
    back_cfg = [512, 512, 512, 256, 128, 64]         # all dilation 2, pad 2
    keys = jax.random.split(key, 32)
    ki = 0

    front = []
    cin = 3
    i = 0
    while i < len(front_cfg):
        v = front_cfg[i]
        assert v != "M"
        pool = i + 1 < len(front_cfg) and front_cfg[i + 1] == "M"
        front.append({"p": _conv_bn_params(keys[ki], cin, v, 3), "pool": pool})
        ki += 1
        cin = v
        i += 2 if pool else 1

    back = []
    for v in back_cfg:
        back.append(_conv_bn_params(keys[ki], cin, v, 3))
        ki += 1
        cin = v

    # output_layer: Conv2d(64, 1, kernel_size=1), weight ~ N(0, 0.01), bias = 0
    out = _conv_bn_params(keys[ki], cin, 1, 1, bn=False, w_std=0.01)
    return {"front": front, "back": back, "out": out}


# ----------------------------------------------------------------------------
# Full forward pass (matches CSRNet.forward)
# ----------------------------------------------------------------------------
def csrnet_forward(x_nchw, params):
    x = jnp.transpose(x_nchw, (0, 2, 3, 1))          # NCHW -> NHWC
    # front_end (VGG16_bn features[0:33]; pools fused into preceding conv)
    for layer in params["front"]:
        x = conv_bn_relu(x, layer["p"], k=3, dilation=1, padding=1,
                         relu=True, pool=layer["pool"])
    # back_end (dilated convs)
    for p in params["back"]:
        x = conv_bn_relu(x, p, k=3, dilation=2, padding=2, relu=True)
    # output_layer (1x1 conv, no BN, no ReLU)
    x = conv_bn_relu(x, params["out"], k=1, dilation=1, padding=0,
                     relu=False, out_dtype=jnp.float32)
    return jnp.transpose(x, (0, 3, 1, 2))            # NHWC -> NCHW


if __name__ == "__main__":
    key = jax.random.PRNGKey(0)
    pkey, xkey = jax.random.split(key)
    params = init_params(pkey)

    # Small input consistent with the module: RGB images, 16x16 spatial.
    x = jax.random.normal(xkey, (2, 3, 16, 16), dtype=jnp.float32)

    y = csrnet_forward(x, params)
    y = jax.block_until_ready(y)

    # Three 2x maxpools: 16 -> 2; output channel count is 1.
    assert y.shape == (2, 1, 2, 2), y.shape
    assert bool(jnp.all(jnp.isfinite(y)))
    print("KERNEL_OK")
</pallas_src>

<mosaic_0001>
module attributes {stable_mosaic.version = 11 : i64} {
  func.func @_conv_kernel(%arg0: i32, %arg1: i32, %arg2: memref<1x342x3xbf16, #tpu.memory_space<vmem>>, %arg3: memref<9x3x64xbf16, #tpu.memory_space<vmem>>, %arg4: memref<1x64xf32, #tpu.memory_space<vmem>>, %arg5: memref<1x16x16x64xbf16, #tpu.memory_space<vmem>>, %arg6: memref<288x64xf32, #tpu.memory_space<vmem>>) attributes {dimension_semantics = [#tpu.dimension_semantics<parallel>, #tpu.dimension_semantics<parallel>], iteration_bounds = array<i64: 2, 1>, scalar_prefetch = 0 : i64, scratch_operands = 1 : i64, tpu.core_type = #tpu.core_type<tc>, window_params = [{transform_indices = @transform_0, window_bounds = array<i64: 1, 342, 3>}, {transform_indices = @transform_1, window_bounds = array<i64: 9, 3, 64>}, {transform_indices = @transform_2, window_bounds = array<i64: 1, 64>}, {transform_indices = @transform_3, window_bounds = array<i64: 1, 16, 16, 64>}]} {
    %c0 = arith.constant 0 : index
    %c0_0 = arith.constant 0 : index
    %c0_1 = arith.constant 0 : index
    %0 = vector.load %arg2[%c0, %c0_0, %c0_1] : memref<1x342x3xbf16, #tpu.memory_space<vmem>>, vector<1x288x3xbf16>
    %1 = vector.shape_cast %0 : vector<1x288x3xbf16> to vector<288x3xbf16>
    %c0_2 = arith.constant 0 : index
    %c0_3 = arith.constant 0 : index
    %c0_4 = arith.constant 0 : index
    %2 = vector.load %arg3[%c0_2, %c0_3, %c0_4] : memref<9x3x64xbf16, #tpu.memory_space<vmem>>, vector<1x3x64xbf16>
    %3 = vector.shape_cast %2 : vector<1x3x64xbf16> to vector<3x64xbf16>
    %cst = arith.constant dense<0.000000e+00> : vector<288x64xf32>
    %4 = tpu.matmul %1, %3, %cst {dimension_numbers = #tpu.dot_dimension_numbers<[1], [0], [0], [1], [0, 0, 1, 1], [], []>} : vector<288x3xbf16>, vector<3x64xbf16>, vector<288x64xf32> -> vector<288x64xf32>
    %c0_5 = arith.constant 0 : index
    %c0_6 = arith.constant 0 : index
    %5 = vector.load %arg6[%c0_5, %c0_6] : memref<288x64xf32, #tpu.memory_space<vmem>>, vector<288x64xf32>
    tpu.vector_store %arg6[%c0_5, %c0_6], %4 {strides = array<i32>} : memref<288x64xf32, #tpu.memory_space<vmem>>, vector<288x64xf32>,
    %c0_7 = arith.constant 0 : index
    %c1 = arith.constant 1 : index
    %c0_8 = arith.constant 0 : index
    %6 = vector.load %arg2[%c0_7, %c1, %c0_8] : memref<1x342x3xbf16, #tpu.memory_space<vmem>>, vector<1x288x3xbf16>
    %7 = vector.shape_cast %6 : vector<1x288x3xbf16> to vector<288x3xbf16>
    %c1_9 = arith.constant 1 : index
    %c0_10 = arith.constant 0 : index
    %c0_11 = arith.constant 0 : index
    %8 = vector.load %arg3[%c1_9, %c0_10, %c0_11] : memref<9x3x64xbf16, #tpu.memory_space<vmem>>, vector<1x3x64xbf16>
    %9 = vector.shape_cast %8 : vector<1x3x64xbf16> to vector<3x64xbf16>
    %cst_12 = arith.constant dense<0.000000e+00> : vector<288x64xf32>
    %10 = tpu.matmul %7, %9, %cst_12 {dimension_numbers = #tpu.dot_dimension_numbers<[1], [0], [0], [1], [0, 0, 1, 1], [], []>} : vector<288x3xbf16>, vector<3x64xbf16>, vector<288x64xf32> -> vector<288x64xf32>
    %c0_13 = arith.constant 0 : index
    %c0_14 = arith.constant 0 : index
    %11 = vector.load %arg6[%c0_13, %c0_14] : memref<288x64xf32, #tpu.memory_space<vmem>>, vector<288x64xf32>
    %12 = arith.addf %11, %10 : vector<288x64xf32>
    %c0_15 = arith.constant 0 : index
    %c0_16 = arith.constant 0 : index
    %13 = vector.load %arg6[%c0_15, %c0_16] : memref<288x64xf32, #tpu.memory_space<vmem>>, vector<288x64xf32>
    tpu.vector_store %arg6[%c0_15, %c0_16], %12 {strides = array<i32>} : memref<288x64xf32, #tpu.memory_space<vmem>>, vector<288x64xf32>,
    %c0_17 = arith.constant 0 : index
    %c2 = arith.constant 2 : index
    %c0_18 = arith.constant 0 : index
    %14 = vector.load %arg2[%c0_17, %c2, %c0_18] : memref<1x342x3xbf16, #tpu.memory_space<vmem>>, vector<1x288x3xbf16>
    %15 = vector.shape_cast %14 : vector<1x288x3xbf16> to vector<288x3xbf16>
    %c2_19 = arith.constant 2 : index
    %c0_20 = arith.constant 0 : index
    %c0_21 = arith.constant 0 : index
    %16 = vector.load %arg3[%c2_19, %c0_20, %c0_21] : memref<9x3x64xbf16, #tpu.memory_space<vmem>>, vector<1x3x64xbf16>
    %17 = vector.shape_cast %16 : vector<1x3x64xbf16> to vector<3x64xbf16>
    %cst_22 = arith.constant dense<0.000000e+00> : vector<288x64xf32>
    %18 = tpu.matmul %15, %17, %cst_22 {dimension_numbers = #tpu.dot_dimension_numbers<[1], [0], [0], [1], [0, 0, 1, 1], [], []>} : vector<288x3xbf16>, vector<3x64xbf16>, vector<288x64xf32> -> vector<288x64xf32>
    %c0_23 = arith.constant 0 : index
    %c0_24 = arith.constant 0 : index
    %19 = vector.load %arg6[%c0_23, %c0_24] : memref<288x64xf32, #tpu.memory_space<vmem>>, vector<288x64xf32>
    %20 = arith.addf %19, %18 : vector<288x64xf32>
    %c0_25 = arith.constant 0 : index
    %c0_26 = arith.constant 0 : index
    %21 = vector.load %arg6[%c0_25, %c0_26] : memref<288x64xf32, #tpu.memory_space<vmem>>, vector<288x64xf32>
    tpu.vector_store %arg6[%c0_25, %c0_26], %20 {strides = array<i32>} : memref<288x64xf32, #tpu.memory_space<vmem>>, vector<288x64xf32>,
    %c0_27 = arith.constant 0 : index
    %c18 = arith.constant 18 : index
    %c0_28 = arith.constant 0 : index
    %22 = vector.load %arg2[%c0_27, %c18, %c0_28] : memref<1x342x3xbf16, #tpu.memory_space<vmem>>, vector<1x288x3xbf16>
    %23 = vector.shape_cast %22 : vector<1x288x3xbf16> to vector<288x3xbf16>
    %c3 = arith.constant 3 : index
    %c0_29 = arith.constant 0 : index
    %c0_30 = arith.constant 0 : index
    %24 = vector.load %arg3[%c3, %c0_29, %c0_30] : memref<9x3x64xbf16, #tpu.memory_space<vmem>>, vector<1x3x64xbf16>
    %25 = vector.shape_cast %24 : vector<1x3x64xbf16> to vector<3x64xbf16>
    %cst_31 = arith.constant dense<0.000000e+00> : vector<288x64xf32>
    %26 = tpu.matmul %23, %25, %cst_31 {dimension_numbers = #tpu.dot_dimension_numbers<[1], [0], [0], [1], [0, 0, 1, 1], [], []>} : vector<288x3xbf16>, vector<3x64xbf16>, vector<288x64xf32> -> vector<288x64xf32>
    %c0_32 = arith.constant 0 : index
    %c0_33 = arith.constant 0 : index
    %27 = vector.load %arg6[%c0_32, %c0_33] : memref<288x64xf32, #tpu.memory_space<vmem>>, vector<288x64xf32>
    %28 = arith.addf %27, %26 : vector<288x64xf32>
    %c0_34 = arith.constant 0 : index
    %c0_35 = arith.constant 0 : index
    %29 = vector.load %arg6[%c0_34, %c0_35] : memref<288x64xf32, #tpu.memory_space<vmem>>, vector<288x64xf32>
    tpu.vector_store %arg6[%c0_34, %c0_35], %28 {strides = array<i32>} : memref<288x64xf32, #tpu.memory_space<vmem>>, vector<288x64xf32>,
    %c0_36 = arith.constant 0 : index
    %c19 = arith.constant 19 : index
    %c0_37 = arith.constant 0 : index
    %30 = vector.load %arg2[%c0_36, %c19, %c0_37] : memref<1x342x3xbf16, #tpu.memory_space<vmem>>, vector<1x288x3xbf16>
    %31 = vector.shape_cast %30 : vector<1x288x3xbf16> to vector<288x3xbf16>
    %c4 = arith.constant 4 : index
    %c0_38 = arith.constant 0 : index
    %c0_39 = arith.constant 0 : index
    %32 = vector.load %arg3[%c4, %c0_38, %c0_39] : memref<9x3x64xbf16, #tpu.memory_space<vmem>>, vector<1x3x64xbf16>
    %33 = vector.shape_cast %32 : vector<1x3x64xbf16> to vector<3x64xbf16>
    %cst_40 = arith.constant dense<0.000000e+00> : vector<288x64xf32>
    %34 = tpu.matmul %31, %33, %cst_40 {dimension_numbers = #tpu.dot_dimension_numbers<[1], [0], [0], [1], [0, 0, 1, 1], [], []>} : vector<288x3xbf16>, vector<3x64xbf16>, vector<288x64xf32> -> vector<288x64xf32>
    %c0_41 = arith.constant 0 : index
    %c0_42 = arith.constant 0 : index
    %35 = vector.load %arg6[%c0_41, %c0_42] : memref<288x64xf32, #tpu.memory_space<vmem>>, vector<288x64xf32>
    %36 = arith.addf %35, %34 : vector<288x64xf32>
    %c0_43 = arith.constant 0 : index
    %c0_44 = arith.constant 0 : index
    %37 = vector.load %arg6[%c0_43, %c0_44] : memref<288x64xf32, #tpu.memory_space<vmem>>, vector<288x64xf32>
    tpu.vector_store %arg6[%c0_43, %c0_44], %36 {strides = array<i32>} : memref<288x64xf32, #tpu.memory_space<vmem>>, vector<288x64xf32>,
    %c0_45 = arith.constant 0 : index
    %c20 = arith.constant 20 : index
    %c0_46 = arith.constant 0 : index
    %38 = vector.load %arg2[%c0_45, %c20, %c0_46] : memref<1x342x3xbf16, #tpu.memory_space<vmem>>, vector<1x288x3xbf16>
    %39 = vector.shape_cast %38 : vector<1x288x3xbf16> to vector<288x3xbf16>
    %c5 = arith.constant 5 : index
    %c0_47 = arith.constant 0 : index
    %c0_48 = arith.constant 0 : index
    %40 = vector.load %arg3[%c5, %c0_47, %c0_48] : memref<9x3x64xbf16, #tpu.memory_space<vmem>>, vector<1x3x64xbf16>
    %41 = vector.shape_cast %40 : vector<1x3x64xbf16> to vector<3x64xbf16>
    %cst_49 = arith.constant dense<0.000000e+00> : vector<288x64xf32>
    %42 = tpu.matmul %39, %41, %cst_49 {dimension_numbers = #tpu.dot_dimension_numbers<[1], [0], [0], [1], [0, 0, 1, 1], [], []>} : vector<288x3xbf16>, vector<3x64xbf16>, vector<288x64xf32> -> vector<288x64xf32>
    %c0_50 = arith.constant 0 : index
    %c0_51 = arith.constant 0 : index
    %43 = vector.load %arg6[%c0_50, %c0_51] : memref<288x64xf32, #tpu.memory_space<vmem>>, vector<288x64xf32>
    %44 = arith.addf %43, %42 : vector<288x64xf32>
    %c0_52 = arith.constant 0 : index
    %c0_53 = arith.constant 0 : index
    %45 = vector.load %arg6[%c0_52, %c0_53] : memref<288x64xf32, #tpu.memory_space<vmem>>, vector<288x64xf32>
    tpu.vector_store %arg6[%c0_52, %c0_53], %44 {strides = array<i32>} : memref<288x64xf32, #tpu.memory_space<vmem>>, vector<288x64xf32>,
    %c0_54 = arith.constant 0 : index
    %c36 = arith.constant 36 : index
    %c0_55 = arith.constant 0 : index
    %46 = vector.load %arg2[%c0_54, %c36, %c0_55] : memref<1x342x3xbf16, #tpu.memory_space<vmem>>, vector<1x288x3xbf16>
    %47 = vector.shape_cast %46 : vector<1x288x3xbf16> to vector<288x3xbf16>
    %c6 = arith.constant 6 : index
    %c0_56 = arith.constant 0 : index
    %c0_57 = arith.constant 0 : index
    %48 = vector.load %arg3[%c6, %c0_56, %c0_57] : memref<9x3x64xbf16, #tpu.memory_space<vmem>>, vector<1x3x64xbf16>
    %49 = vector.shape_cast %48 : vector<1x3x64xbf16> to vector<3x64xbf16>
    %cst_58 = arith.constant dense<0.000000e+00> : vector<288x64xf32>
    %50 = tpu.matmul %47, %49, %cst_58 {dimension_numbers = #tpu.dot_dimension_numbers<[1], [0], [0], [1], [0, 0, 1, 1], [], []>} : vector<288x3xbf16>, vector<3x64xbf16>, vector<288x64xf32> -> vector<288x64xf32>
    %c0_59 = arith.constant 0 : index
    %c0_60 = arith.constant 0 : index
    %51 = vector.load %arg6[%c0_59, %c0_60] : memref<288x64xf32, #tpu.memory_space<vmem>>, vector<288x64xf32>
    %52 = arith.addf %51, %50 : vector<288x64xf32>
    %c0_61 = arith.constant 0 : index
    %c0_62 = arith.constant 0 : index
    %53 = vector.load %arg6[%c0_61, %c0_62] : memref<288x64xf32, #tpu.memory_space<vmem>>, vector<288x64xf32>
    tpu.vector_store %arg6[%c0_61, %c0_62], %52 {strides = array<i32>} : memref<288x64xf32, #tpu.memory_space<vmem>>, vector<288x64xf32>,
    %c0_63 = arith.constant 0 : index
    %c37 = arith.constant 37 : index
    %c0_64 = arith.constant 0 : index
    %54 = vector.load %arg2[%c0_63, %c37, %c0_64] : memref<1x342x3xbf16, #tpu.memory_space<vmem>>, vector<1x288x3xbf16>
    %55 = vector.shape_cast %54 : vector<1x288x3xbf16> to vector<288x3xbf16>
    %c7 = arith.constant 7 : index
    %c0_65 = arith.constant 0 : index
    %c0_66 = arith.constant 0 : index
    %56 = vector.load %arg3[%c7, %c0_65, %c0_66] : memref<9x3x64xbf16, #tpu.memory_space<vmem>>, vector<1x3x64xbf16>
    %57 = vector.shape_cast %56 : vector<1x3x64xbf16> to vector<3x64xbf16>
    %cst_67 = arith.constant dense<0.000000e+00> : vector<288x64xf32>
    %58 = tpu.matmul %55, %57, %cst_67 {dimension_numbers = #tpu.dot_dimension_numbers<[1], [0], [0], [1], [0, 0, 1, 1], [], []>} : vector<288x3xbf16>, vector<3x64xbf16>, vector<288x64xf32> -> vector<288x64xf32>
    %c0_68 = arith.constant 0 : index
    %c0_69 = arith.constant 0 : index
    %59 = vector.load %arg6[%c0_68, %c0_69] : memref<288x64xf32, #tpu.memory_space<vmem>>, vector<288x64xf32>
    %60 = arith.addf %59, %58 : vector<288x64xf32>
    %c0_70 = arith.constant 0 : index
    %c0_71 = arith.constant 0 : index
    %61 = vector.load %arg6[%c0_70, %c0_71] : memref<288x64xf32, #tpu.memory_space<vmem>>, vector<288x64xf32>
    tpu.vector_store %arg6[%c0_70, %c0_71], %60 {strides = array<i32>} : memref<288x64xf32, #tpu.memory_space<vmem>>, vector<288x64xf32>,
    %c0_72 = arith.constant 0 : index
    %c38 = arith.constant 38 : index
    %c0_73 = arith.constant 0 : index
    %62 = vector.load %arg2[%c0_72, %c38, %c0_73] : memref<1x342x3xbf16, #tpu.memory_space<vmem>>, vector<1x288x3xbf16>
    %63 = vector.shape_cast %62 : vector<1x288x3xbf16> to vector<288x3xbf16>
    %c8 = arith.constant 8 : index
    %c0_74 = arith.constant 0 : index
    %c0_75 = arith.constant 0 : index
    %64 = vector.load %arg3[%c8, %c0_74, %c0_75] : memref<9x3x64xbf16, #tpu.memory_space<vmem>>, vector<1x3x64xbf16>
    %65 = vector.shape_cast %64 : vector<1x3x64xbf16> to vector<3x64xbf16>
    %cst_76 = arith.constant dense<0.000000e+00> : vector<288x64xf32>
    %66 = tpu.matmul %63, %65, %cst_76 {dimension_numbers = #tpu.dot_dimension_numbers<[1], [0], [0], [1], [0, 0, 1, 1], [], []>} : vector<288x3xbf16>, vector<3x64xbf16>, vector<288x64xf32> -> vector<288x64xf32>
    %c0_77 = arith.constant 0 : index
    %c0_78 = arith.constant 0 : index
    %67 = vector.load %arg6[%c0_77, %c0_78] : memref<288x64xf32, #tpu.memory_space<vmem>>, vector<288x64xf32>
    %68 = arith.addf %67, %66 : vector<288x64xf32>
    %c0_79 = arith.constant 0 : index
    %c0_80 = arith.constant 0 : index
    %69 = vector.load %arg6[%c0_79, %c0_80] : memref<288x64xf32, #tpu.memory_space<vmem>>, vector<288x64xf32>
    tpu.vector_store %arg6[%c0_79, %c0_80], %68 {strides = array<i32>} : memref<288x64xf32, #tpu.memory_space<vmem>>, vector<288x64xf32>,
    %c0_81 = arith.constant 0 : index
    %c0_82 = arith.constant 0 : index
    %70 = vector.load %arg4[%c0_81, %c0_82] : memref<1x64xf32, #tpu.memory_space<vmem>>, vector<1x64xf32>
    %c0_83 = arith.constant 0 : index
    %c0_84 = arith.constant 0 : index
    %71 = vector.load %arg6[%c0_83, %c0_84] : memref<288x64xf32, #tpu.memory_space<vmem>>, vector<16x64xf32>
    %72 = vector.broadcast %70 : vector<1x64xf32> to vector<16x64xf32>
    %73 = arith.addf %71, %72 : vector<16x64xf32>
    %cst_85 = arith.constant 0.000000e+00 : f32
    %74 = vector.broadcast %cst_85 : f32 to vector<16x64xf32>
    %75 = arith.maximumf %73, %74 : vector<16x64xf32>
    %76 = arith.truncf %75 : vector<16x64xf32> to vector<16x64xbf16>
    %c0_86 = arith.constant 0 : index
    %c0_87 = arith.constant 0 : index
    %c0_88 = arith.constant 0 : index
    %c0_89 = arith.constant 0 : index
    %77 = vector.load %arg5[%c0_86, %c0_87, %c0_88, %c0_89] : memref<1x16x16x64xbf16, #tpu.memory_space<vmem>>, vector<1x1x16x64xbf16>
    %78 = vector.shape_cast %77 : vector<1x1x16x64xbf16> to vector<16x64xbf16>
    %79 = vector.shape_cast %76 : vector<16x64xbf16> to vector<1x1x16x64xbf16>
    tpu.vector_store %arg5[%c0_86, %c0_87, %c0_88, %c0_89], %79 {strides = array<i32>} : memref<1x16x16x64xbf16, #tpu.memory_space<vmem>>, vector<1x1x16x64xbf16>,
    %c18_90 = arith.constant 18 : index
    %c0_91 = arith.constant 0 : index
    %80 = vector.load %arg6[%c18_90, %c0_91] : memref<288x64xf32, #tpu.memory_space<vmem>>, vector<16x64xf32>
    %81 = vector.broadcast %70 : vector<1x64xf32> to vector<16x64xf32>
    %82 = arith.addf %80, %81 : vector<16x64xf32>
    %cst_92 = arith.constant 0.000000e+00 : f32
    %83 = vector.broadcast %cst_92 : f32 to vector<16x64xf32>
    %84 = arith.maximumf %82, %83 : vector<16x64xf32>
    %85 = arith.truncf %84 : vector<16x64xf32> to vector<16x64xbf16>
    %c0_93 = arith.constant 0 : index
    %c1_94 = arith.constant 1 : index
    %c0_95 = arith.constant 0 : index
    %c0_96 = arith.constant 0 : index
    %86 = vector.load %arg5[%c0_93, %c1_94, %c0_95, %c0_96] : memref<1x16x16x64xbf16, #tpu.memory_space<vmem>>, vector<1x1x16x64xbf16>
    %87 = vector.shape_cast %86 : vector<1x1x16x64xbf16> to vector<16x64xbf16>
    %88 = vector.shape_cast %85 : vector<16x64xbf16> to vector<1x1x16x64xbf16>
    tpu.vector_store %arg5[%c0_93, %c1_94, %c0_95, %c0_96], %88 {strides = array<i32>} : memref<1x16x16x64xbf16, #tpu.memory_space<vmem>>, vector<1x1x16x64xbf16>,
    %c36_97 = arith.constant 36 : index
    %c0_98 = arith.constant 0 : index
    %89 = vector.load %arg6[%c36_97, %c0_98] : memref<288x64xf32, #tpu.memory_space<vmem>>, vector<16x64xf32>
    %90 = vector.broadcast %70 : vector<1x64xf32> to vector<16x64xf32>
    %91 = arith.addf %89, %90 : vector<16x64xf32>
    %cst_99 = arith.constant 0.000000e+00 : f32
    %92 = vector.broadcast %cst_99 : f32 to vector<16x64xf32>
    %93 = arith.maximumf %91, %92 : vector<16x64xf32>
    %94 = arith.truncf %93 : vector<16x64xf32> to vector<16x64xbf16>
    %c0_100 = arith.constant 0 : index
    %c2_101 = arith.constant 2 : index
    %c0_102 = arith.constant 0 : index
    %c0_103 = arith.constant 0 : index
    %95 = vector.load %arg5[%c0_100, %c2_101, %c0_102, %c0_103] : memref<1x16x16x64xbf16, #tpu.memory_space<vmem>>, vector<1x1x16x64xbf16>
    %96 = vector.shape_cast %95 : vector<1x1x16x64xbf16> to vector<16x64xbf16>
    %97 = vector.shape_cast %94 : vector<16x64xbf16> to vector<1x1x16x64xbf16>
    tpu.vector_store %arg5[%c0_100, %c2_101, %c0_102, %c0_103], %97 {strides = array<i32>} : memref<1x16x16x64xbf16, #tpu.memory_space<vmem>>, vector<1x1x16x64xbf16>,
    %c54 = arith.constant 54 : index
    %c0_104 = arith.constant 0 : index
    %98 = vector.load %arg6[%c54, %c0_104] : memref<288x64xf32, #tpu.memory_space<vmem>>, vector<16x64xf32>
    %99 = vector.broadcast %70 : vector<1x64xf32> to vector<16x64xf32>
    %100 = arith.addf %98, %99 : vector<16x64xf32>
    %cst_105 = arith.constant 0.000000e+00 : f32
    %101 = vector.broadcast %cst_105 : f32 to vector<16x64xf32>
    %102 = arith.maximumf %100, %101 : vector<16x64xf32>
    %103 = arith.truncf %102 : vector<16x64xf32> to vector<16x64xbf16>
    %c0_106 = arith.constant 0 : index
    %c3_107 = arith.constant 3 : index
    %c0_108 = arith.constant 0 : index
    %c0_109 = arith.constant 0 : index
    %104 = vector.load %arg5[%c0_106, %c3_107, %c0_108, %c0_109] : memref<1x16x16x64xbf16, #tpu.memory_space<vmem>>, vector<1x1x16x64xbf16>
    %105 = vector.shape_cast %104 : vector<1x1x16x64xbf16> to vector<16x64xbf16>
    %106 = vector.shape_cast %103 : vector<16x64xbf16> to vector<1x1x16x64xbf16>
    tpu.vector_store %arg5[%c0_106, %c3_107, %c0_108, %c0_109], %106 {strides = array<i32>} : memref<1x16x16x64xbf16, #tpu.memory_space<vmem>>, vector<1x1x16x64xbf16>,
    %c72 = arith.constant 72 : index
    %c0_110 = arith.constant 0 : index
    %107 = vector.load %arg6[%c72, %c0_110] : memref<288x64xf32, #tpu.memory_space<vmem>>, vector<16x64xf32>
    %108 = vector.broadcast %70 : vector<1x64xf32> to vector<16x64xf32>
    %109 = arith.addf %107, %108 : vector<16x64xf32>
    %cst_111 = arith.constant 0.000000e+00 : f32
    %110 = vector.broadcast %cst_111 : f32 to vector<16x64xf32>
    %111 = arith.maximumf %109, %110 : vector<16x64xf32>
    %112 = arith.truncf %111 : vector<16x64xf32> to vector<16x64xbf16>
    %c0_112 = arith.constant 0 : index
    %c4_113 = arith.constant 4 : index
    %c0_114 = arith.constant 0 : index
    %c0_115 = arith.constant 0 : index
    %113 = vector.load %arg5[%c0_112, %c4_113, %c0_114, %c0_115] : memref<1x16x16x64xbf16, #tpu.memory_space<vmem>>, vector<1x1x16x64xbf16>
    %114 = vector.shape_cast %113 : vector<1x1x16x64xbf16> to vector<16x64xbf16>
    %115 = vector.shape_cast %112 : vector<16x64xbf16> to vector<1x1x16x64xbf16>
    tpu.vector_store %arg5[%c0_112, %c4_113, %c0_114, %c0_115], %115 {strides = array<i32>} : memref<1x16x16x64xbf16, #tpu.memory_space<vmem>>, vector<1x1x16x64xbf16>,
    %c90 = arith.constant 90 : index
    %c0_116 = arith.constant 0 : index
    %116 = vector.load %arg6[%c90, %c0_116] : memref<288x64xf32, #tpu.memory_space<vmem>>, vector<16x64xf32>
    %117 = vector.broadcast %70 : vector<1x64xf32> to vector<16x64xf32>
    %118 = arith.addf %116, %117 : vector<16x64xf32>
    %cst_117 = arith.constant 0.000000e+00 : f32
    %119 = vector.broadcast %cst_117 : f32 to vector<16x64xf32>
    %120 = arith.maximumf %118, %119 : vector<16x64xf32>
    %121 = arith.truncf %120 : vector<16x64xf32> to vector<16x64xbf16>
    %c0_118 = arith.constant 0 : index
    %c5_119 = arith.constant 5 : index
    %c0_120 = arith.constant 0 : index
    %c0_121 = arith.constant 0 : index
    %122 = vector.load %arg5[%c0_118, %c5_119, %c0_120, %c0_121] : memref<1x16x16x64xbf16, #tpu.memory_space<vmem>>, vector<1x1x16x64xbf16>
    %123 = vector.shape_cast %122 : vector<1x1x16x64xbf16> to vector<16x64xbf16>
    %124 = vector.shape_cast %121 : vector<16x64xbf16> to vector<1x1x16x64xbf16>
    tpu.vector_store %arg5[%c0_118, %c5_119, %c0_120, %c0_121], %124 {strides = array<i32>} : memref<1x16x16x64xbf16, #tpu.memory_space<vmem>>, vector<1x1x16x64xbf16>,
    %c108 = arith.constant 108 : index
    %c0_122 = arith.constant 0 : index
    %125 = vector.load %arg6[%c108, %c0_122] : memref<288x64xf32, #tpu.memory_space<vmem>>, vector<16x64xf32>
    %126 = vector.broadcast %70 : vector<1x64xf32> to vector<16x64xf32>
    %127 = arith.addf %125, %126 : vector<16x64xf32>
    %cst_123 = arith.constant 0.000000e+00 : f32
    %128 = vector.broadcast %cst_123 : f32 to vector<16x64xf32>
    %129 = arith.maximumf %127, %128 : vector<16x64xf32>
    %130 = arith.truncf %129 : vector<16x64xf32> to vector<16x64xbf16>
    %c0_124 = arith.constant 0 : index
    %c6_125 = arith.constant 6 : index
    %c0_126 = arith.constant 0 : index
    %c0_127 = arith.constant 0 : index
    %131 = vector.load %arg5[%c0_124, %c6_125, %c0_126, %c0_127] : memref<1x16x16x64xbf16, #tpu.memory_space<vmem>>, vector<1x1x16x64xbf16>
    %132 = vector.shape_cast %131 : vector<1x1x16x64xbf16> to vector<16x64xbf16>
    %133 = vector.shape_cast %130 : vector<16x64xbf16> to vector<1x1x16x64xbf16>
    tpu.vector_store %arg5[%c0_124, %c6_125, %c0_126, %c0_127], %133 {strides = array<i32>} : memref<1x16x16x64xbf16, #tpu.memory_space<vmem>>, vector<1x1x16x64xbf16>,
    %c126 = arith.constant 126 : index
    %c0_128 = arith.constant 0 : index
    %134 = vector.load %arg6[%c126, %c0_128] : memref<288x64xf32, #tpu.memory_space<vmem>>, vector<16x64xf32>
    %135 = vector.broadcast %70 : vector<1x64xf32> to vector<16x64xf32>
    %136 = arith.addf %134, %135 : vector<16x64xf32>
    %cst_129 = arith.constant 0.000000e+00 : f32
    %137 = vector.broadcast %cst_129 : f32 to vector<16x64xf32>
    %138 = arith.maximumf %136, %137 : vector<16x64xf32>
    %139 = arith.truncf %138 : vector<16x64xf32> to vector<16x64xbf16>
    %c0_130 = arith.constant 0 : index
    %c7_131 = arith.constant 7 : index
    %c0_132 = arith.constant 0 : index
    %c0_133 = arith.constant 0 : index
    %140 = vector.load %arg5[%c0_130, %c7_131, %c0_132, %c0_133] : memref<1x16x16x64xbf16, #tpu.memory_space<vmem>>, vector<1x1x16x64xbf16>
    %141 = vector.shape_cast %140 : vector<1x1x16x64xbf16> to vector<16x64xbf16>
    %142 = vector.shape_cast %139 : vector<16x64xbf16> to vector<1x1x16x64xbf16>
    tpu.vector_store %arg5[%c0_130, %c7_131, %c0_132, %c0_133], %142 {strides = array<i32>} : memref<1x16x16x64xbf16, #tpu.memory_space<vmem>>, vector<1x1x16x64xbf16>,
    %c144 = arith.constant 144 : index
    %c0_134 = arith.constant 0 : index
    %143 = vector.load %arg6[%c144, %c0_134] : memref<288x64xf32, #tpu.memory_space<vmem>>, vector<16x64xf32>
    %144 = vector.broadcast %70 : vector<1x64xf32> to vector<16x64xf32>
    %145 = arith.addf %143, %144 : vector<16x64xf32>
    %cst_135 = arith.constant 0.000000e+00 : f32
    %146 = vector.broadcast %cst_135 : f32 to vector<16x64xf32>
    %147 = arith.maximumf %145, %146 : vector<16x64xf32>
    %148 = arith.truncf %147 : vector<16x64xf32> to vector<16x64xbf16>
    %c0_136 = arith.constant 0 : index
    %c8_137 = arith.constant 8 : index
    %c0_138 = arith.constant 0 : index
    %c0_139 = arith.constant 0 : index
    %149 = vector.load %arg5[%c0_136, %c8_137, %c0_138, %c0_139] : memref<1x16x16x64xbf16, #tpu.memory_space<vmem>>, vector<1x1x16x64xbf16>
    %150 = vector.shape_cast %149 : vector<1x1x16x64xbf16> to vector<16x64xbf16>
    %151 = vector.shape_cast %148 : vector<16x64xbf16> to vector<1x1x16x64xbf16>
    tpu.vector_store %arg5[%c0_136, %c8_137, %c0_138, %c0_139], %151 {strides = array<i32>} : memref<1x16x16x64xbf16, #tpu.memory_space<vmem>>, vector<1x1x16x64xbf16>,
    %c162 = arith.constant 162 : index
    %c0_140 = arith.constant 0 : index
    %152 = vector.load %arg6[%c162, %c0_140] : memref<288x64xf32, #tpu.memory_space<vmem>>, vector<16x64xf32>
    %153 = vector.broadcast %70 : vector<1x64xf32> to vector<16x64xf32>
    %154 = arith.addf %152, %153 : vector<16x64xf32>
    %cst_141 = arith.constant 0.000000e+00 : f32
    %155 = vector.broadcast %cst_141 : f32 to vector<16x64xf32>
    %156 = arith.maximumf %154, %155 : vector<16x64xf32>
    %157 = arith.truncf %156 : vector<16x64xf32> to vector<16x64xbf16>
    %c0_142 = arith.constant 0 : index
    %c9 = arith.constant 9 : index
    %c0_143 = arith.constant 0 : index
    %c0_144 = arith.constant 0 : index
    %158 = vector.load %arg5[%c0_142, %c9, %c0_143, %c0_144] : memref<1x16x16x64xbf16, #tpu.memory_space<vmem>>, vector<1x1x16x64xbf16>
    %159 = vector.shape_cast %158 : vector<1x1x16x64xbf16> to vector<16x64xbf16>
    %160 = vector.shape_cast %157 : vector<16x64xbf16> to vector<1x1x16x64xbf16>
    tpu.vector_store %arg5[%c0_142, %c9, %c0_143, %c0_144], %160 {strides = array<i32>} : memref<1x16x16x64xbf16, #tpu.memory_space<vmem>>, vector<1x1x16x64xbf16>,
    %c180 = arith.constant 180 : index
    %c0_145 = arith.constant 0 : index
    %161 = vector.load %arg6[%c180, %c0_145] : memref<288x64xf32, #tpu.memory_space<vmem>>, vector<16x64xf32>
    %162 = vector.broadcast %70 : vector<1x64xf32> to vector<16x64xf32>
    %163 = arith.addf %161, %162 : vector<16x64xf32>
    %cst_146 = arith.constant 0.000000e+00 : f32
    %164 = vector.broadcast %cst_146 : f32 to vector<16x64xf32>
    %165 = arith.maximumf %163, %164 : vector<16x64xf32>
    %166 = arith.truncf %165 : vector<16x64xf32> to vector<16x64xbf16>
    %c0_147 = arith.constant 0 : index
    %c10 = arith.constant 10 : index
    %c0_148 = arith.constant 0 : index
    %c0_149 = arith.constant 0 : index
    %167 = vector.load %arg5[%c0_147, %c10, %c0_148, %c0_149] : memref<1x16x16x64xbf16, #tpu.memory_space<vmem>>, vector<1x1x16x64xbf16>
    %168 = vector.shape_cast %167 : vector<1x1x16x64xbf16> to vector<16x64xbf16>
    %169 = vector.shape_cast %166 : vector<16x64xbf16> to vector<1x1x16x64xbf16>
    tpu.vector_store %arg5[%c0_147, %c10, %c0_148, %c0_149], %169 {strides = array<i32>} : memref<1x16x16x64xbf16, #tpu.memory_space<vmem>>, vector<1x1x16x64xbf16>,
    %c198 = arith.constant 198 : index
    %c0_150 = arith.constant 0 : index
    %170 = vector.load %arg6[%c198, %c0_150] : memref<288x64xf32, #tpu.memory_space<vmem>>, vector<16x64xf32>
    %171 = vector.broadcast %70 : vector<1x64xf32> to vector<16x64xf32>
    %172 = arith.addf %170, %171 : vector<16x64xf32>
    %cst_151 = arith.constant 0.000000e+00 : f32
    %173 = vector.broadcast %cst_151 : f32 to vector<16x64xf32>
    %174 = arith.maximumf %172, %173 : vector<16x64xf32>
    %175 = arith.truncf %174 : vector<16x64xf32> to vector<16x64xbf16>
    %c0_152 = arith.constant 0 : index
    %c11 = arith.constant 11 : index
    %c0_153 = arith.constant 0 : index
    %c0_154 = arith.constant 0 : index
    %176 = vector.load %arg5[%c0_152, %c11, %c0_153, %c0_154] : memref<1x16x16x64xbf16, #tpu.memory_space<vmem>>, vector<1x1x16x64xbf16>
    %177 = vector.shape_cast %176 : vector<1x1x16x64xbf16> to vector<16x64xbf16>
    %178 = vector.shape_cast %175 : vector<16x64xbf16> to vector<1x1x16x64xbf16>
    tpu.vector_store %arg5[%c0_152, %c11, %c0_153, %c0_154], %178 {strides = array<i32>} : memref<1x16x16x64xbf16, #tpu.memory_space<vmem>>, vector<1x1x16x64xbf16>,
    %c216 = arith.constant 216 : index
    %c0_155 = arith.constant 0 : index
    %179 = vector.load %arg6[%c216, %c0_155] : memref<288x64xf32, #tpu.memory_space<vmem>>, vector<16x64xf32>
    %180 = vector.broadcast %70 : vector<1x64xf32> to vector<16x64xf32>
    %181 = arith.addf %179, %180 : vector<16x64xf32>
    %cst_156 = arith.constant 0.000000e+00 : f32
    %182 = vector.broadcast %cst_156 : f32 to vector<16x64xf32>
    %183 = arith.maximumf %181, %182 : vector<16x64xf32>
    %184 = arith.truncf %183 : vector<16x64xf32> to vector<16x64xbf16>
    %c0_157 = arith.constant 0 : index
    %c12 = arith.constant 12 : index
    %c0_158 = arith.constant 0 : index
    %c0_159 = arith.constant 0 : index
    %185 = vector.load %arg5[%c0_157, %c12, %c0_158, %c0_159] : memref<1x16x16x64xbf16, #tpu.memory_space<vmem>>, vector<1x1x16x64xbf16>
    %186 = vector.shape_cast %185 : vector<1x1x16x64xbf16> to vector<16x64xbf16>
    %187 = vector.shape_cast %184 : vector<16x64xbf16> to vector<1x1x16x64xbf16>
    tpu.vector_store %arg5[%c0_157, %c12, %c0_158, %c0_159], %187 {strides = array<i32>} : memref<1x16x16x64xbf16, #tpu.memory_space<vmem>>, vector<1x1x16x64xbf16>,
    %c234 = arith.constant 234 : index
    %c0_160 = arith.constant 0 : index
    %188 = vector.load %arg6[%c234, %c0_160] : memref<288x64xf32, #tpu.memory_space<vmem>>, vector<16x64xf32>
    %189 = vector.broadcast %70 : vector<1x64xf32> to vector<16x64xf32>
    %190 = arith.addf %188, %189 : vector<16x64xf32>
    %cst_161 = arith.constant 0.000000e+00 : f32
    %191 = vector.broadcast %cst_161 : f32 to vector<16x64xf32>
    %192 = arith.maximumf %190, %191 : vector<16x64xf32>
    %193 = arith.truncf %192 : vector<16x64xf32> to vector<16x64xbf16>
    %c0_162 = arith.constant 0 : index
    %c13 = arith.constant 13 : index
    %c0_163 = arith.constant 0 : index
    %c0_164 = arith.constant 0 : index
    %194 = vector.load %arg5[%c0_162, %c13, %c0_163, %c0_164] : memref<1x16x16x64xbf16, #tpu.memory_space<vmem>>, vector<1x1x16x64xbf16>
    %195 = vector.shape_cast %194 : vector<1x1x16x64xbf16> to vector<16x64xbf16>
    %196 = vector.shape_cast %193 : vector<16x64xbf16> to vector<1x1x16x64xbf16>
    tpu.vector_store %arg5[%c0_162, %c13, %c0_163, %c0_164], %196 {strides = array<i32>} : memref<1x16x16x64xbf16, #tpu.memory_space<vmem>>, vector<1x1x16x64xbf16>,
    %c252 = arith.constant 252 : index
    %c0_165 = arith.constant 0 : index
    %197 = vector.load %arg6[%c252, %c0_165] : memref<288x64xf32, #tpu.memory_space<vmem>>, vector<16x64xf32>
    %198 = vector.broadcast %70 : vector<1x64xf32> to vector<16x64xf32>
    %199 = arith.addf %197, %198 : vector<16x64xf32>
    %cst_166 = arith.constant 0.000000e+00 : f32
    %200 = vector.broadcast %cst_166 : f32 to vector<16x64xf32>
    %201 = arith.maximumf %199, %200 : vector<16x64xf32>
    %202 = arith.truncf %201 : vector<16x64xf32> to vector<16x64xbf16>
    %c0_167 = arith.constant 0 : index
    %c14 = arith.constant 14 : index
    %c0_168 = arith.constant 0 : index
    %c0_169 = arith.constant 0 : index
    %203 = vector.load %arg5[%c0_167, %c14, %c0_168, %c0_169] : memref<1x16x16x64xbf16, #tpu.memory_space<vmem>>, vector<1x1x16x64xbf16>
    %204 = vector.shape_cast %203 : vector<1x1x16x64xbf16> to vector<16x64xbf16>
    %205 = vector.shape_cast %202 : vector<16x64xbf16> to vector<1x1x16x64xbf16>
    tpu.vector_store %arg5[%c0_167, %c14, %c0_168, %c0_169], %205 {strides = array<i32>} : memref<1x16x16x64xbf16, #tpu.memory_space<vmem>>, vector<1x1x16x64xbf16>,
    %c270 = arith.constant 270 : index
    %c0_170 = arith.constant 0 : index
    %206 = vector.load %arg6[%c270, %c0_170] : memref<288x64xf32, #tpu.memory_space<vmem>>, vector<16x64xf32>
    %207 = vector.broadcast %70 : vector<1x64xf32> to vector<16x64xf32>
    %208 = arith.addf %206, %207 : vector<16x64xf32>
    %cst_171 = arith.constant 0.000000e+00 : f32
    %209 = vector.broadcast %cst_171 : f32 to vector<16x64xf32>
    %210 = arith.maximumf %208, %209 : vector<16x64xf32>
    %211 = arith.truncf %210 : vector<16x64xf32> to vector<16x64xbf16>
    %c0_172 = arith.constant 0 : index
    %c15 = arith.constant 15 : index
    %c0_173 = arith.constant 0 : index
    %c0_174 = arith.constant 0 : index
    %212 = vector.load %arg5[%c0_172, %c15, %c0_173, %c0_174] : memref<1x16x16x64xbf16, #tpu.memory_space<vmem>>, vector<1x1x16x64xbf16>
    %213 = vector.shape_cast %212 : vector<1x1x16x64xbf16> to vector<16x64xbf16>
    %214 = vector.shape_cast %211 : vector<16x64xbf16> to vector<1x1x16x64xbf16>
    tpu.vector_store %arg5[%c0_172, %c15, %c0_173, %c0_174], %214 {strides = array<i32>} : memref<1x16x16x64xbf16, #tpu.memory_space<vmem>>, vector<1x1x16x64xbf16>,
    return
  }
  func.func @transform_0(%arg0: i32, %arg1: i32) -> (i32, i32, i32) {
    %c0_i32 = arith.constant 0 : i32
    %c0_i32_0 = arith.constant 0 : i32
    %c0_i32_1 = arith.constant 0 : i32
    return %arg0, %c0_i32, %c0_i32_0 : i32, i32, i32
  }
  func.func @transform_1(%arg0: i32, %arg1: i32) -> (i32, i32, i32) {
    %c0_i32 = arith.constant 0 : i32
    %c0_i32_0 = arith.constant 0 : i32
    %c0_i32_1 = arith.constant 0 : i32
    return %c0_i32, %c0_i32_0, %arg1 : i32, i32, i32
  }
  func.func @transform_2(%arg0: i32, %arg1: i32) -> (i32, i32) {
    %c0_i32 = arith.constant 0 : i32
    %c0_i32_0 = arith.constant 0 : i32
    return %c0_i32, %arg1 : i32, i32
  }
  func.func @transform_3(%arg0: i32, %arg1: i32) -> (i32, i32, i32, i32) {
    %c0_i32 = arith.constant 0 : i32
    %c0_i32_0 = arith.constant 0 : i32
    %c0_i32_1 = arith.constant 0 : i32
    return %arg0, %c0_i32, %c0_i32_0, %arg1 : i32, i32, i32, i32
  }
}

</mosaic_0001>

<bundles_post_ra>
// kernel: tpu_custom_call.1
= control target key start
LH: loop header
LB: loop body
LE: loop exit
PB: predicated region body
PF: predicated region fallthrough
CT: control target
= control target key end

     0   :  { %8 = vsyncpa [#allocation4], 0  ;;  %s7840_s0 = inlined_call_operand.vmem [shape: bf16[2,342,3], index: 0, kind: input, shape index: {}]   ;;  %s7841_s1 = inlined_call_operand.vmem [shape: bf16[9,3,64], index: 1, kind: input, shape index: {}]   ;;  %s7842_s2 = inlined_call_operand.vmem [shape: f32[1,64], index: 2, kind: input, shape index: {}]   ;;  %s7843_s3 = inlined_call_operand.hbm [shape: bf16[2,16,16,64], index: 3, kind: output, shape index: {}]  }
   0x1   :  { %10 = vsyncpa [#allocation4 + $0x1], 0  ;;  %s5875_s12 = smov 0   ;;  %s5877_s13 = smov 0  }
   0x2   :  { %s5879_s14 = smov 0   ;;  %s5881_s15 = smov 0  }
   0x3   :  { %s5883_s16 = smov 0   ;;  %s5885_s17 = smov 0  }
   0x4 LB: > { %s4683_s18 = sadd.s32 4294967295, %s5850_s17   ;;  %s4684_s19 = sadd.s32 4294967294, %s5850_s17   ;;  %s5850_s17 = sphi %s5885_s17, %s16_s17   ;;  %s5846_s16 = sphi %s5883_s16, %s7850_s16   ;;  %s5842_s15 = sphi %s5881_s15, %s7849_s15   ;;  %s5838_s14 = sphi %s5879_s14, %s7848_s14   ;;  %s5834_s13 = sphi %s5877_s13, %s7847_s13   ;;  %s5830_s12 = sphi %s5875_s12, %s7846_s12  }
   0x5   : > { %s28_s20 = sadd.s32 1, %s5846_s16  ;;  %s115_s21 = sadd.s32 1, %s5838_s14 }
   0x6   : > { %p30_p0 = scmp.ge.s32.totalorder %s28_s20, 2  ;;  %p125_p1 = scmp.ne.s32.totalorder %s5838_s14, %s5834_s13 }
   0x7   : > { %p126_p2 = scmp.eq.s32.totalorder %s4683_s18, 1  ;;  %p131_p3 = scmp.ne.s32.totalorder %s5834_s13, %s5830_s12 }
   0x8   : > { %s7852_s20 = smov (%p30_p0, %s28_s20), 0  ;;  %p132_p5 = scmp.eq.s32.totalorder %s4684_s19, 1 }
   0x9   : > { %p5915_p4 = por %p126_p2, %p125_p1  ;;  %s110_s23 = ssub.s32 %s5846_s16, %s7852_s20 }
   0xa   : > { %p4689_p6 = scmp.ge.s32.totalorder %s5850_s17, 1  ;;  %p113_p7 = scmp.eq.s32.totalorder %s110_s23, 0 }
   0xb   : > { %p5922_p8 = por %p132_p5, %p131_p3  ;;  %p171_p9 = scmp.lt.s32.totalorder %s5850_s17, 3 }
   0xc   : > { %s5928_s25 = scalar_select %p113_p7, %s5838_s14, %s115_s21  }
   0xd   : > { %p172_p10 = pnand %p4689_p6, %p171_p9 }
   0xe   : > { %p202_p11 = scmp.lt.s32.totalorder (!%p172_p10), %s5842_s15, 1  ;;  %s199_s7 = sand.u32 (!%p172_p10), 1, %s5834_s13  }
   0xf   : > { %175 = sbr.rel (%p172_p10) target bundleno = 853 (0x355), region = 32  ;;  %s5707_s18 = sshll.u32 (!%p172_p10), %s5842_s15, 7 }
  0x10   : > { %s4580_s23 = scalar_lea.hbm (!%p172_p10), %s7843_s3, %s5707_s18 }
  0x11   : > { %s4583_s27 = sshll.u32 (!%p172_p10), %s4580_s23, 4  ;;  %s4584_s27 = int_to_ptr.hbm [resolvable:$true] %s4583_s27 }
  0x12   : > { %s5786_s28 = sshra.s32 (!%p172_p10), %s4584_s27, 4  ;;  %s5787_s28 = int_to_ptr.hbm [resolvable:$true] %s5786_s28 }
  0x13   : > { %s5788_s29 = scalar_lea.hbm (!%p172_p10), %s5787_s28, 128  ;;  %p5793_p1 = scmp.lt.s32.totalorder (!%p172_p10), %s5787_s28, %s7843_s3 }
  0x14   : > { %v251_v0 = vld [vmem:[%s7841_s1] sm:$0x3]  ;;  %vm397_vm0 = vcmask 1040384   ;;  %vm398_vm1 = vcmask 1041408   ;;  %v5852_v1 = vmov 65535   ;;  %s203_s5 = scalar_select %p202_p11, %s5842_s15, 1 }
  0x15   : > { %v399_v2 = vsel %vm397_vm0, 4294967295, %v5852_v1  ;;  %v4782_v3 = vld [vmem:[%s7841_s1 + $0x2] sm:$0x3]  ;;  %v4873_v4 = vld [vmem:[%s7841_s1 + $0x4] sm:$0x3]  ;;  %vm342_vm2 = vcmask 23552   ;;  %p5789_p12 = scmp.ne.s32.totalorder %s5787_s28, %s5788_s29 }
  0x16   : > { %v5940_v5 = vsel %vm398_vm1, %v399_v2, 0  ;;  %v5055_v6 = vld [vmem:[%s7841_s1 + $0x8] sm:$0x3]  ;;  %s5711_s8 = smul.u32 172, %s203_s5  ;;  %v4964_v15 = vld [vmem:[%s7841_s1 + $0x6] sm:$0x3] }
  0x17   : > { %v402_v7 = vand.u32 %v5940_v5, %v251_v0  ;;  %v876_v8 = vand.u32 %v4782_v3, %v5940_v5  ;;  %v1310_v9 = vand.u32 %v4873_v4, %v5940_v5  ;;  %v2310_v10 = vand.u32 %v5055_v6, %v5940_v5  ;;  %v5146_v28 = vld [vmem:[%s7841_s1 + $0xa] sm:$0x3]  ;;  %v5237_v29 = vld [vmem:[%s7841_s1 + $0xc] sm:$0x3]  ;;  %v5328_v36 = vld [vmem:[%s7841_s1 + $0xe] sm:$0x3]  ;;  %p5790_p13 = pnand %p5789_p12, %p5915_p4 }
  0x18   : > { %s5953_s11 = scalar_lea.vmem %s7840_s0, %s5711_s8  ;;  %v1743_v16 = vand.u32 %v4964_v15, %v5940_v5  ;;  %v2744_v30 = vand.u32 %v5146_v28, %v5940_v5  ;;  %v3177_v31 = vand.u32 %v5237_v29, %v5940_v5  ;;  %v3744_v38 = vand.u32 %v5328_v36, %v5940_v5  ;;  %v5419_v50 = vld [vmem:[%s7841_s1 + $0x10] sm:$0x3]  ;;  %s4690_s8 = sshll.u32 %s199_s7, 7 }
  0x19   : > { %5708 = vmatpush.bf16.msra.mxu1 %v402_v7  ;;  %5709 = vmatpush.bf16.msra.mxu2 %v402_v7  ;;  %v5550_v11 = vld [vmem:[%s5953_s11 + $0x28] sm:$0xff]  ;;  %v5555_v12 = vld [vmem:[%s5953_s11 + $0x50] sm:$0xff]  ;;  %v5545_v13 = vld [vmem:[%s5953_s11] sm:$0xff]  ;;  %vm1217_vm3 = vcmask 1046528   ;;  %v4178_v55 = vand.u32 %v5419_v50, %v5940_v5  ;;  %vm672_vm4 = vsmask.f32 7424  ;;  %p5791_p0 = pneg %p5790_p13 }
  0x1a   : > { %411 = vmatpush.bf16.msra.mxu0 %v402_v7  ;;  %5710 = vmatpush.bf16.msra.mxu3 %v402_v7  ;;  %v5560_v14 = vld [vmem:[%s5953_s11 + $0x78] sm:$0xff]  ;;  %v5551_v17 = vld [vmem:[%s5953_s11 + $0x30] sm:$0xff]  ;;  %v5546_v19 = vld [vmem:[%s5953_s11 + $0x8] sm:$0xff]  ;;  %vm2084_vm5 = vsmask.f32 6400  ;;  %vm503_vm6 = vcmask 523264  }
  0x1b   : > { %v5556_v18 = vld [vmem:[%s5953_s11 + $0x58] sm:$0xff]  ;;  %v5561_v20 = vld [vmem:[%s5953_s11 + $0x80] sm:$0xff]  ;;  %v5547_v23 = vld [vmem:[%s5953_s11 + $0x10] sm:$0xff]  ;;  %vm3518_vm7 = vsmask.f32 5376  ;;  %vm2651_vm8 = vcmask 1045504  }
  0x1c   : > { %4769 = vmatmul.msk.bf16.vlgmr.msra.gmra.mxu1 %vm342_vm2, %v5550_v11  ;;  %4774 = vmatmul.msk.bf16.vlgmr.msra.gmra.mxu2 %vm342_vm2, %v5555_v12  ;;  %v5552_v21 = vld [vmem:[%s5953_s11 + $0x38] sm:$0xff]  ;;  %v5557_v22 = vld [vmem:[%s5953_s11 + $0x60] sm:$0xff]  ;;  %v5562_v24 = vld [vmem:[%s5953_s11 + $0x88] sm:$0xff]  ;;  %vm4085_vm9 = vcmask 1044480   ;;  %vm4399_vm10 = vcmask 519168   ;;  %s7251_s9 = scalar_lea.vmem [#allocation3], %s4690_s8 }
  0x1d   : > { %885 = vmatpush.bf16.msrb.mxu1 %v876_v8  ;;  %1319 = vmatpush.bf16.msrb.mxu2 %v1310_v9  ;;  %v5553_v25 = vld [vmem:[%s5953_s11 + $0x40] sm:$0xff]  ;;  %v5558_v26 = vld [vmem:[%s5953_s11 + $0x68] sm:$0xff]  ;;  %v5548_v27 = vld [vmem:[%s5953_s11 + $0x18] sm:$0xff]  ;;  %s4581_s26 = sshll.u32 %s7251_s9, 4  ;;  %s4568_s15 = scalar_lea.sflag [#allocation4], %s199_s7  ;;  %s4582_s26 = int_to_ptr.vmem [resolvable:$true] %s4581_s26 }
  0x1e   : > { %2319 = vmatpush.bf16.msrb.mxu0 %v2310_v10  ;;  %4779 = vmatmul.msk.bf16.vlgmr.msra.gmra.mxu3 %vm342_vm2, %v5560_v14  ;;  %v4967_v32 = vld [vmem:[%s5953_s11 + $0x8] sm:$0xe]  ;;  %v5599_v33 = vld [vmem:[%s5953_s11 + $0x8] sm:$0xf0]  ;;  %v5600_v34 = vld [vmem:[%s5953_s11 + $0x10] sm:$0xff]  ;;  %s5792_s5 = scalar_lea.hbm %s7843_s3, 256 }
  0x1f   : > { %4764 = vmatmul.msk.bf16.vlgmr.msra.gmra.mxu0 %vm342_vm2, %v5545_v13  ;;  %1752 = vmatpush.bf16.msrb.mxu3 %v1743_v16  ;;  %v4968_v35 = vor.u32 %v5599_v33, %v4967_v32  ;;  %v1652_v37 = vrot.slane %v5600_v34, 1  ;;  %v5554_v41 = vld [vmem:[%s5953_s11 + $0x48] sm:$0xff]  ;;  %v5559_v42 = vld [vmem:[%s5953_s11 + $0x70] sm:$0xff]  ;;  %v5563_v45 = vld [vmem:[%s5953_s11] sm:$0xff]  ;;  %p5794_p2 = scmp.lt.s32.totalorder %s5792_s5, %s5788_s29 }
  0x20   : > { %v5058_v43 = vld [vmem:[%s5953_s11 + $0x8] sm:$0xe]  ;;  %v5617_v44 = vld [vmem:[%s5953_s11 + $0x8] sm:$0xf0]  ;;  %v5549_v46 = vld [vmem:[%s5953_s11 + $0x20] sm:$0xff]  ;;  %v676_v52 = vshll.u32 %v5563_v45, 16 }
  0x21   : > { %2753 = vmatpush.bf16.msra.mxu1 %v2744_v30  ;;  %3186 = vmatpush.bf16.msra.mxu2 %v3177_v31  ;;  %v1651_v39 = vrot.slane %v4968_v35, 1  ;;  %v5059_v47 = vor.u32 %v5617_v44, %v5058_v43  ;;  %v5618_v48 = vld [vmem:[%s5953_s11 + $0x10] sm:$0xff]  ;;  %v5601_v49 = vld [vmem:[%s5953_s11 + $0x18] sm:$0xff]  ;;  %v5564_v51 = vld [vmem:[%s5953_s11 + $0x8] sm:$0xff]  ;;  %v674_v62 = vshrl.u32 %v5563_v45, 16  ;;  %p5795_p3 = por %p5794_p2, %p5793_p1 }
  0x22   : > { %v4876_v53 = vld [vmem:[%s5953_s11] sm:$0xe]  ;;  %v5581_v56 = vld [vmem:[%s5953_s11] sm:$0xf0]  ;;  %v1654_v57 = vrot.slane %v5601_v49, 1  ;;  %v2094_v59 = vshrl.u32 %v5618_v48, 16  ;;  %4187 = vmatpush.bf16.msra.mxu0 %v4178_v55 }
  0x23   : > { %3753 = vmatpush.bf16.msra.mxu3 %v3744_v38  ;;  %v1653_v40 = vsel %vm1217_vm3, %v1651_v39, %v1652_v37  ;;  %v2086_v54 = vshrl.u32 %v5059_v47, 16  ;;  %v2089_v58 = vshll.u32 %v5059_v47, 16  ;;  %v2097_v60 = vshll.u32 %v5618_v48, 16  ;;  %v5582_v1 = vld [vmem:[%s5953_s11 + $0x8] sm:$0xff]  ;;  %v5619_v16 = vld [vmem:[%s5953_s11 + $0x18] sm:$0xff]  ;;  %v5620_v35 = vld [vmem:[%s5953_s11 + $0x20] sm:$0xff]  ;;  %p5796_p5 = pnand %p5795_p3, %p5791_p0 }
  0x24   : > { %v1655_v61 = vsel %vm1217_vm3, %v1652_v37, %v1654_v57  ;;  %v678_v63 = vrot.slane %v676_v52, 1  ;;  %v681_v0 = vshll.u32 %v5564_v51, 16  ;;  %v4877_v2 = vor.u32 %v5581_v56, %v4876_v53  ;;  %v5566_v36 = vld [vmem:[%s5953_s11 + $0x18] sm:$0xff]  ;;  %v5603_v37 = vld [vmem:[%s5953_s11 + $0x28] sm:$0xff]  ;;  %v5567_v55 = vld [vmem:[%s5953_s11 + $0x20] sm:$0xff] }
  0x25   : > { %v2088_v3 = vrot.slane %v2086_v54, 1  ;;  %v2091_v4 = vrot.slane %v2089_v58, 2  ;;  %v2096_v6 = vrot.slane %v2094_v59, 1  ;;  %v2099_v7 = vrot.slane %v2097_v60, 2  ;;  %v5584_v43 = vld [vmem:[%s5953_s11 + $0x18] sm:$0xff]  ;;  %v5621_v54 = vld [vmem:[%s5953_s11 + $0x28] sm:$0xff] }
  0x26   : > { %v679_v5 = vor.u32 %v678_v63, %v674_v62  ;;  %v683_v8 = vrot.slane %v681_v0, 1  ;;  %v1218_v9 = vrot.slane %v4877_v2, 1  ;;  %v1219_v10 = vrot.slane %v5582_v1, 1  ;;  %v5604_v56 = vld [vmem:[%s5953_s11 + $0x30] sm:$0xff]  ;;  %v5585_v62 = vld [vmem:[%s5953_s11 + $0x20] sm:$0xff] }
  0x27   : > { %v2092_v11 = vor.u32 %v2091_v4, %v2088_v3  ;;  %v2100_v12 = vor.u32 %v2099_v7, %v2096_v6  ;;  %v2112_v38 = vshrl.u32 %v5620_v35, 16  ;;  %v2115_v39 = vshll.u32 %v5620_v35, 16 }
  0x28   : > { %v684_v13 = vsel %vm672_vm4, %v679_v5, %v683_v8  ;;  %v1220_v14 = vsel %vm1217_vm3, %v1218_v9, %v1219_v10  ;;  %v1223_v49 = vrot.slane %v5584_v43, 1  ;;  %v2124_v58 = vshll.u32 %v5621_v54, 16 }
  0x29   : > { %v2101_v15 = vsel %vm2084_vm5, %v2092_v11, %v2100_v12  ;;  %v2114_v45 = vrot.slane %v2112_v38, 1  ;;  %v1660_v59 = vrot.slane %v5604_v56, 1  ;;  %v701_v60 = vshrl.u32 %v5566_v36, 16  ;;  %v5622_v11 = vld [vmem:[%s5953_s11 + $0x30] sm:$0xff] }
  0x2a   : > { %v2126_v1 = vrot.slane %v2124_v58, 2  ;;  %v1225_v4 = vrot.slane %v5585_v62, 1 }
  0x2c   : > { %4770 = vmatmul.msk.bf16.gmra.mxu1 %vm342_vm2, %v5551_v17  ;;  %4775 = vmatmul.msk.bf16.gmra.mxu2 %vm342_vm2, %v5556_v18  ;;  %v5602_v17 = vld [vmem:[%s5953_s11 + $0x20] sm:$0xff]  ;;  %v5565_v18 = vld [vmem:[%s5953_s11 + $0x10] sm:$0xff] }
  0x2e   : > { %4780 = vmatmul.msk.bf16.gmra.mxu3 %vm342_vm2, %v5561_v20  ;;  %v2103_v20 = vshrl.u32 %v5619_v16, 16 }
  0x2f   : > { %4765 = vmatmul.msk.bf16.gmra.mxu0 %vm342_vm2, %v5546_v19  ;;  %v1656_v19 = vrot.slane %v5602_v17, 1 }
  0x3c   : > { %4771 = vmatmul.msk.bf16.gmra.mxu1 %vm342_vm2, %v5552_v21  ;;  %4776 = vmatmul.msk.bf16.gmra.mxu2 %vm342_vm2, %v5557_v22  ;;  %v2106_v21 = vshll.u32 %v5619_v16, 16  ;;  %v1657_v22 = vsel %vm1217_vm3, %v1654_v57, %v1656_v19  ;;  %v2121_v57 = vshrl.u32 %v5621_v54, 16 }
  0x3e   : > { %4781 = vmatmul.msk.bf16.gmra.mxu3 %vm342_vm2, %v5562_v24  ;;  %v689_v24 = vshll.u32 %v5565_v18, 16  ;;  %v2123_v0 = vrot.slane %v2121_v57, 1 }
  0x3f   : > { %4766 = vmatmul.msk.bf16.gmra.mxu0 %vm342_vm2, %v5547_v23  ;;  %v685_v23 = vshrl.u32 %v5564_v51, 16 }
  0x40   : > { %v691_v29 = vrot.slane %v689_v24, 1  ;;  %v2127_v6 = vor.u32 %v2126_v1, %v2123_v0  ;;  %v5624_v0 = vld [vmem:[%s5953_s11 + $0x40] sm:$0xff] }
  0x41   : > { %v687_v28 = vor.u32 %v685_v23, %v683_v8  ;;  %v1226_v8 = vsel %vm1217_vm3, %v1223_v49, %v1225_v4 }
  0x43   : > { %v692_v32 = vsel %vm672_vm4, %v687_v28, %v691_v29 }
  0x4c   : > { %4772 = vmatmul.msk.bf16.gmra.mxu1 %vm342_vm2, %v5553_v25  ;;  %4777 = vmatmul.msk.bf16.gmra.mxu2 %vm342_vm2, %v5558_v26  ;;  %v5583_v25 = vld [vmem:[%s5953_s11 + $0x10] sm:$0xff]  ;;  %v2105_v26 = vrot.slane %v2103_v20, 1 }
  0x4d   : > { %v1221_v30 = vrot.slane %v5583_v25, 1 }
  0x4e   : > { %5037 = vmatmul.msk.bf16.vlgmr.msrb.gmra.mxu3 %vm342_vm2, %v1653_v40  ;;  %v1658_v40 = vrot.slane %v5603_v37, 1  ;;  %v5623_v37 = vld [vmem:[%s5953_s11 + $0x38] sm:$0xff] }
  0x4f   : > { %4767 = vmatmul.msk.bf16.gmra.mxu0 %vm342_vm2, %v5548_v27  ;;  %v2108_v27 = vrot.slane %v2106_v21, 2  ;;  %v1222_v33 = vsel %vm1217_vm3, %v1219_v10, %v1221_v30  ;;  %v1224_v52 = vsel %vm1217_vm3, %v1221_v30, %v1223_v49  ;;  %v5586_v21 = vld [vmem:[%s5953_s11 + $0x28] sm:$0xff] }
  0x50   : > { %v1659_v44 = vsel %vm1217_vm3, %v1656_v19, %v1658_v40  ;;  %v1661_v63 = vsel %vm1217_vm3, %v1658_v40, %v1660_v59  ;;  %v709_v19 = vshrl.u32 %v5567_v55, 16  ;;  %v5606_v40 = vld [vmem:[%s5953_s11 + $0x40] sm:$0xff] }
  0x51   : > { %v2109_v31 = vor.u32 %v2108_v27, %v2105_v26 }
  0x53   : > { %v2110_v34 = vsel %vm2084_vm5, %v2100_v12, %v2109_v31  ;;  %v5568_v12 = vld [vmem:[%s5953_s11 + $0x28] sm:$0xff] }
  0x54   : > { %v713_v20 = vshll.u32 %v5568_v12, 16 }
  0x56   : > { %v715_v28 = vrot.slane %v713_v20, 1 }
  0x5c   : > { %4773 = vmatmul.msk.bf16.gmra.mxu1 %vm342_vm2, %v5554_v41  ;;  %4778 = vmatmul.msk.bf16.gmra.mxu2 %vm342_vm2, %v5559_v42  ;;  %v693_v41 = vshrl.u32 %v5565_v18, 16  ;;  %v697_v42 = vshll.u32 %v5566_v36, 16 }
  0x5e   : > { %5038 = vmatmul.msk.bf16.gmra.mxu3 %vm342_vm2, %v1655_v61  ;;  %v695_v47 = vor.u32 %v693_v41, %v691_v29  ;;  %v699_v48 = vrot.slane %v697_v42, 1  ;;  %v705_v61 = vshll.u32 %v5567_v55, 16  ;;  %v1227_v29 = vrot.slane %v5586_v21, 1 }
  0x5f   : > { %4768 = vmatmul.msk.bf16.gmra.mxu0 %vm342_vm2, %v5549_v46  ;;  %v2117_v46 = vrot.slane %v2115_v39, 2  ;;  %v5569_v39 = vld [vmem:[%s5953_s11 + $0x30] sm:$0xff]  ;;  %v2139_v41 = vshrl.u32 %v5623_v37, 16  ;;  %v2142_v42 = vshll.u32 %v5623_v37, 16 }
  0x60   : > { %v700_v51 = vsel %vm672_vm4, %v695_v47, %v699_v48  ;;  %v703_v2 = vor.u32 %v701_v60, %v699_v48  ;;  %v707_v3 = vrot.slane %v705_v61, 1  ;;  %v721_v47 = vshll.u32 %v5569_v39, 16  ;;  %v5587_v48 = vld [vmem:[%s5953_s11 + $0x30] sm:$0xff] }
  0x61   : > { %v2118_v50 = vor.u32 %v2117_v46, %v2114_v45  ;;  %v717_v46 = vshrl.u32 %v5568_v12, 16  ;;  %v1229_v56 = vrot.slane %v5587_v48, 1 }
  0x62   : > { %v708_v5 = vsel %vm672_vm4, %v703_v2, %v707_v3  ;;  %v711_v27 = vor.u32 %v709_v19, %v707_v3  ;;  %v723_v55 = vrot.slane %v721_v47, 1  ;;  %v5570_v2 = vld [vmem:[%s5953_s11 + $0x38] sm:$0xff]  ;;  %v5607_v3 = vld [vmem:[%s5953_s11 + $0x48] sm:$0xff] }
  0x63   : > { %v2119_v53 = vsel %vm2084_vm5, %v2109_v31, %v2118_v50  ;;  %v2128_v10 = vsel %vm2084_vm5, %v2118_v50, %v2127_v6  ;;  %v719_v54 = vor.u32 %v717_v46, %v715_v28  ;;  %v1230_v61 = vsel %vm1217_vm3, %v1227_v29, %v1229_v56 }
  0x65   : > { %v724_v60 = vsel %vm672_vm4, %v719_v54, %v723_v55  ;;  %v5626_v54 = vld [vmem:[%s5953_s11 + $0x50] sm:$0xff] }
  0x6c   : > { %4855 = vmatmul.msk.bf16.vlgmr.msrb.gmra.mxu1 %vm342_vm2, %v684_v13  ;;  %4946 = vmatmul.msk.bf16.vlgmr.msrb.gmra.mxu2 %vm342_vm2, %v1220_v14  ;;  %v5605_v13 = vld [vmem:[%s5953_s11 + $0x38] sm:$0xff]  ;;  %v2130_v14 = vshrl.u32 %v5622_v11, 16 }
  0x6d   : > { %v1662_v17 = vrot.slane %v5605_v13, 1 }
  0x6e   : > { %5039 = vmatmul.msk.bf16.gmra.mxu3 %vm342_vm2, %v1657_v22  ;;  %v2132_v24 = vrot.slane %v2130_v14, 1 }
  0x6f   : > { %5128 = vmatmul.msk.bf16.vlgmr.msrb.gmra.mxu0 %vm342_vm2, %v2101_v15  ;;  %v2133_v15 = vshll.u32 %v5622_v11, 16  ;;  %v1663_v22 = vsel %vm1217_vm3, %v1660_v59, %v1662_v17  ;;  %v5588_v11 = vld [vmem:[%s5953_s11 + $0x38] sm:$0xff] }
  0x70   : > { %v1231_v19 = vrot.slane %v5588_v11, 1 }
  0x71   : > { %v2135_v25 = vrot.slane %v2133_v15, 2 }
  0x73   : > { %v2136_v30 = vor.u32 %v2135_v25, %v2132_v24  ;;  %v1232_v24 = vsel %vm1217_vm3, %v1229_v56, %v1231_v19  ;;  %v5609_v56 = vld [vmem:[%s5953_s11 + $0x58] sm:$0xff] }
  0x75   : > { %v2137_v36 = vsel %vm2084_vm5, %v2127_v6, %v2136_v30  ;;  %v2151_v6 = vshll.u32 %v5624_v0, 16 }
  0x77   : > { %v2153_v15 = vrot.slane %v2151_v6, 2 }
  0x7c   : > { %4856 = vmatmul.msk.bf16.gmra.mxu1 %vm342_vm2, %v692_v32  ;;  %4947 = vmatmul.msk.bf16.gmra.mxu2 %vm342_vm2, %v1222_v33  ;;  %v716_v33 = vsel %vm672_vm4, %v711_v27, %v715_v28  ;;  %v5625_v27 = vld [vmem:[%s5953_s11 + $0x48] sm:$0xff] }
  0x7e   : > { %5040 = vmatmul.msk.bf16.gmra.mxu3 %vm342_vm2, %v1659_v44  ;;  %v1664_v44 = vrot.slane %v5606_v40, 1 }
  0x7f   : > { %5129 = vmatmul.msk.bf16.gmra.mxu0 %vm342_vm2, %v2110_v34  ;;  %v1228_v34 = vsel %vm1217_vm3, %v1225_v4, %v1227_v29  ;;  %v2148_v4 = vshrl.u32 %v5624_v0, 16  ;;  %v5571_v29 = vld [vmem:[%s5953_s11 + $0x40] sm:$0xff] }
  0x80   : > { %v1665_v49 = vsel %vm1217_vm3, %v1662_v17, %v1664_v44  ;;  %v737_v37 = vshll.u32 %v5571_v29, 16 }
  0x81   : > { %v2150_v14 = vrot.slane %v2148_v4, 1 }
  0x83   : > { %v2154_v20 = vor.u32 %v2153_v15, %v2150_v14 }
  0x8c   : > { %4857 = vmatmul.msk.bf16.gmra.mxu1 %vm342_vm2, %v700_v51  ;;  %4948 = vmatmul.msk.bf16.gmra.mxu2 %vm342_vm2, %v1224_v52  ;;  %v2141_v51 = vrot.slane %v2139_v41, 1  ;;  %v2144_v52 = vrot.slane %v2142_v42, 2 }
  0x8e   : > { %5041 = vmatmul.msk.bf16.gmra.mxu3 %vm342_vm2, %v1661_v63  ;;  %v2145_v57 = vor.u32 %v2144_v52, %v2141_v51 }
  0x8f   : > { %5130 = vmatmul.msk.bf16.gmra.mxu0 %vm342_vm2, %v2119_v53 }
  0x90   : > { %v2146_v63 = vsel %vm2084_vm5, %v2136_v30, %v2145_v57  ;;  %v5608_v30 = vld [vmem:[%s5953_s11 + $0x50] sm:$0xff] }
  0x99   : > { %v438_v7 = vpop.f32.mrf.mxu1 }
  0x9a   : > { %514 = vst.msk [vmem:[#allocation2 + $0x50] sm:$0xff] %vm503_vm6, %v438_v7 }
  0x9c   : > { %v413_v9 = vpop.f32.mrf.mxu0  ;;  %4858 = vmatmul.msk.bf16.gmra.mxu1 %vm342_vm2, %v708_v5  ;;  %4949 = vmatmul.msk.bf16.gmra.mxu2 %vm342_vm2, %v1226_v8  ;;  %v1666_v5 = vrot.slane %v5607_v3, 1 }
  0x9d   : > { %504 = vst.msk [vmem:[#allocation2] sm:$0xff] %vm503_vm6, %v413_v9  ;;  %v725_v9 = vshrl.u32 %v5569_v39, 16 }
  0x9e   : > { %5042 = vmatmul.msk.bf16.gmra.mxu3 %vm342_vm2, %v1663_v22  ;;  %v1667_v12 = vsel %vm1217_vm3, %v1664_v44, %v1666_v5  ;;  %v739_v44 = vrot.slane %v737_v37, 1 }
  0x9f   : > { %5131 = vmatmul.msk.bf16.gmra.mxu0 %vm342_vm2, %v2128_v10  ;;  %v463_v16 = vpop.f32.mrf.mxu2  ;;  %v729_v10 = vshll.u32 %v5570_v2, 16  ;;  %v727_v17 = vor.u32 %v725_v9, %v723_v55  ;;  %v5572_v55 = vld [vmem:[%s5953_s11 + $0x48] sm:$0xff] }
  0xa0   : > { %524 = vst.msk [vmem:[#allocation2 + $0xa0] sm:$0xff] %vm503_vm6, %v463_v16  ;;  %v745_v0 = vshll.u32 %v5572_v55, 16 }
  0xa1   : > { %v440_v18 = vpop.f32.mrf.mxu1  ;;  %v488_v26 = vpop.f32.mrf.mxu3 }
  0xa2   : > { %515 = vst.msk [vmem:[#allocation2 + $0x58] sm:$0xff] %vm503_vm6, %v440_v18  ;;  %v731_v18 = vrot.slane %v729_v10, 1 }
  0xa3   : > { %534 = vst.msk [vmem:[#allocation2 + $0xf0] sm:$0xff] %vm503_vm6, %v488_v26  ;;  %v2155_v26 = vsel %vm2084_vm5, %v2145_v57, %v2154_v20 }
  0xa4   : > { %v415_v23 = vpop.f32.mrf.mxu0 }
  0xa5   : > { %505 = vst.msk [vmem:[#allocation2 + $0x8] sm:$0xff] %vm503_vm6, %v415_v23  ;;  %v732_v23 = vsel %vm672_vm4, %v727_v17, %v731_v18 }
  0xa7   : > { %v465_v31 = vpop.f32.mrf.mxu2 }
  0xa8   : > { %525 = vst.msk [vmem:[#allocation2 + $0xa8] sm:$0xff] %vm503_vm6, %v465_v31  ;;  %v2157_v31 = vshrl.u32 %v5625_v27, 16 }
  0xa9   : > { %v443_v32 = vpop.f32.mrf.mxu1  ;;  %v490_v38 = vpop.f32.mrf.mxu3 }
  0xaa   : > { %516 = vst.msk [vmem:[#allocation2 + $0x60] sm:$0xff] %vm503_vm6, %v443_v32  ;;  %v2160_v32 = vshll.u32 %v5625_v27, 16  ;;  %v2159_v41 = vrot.slane %v2157_v31, 1  ;;  %v6183_v31 = vld [vmem:[%s5953_s11 + $0x50] sm:$0xff] }
  0xab   : > { %535 = vst.msk [vmem:[#allocation2 + $0xf8] sm:$0xff] %vm503_vm6, %v490_v38  ;;  %v5589_v38 = vld [vmem:[%s5953_s11 + $0x40] sm:$0xff] }
  0xac   : > { %v418_v35 = vpop.f32.mrf.mxu0  ;;  %4859 = vmatmul.msk.bf16.gmra.mxu1 %vm342_vm2, %v716_v33  ;;  %4950 = vmatmul.msk.bf16.gmra.mxu2 %vm342_vm2, %v1228_v34  ;;  %v1668_v34 = vrot.slane %v5608_v30, 1  ;;  %v2162_v42 = vrot.slane %v2160_v32, 2 }
  0xad   : > { %506 = vst.msk [vmem:[#allocation2 + $0x10] sm:$0xff] %vm503_vm6, %v418_v35 }
  0xae   : > { %5043 = vmatmul.msk.bf16.gmra.mxu3 %vm342_vm2, %v1665_v49  ;;  %v1669_v39 = vsel %vm1217_vm3, %v1666_v5, %v1668_v34  ;;  %v2163_v46 = vor.u32 %v2162_v42, %v2159_v41  ;;  %v747_v5 = vrot.slane %v745_v0, 1  ;;  %v1237_v41 = vrot.slane %v6183_v31, 1 }
  0xaf   : > { %5132 = vmatmul.msk.bf16.gmra.mxu0 %vm342_vm2, %v2137_v36  ;;  %v468_v43 = vpop.f32.mrf.mxu2  ;;  %v733_v36 = vshrl.u32 %v5570_v2, 16 }
  0xb0   : > { %526 = vst.msk [vmem:[#allocation2 + $0xb0] sm:$0xff] %vm503_vm6, %v468_v43 }
  0xb1   : > { %v445_v45 = vpop.f32.mrf.mxu1  ;;  %v493_v53 = vpop.f32.mrf.mxu3  ;;  %v735_v43 = vor.u32 %v733_v36, %v731_v18 }
  0xb2   : > { %517 = vst.msk [vmem:[#allocation2 + $0x68] sm:$0xff] %vm503_vm6, %v445_v45  ;;  %v1233_v45 = vrot.slane %v5589_v38, 1 }
  0xb3   : > { %536 = vst.msk [vmem:[#allocation2 + $0x100] sm:$0xff] %vm503_vm6, %v493_v53  ;;  %v2164_v53 = vsel %vm2084_vm5, %v2154_v20, %v2163_v46  ;;  %v6175_v20 = vld [vmem:[%s5953_s11 + $0x50] sm:$0xff] }
  0xb4   : > { %v420_v50 = vpop.f32.mrf.mxu0  ;;  %v1234_v51 = vsel %vm1217_vm3, %v1231_v19, %v1233_v45  ;;  %v5627_v19 = vld [vmem:[%s5953_s11 + $0x58] sm:$0xff]  ;;  %v753_v30 = vshll.u32 %v6175_v20, 16 }
  0xb5   : > { %507 = vst.msk [vmem:[#allocation2 + $0x18] sm:$0xff] %vm503_vm6, %v420_v50  ;;  %v740_v50 = vsel %vm672_vm4, %v735_v43, %v739_v44 }
  0xb7   : > { %v470_v58 = vpop.f32.mrf.mxu2 }
  0xb8   : > { %527 = vst.msk [vmem:[#allocation2 + $0xb8] sm:$0xff] %vm503_vm6, %v470_v58  ;;  %v2166_v58 = vshrl.u32 %v5626_v54, 16 }
  0xb9   : > { %v448_v59 = vpop.f32.mrf.mxu1  ;;  %v495_v1 = vpop.f32.mrf.mxu3 }
  0xba   : > { %518 = vst.msk [vmem:[#allocation2 + $0x70] sm:$0xff] %vm503_vm6, %v448_v59  ;;  %v2169_v59 = vshll.u32 %v5626_v54, 16  ;;  %v2168_v4 = vrot.slane %v2166_v58, 1  ;;  %v6204_v58 = vld [vmem:[%s5953_s11 + $0x58] sm:$0xff] }
  0xbb   : > { %537 = vst.msk [vmem:[#allocation2 + $0x108] sm:$0xff] %vm503_vm6, %v495_v1  ;;  %v5590_v1 = vld [vmem:[%s5953_s11 + $0x48] sm:$0xff] }
  0xbc   : > { %v423_v62 = vpop.f32.mrf.mxu0  ;;  %4860 = vmatmul.msk.bf16.gmra.mxu1 %vm342_vm2, %v724_v60  ;;  %4951 = vmatmul.msk.bf16.gmra.mxu2 %vm342_vm2, %v1230_v61  ;;  %v1670_v61 = vrot.slane %v5609_v56, 1  ;;  %v2171_v6 = vrot.slane %v2169_v59, 2  ;;  %v6208_v59 = vld [vmem:[%s5953_s11 + $0x68] sm:$0xff] }
  0xbd   : > { %508 = vst.msk [vmem:[#allocation2 + $0x20] sm:$0xff] %vm503_vm6, %v423_v62 }
  0xbe   : > { %5044 = vmatmul.msk.bf16.gmra.mxu3 %vm342_vm2, %v1667_v12  ;;  %v1671_v2 = vsel %vm1217_vm3, %v1668_v34, %v1670_v61  ;;  %v2172_v9 = vor.u32 %v2171_v6, %v2168_v4  ;;  %v757_v4 = vshrl.u32 %v6175_v20, 16  ;;  %v761_v6 = vshll.u32 %v6204_v58, 16 }
  0xbf   : > { %5133 = vmatmul.msk.bf16.gmra.mxu0 %vm342_vm2, %v2146_v63  ;;  %v473_v7 = vpop.f32.mrf.mxu2  ;;  %v741_v63 = vshrl.u32 %v5571_v29, 16  ;;  %v749_v29 = vshrl.u32 %v5572_v55, 16 }
  0xc0   : > { %528 = vst.msk [vmem:[#allocation2 + $0xc0] sm:$0xff] %vm503_vm6, %v473_v7  ;;  %v2173_v18 = vsel %vm2084_vm5, %v2163_v46, %v2172_v9  ;;  %v979_v46 = vld [vmem:[#allocation2 + $0x10] sm:$0xff] }
  0xc1   : > { %v450_v8 = vpop.f32.mrf.mxu1  ;;  %v498_v16 = vpop.f32.mrf.mxu3  ;;  %v743_v7 = vor.u32 %v741_v63, %v739_v44 }
  0xc2   : > { %519 = vst.msk [vmem:[#allocation2 + $0x78] sm:$0xff] %vm503_vm6, %v450_v8  ;;  %v1235_v8 = vrot.slane %v5590_v1, 1  ;;  %v1674_v1 = vrot.slane %v6208_v59, 1 }
  0xc3   : > { %538 = vst.msk [vmem:[#allocation2 + $0x110] sm:$0xff] %vm503_vm6, %v498_v16  ;;  %v748_v14 = vsel %vm672_vm4, %v743_v7, %v747_v5  ;;  %v6219_v7 = vld [vmem:[%s5953_s11 + $0x58] sm:$0xff] }
  0xc4   : > { %v425_v13 = vpop.f32.mrf.mxu0  ;;  %v1236_v15 = vsel %vm1217_vm3, %v1233_v45, %v1235_v8 }
  0xc5   : > { %509 = vst.msk [vmem:[#allocation2 + $0x28] sm:$0xff] %vm503_vm6, %v425_v13  ;;  %v977_v13 = vld [vmem:[#allocation2] sm:$0xff] }
  0xc7   : > { %v475_v21 = vpop.f32.mrf.mxu2 }
  0xc8   : > { %529 = vst.msk [vmem:[#allocation2 + $0xc8] sm:$0xff] %vm503_vm6, %v475_v21  ;;  %v5610_v21 = vld [vmem:[%s5953_s11 + $0x60] sm:$0xff] }
  0xc9   : > { %v453_v22 = vpop.f32.mrf.mxu1  ;;  %v500_v28 = vpop.f32.mrf.mxu3 }
  0xca   : > { %520 = vst.msk [vmem:[#allocation2 + $0x80] sm:$0xff] %vm503_vm6, %v453_v22 }
  0xcb   : > { %539 = vst.msk [vmem:[#allocation2 + $0x118] sm:$0xff] %vm503_vm6, %v500_v28  ;;  %v978_v28 = vld [vmem:[#allocation2 + $0x8] sm:$0xff] }
  0xcc   : > { %v428_v25 = vpop.f32.mrf.mxu0  ;;  %4861 = vmatmul.msk.bf16.gmra.mxu1 %vm342_vm2, %v732_v23  ;;  %4952 = vmatmul.msk.bf16.gmra.mxu2 %vm342_vm2, %v1232_v24  ;;  %v2175_v23 = vshrl.u32 %v5627_v19, 16  ;;  %v2178_v24 = vshll.u32 %v5627_v19, 16 }
  0xcd   : > { %510 = vst.msk [vmem:[#allocation2 + $0x30] sm:$0xff] %vm503_vm6, %v428_v25 }
  0xce   : > { %5045 = vmatmul.msk.bf16.gmra.mxu3 %vm342_vm2, %v1669_v39  ;;  %v2180_v36 = vrot.slane %v2178_v24, 2  ;;  %v751_v39 = vor.u32 %v749_v29, %v747_v5 }
  0xcf   : > { %5134 = vmatmul.msk.bf16.gmra.mxu0 %vm342_vm2, %v2155_v26  ;;  %v478_v33 = vpop.f32.mrf.mxu2  ;;  %v1672_v26 = vrot.slane %v5610_v21, 1 }
  0xd0   : > { %530 = vst.msk [vmem:[#allocation2 + $0xd0] sm:$0xff] %vm503_vm6, %v478_v33 }
  0xd1   : > { %v455_v35 = vpop.f32.mrf.mxu1  ;;  %v6140_v47 = vpop.f32.mrf.mxu3  ;;  %v1673_v32 = vsel %vm1217_vm3, %v1670_v61, %v1672_v26 }
  0xd2   : > { %521 = vst.msk [vmem:[#allocation2 + $0x88] sm:$0xff] %vm503_vm6, %v455_v35  ;;  %v2177_v35 = vrot.slane %v2175_v23, 1 }
  0xd4   : > { %v430_v40 = vpop.f32.mrf.mxu0  ;;  %v2181_v42 = vor.u32 %v2180_v36, %v2177_v35  ;;  %v6249_v36 = vld [vmem:[%s5953_s11 + $0x60] sm:$0xff] }
  0xd5   : > { %511 = vst.msk [vmem:[#allocation2 + $0x38] sm:$0xff] %vm503_vm6, %v430_v40  ;;  %v755_v40 = vrot.slane %v753_v30, 1 }
  0xd7   : > { %v480_v48 = vpop.f32.mrf.mxu2 }
  0xd8   : > { %531 = vst.msk [vmem:[#allocation2 + $0xd8] sm:$0xff] %vm503_vm6, %v480_v48  ;;  %v756_v48 = vsel %vm672_vm4, %v751_v39, %v755_v40 }
  0xd9   : > { %v458_v49 = vpop.f32.mrf.mxu1  ;;  %v6154_v57 = vpop.f32.mrf.mxu3 }
  0xda   : > { %522 = vst.msk [vmem:[#allocation2 + $0x90] sm:$0xff] %vm503_vm6, %v458_v49  ;;  %v1238_v49 = vsel %vm1217_vm3, %v1235_v8, %v1237_v41 }
  0xdc   : > { %v433_v52 = vpop.f32.mrf.mxu0  ;;  %4862 = vmatmul.msk.bf16.gmra.mxu1 %vm342_vm2, %v740_v50  ;;  %4953 = vmatmul.msk.bf16.gmra.mxu2 %vm342_vm2, %v1234_v51 }
  0xdd   : > { %512 = vst.msk [vmem:[#allocation2 + $0x40] sm:$0xff] %vm503_vm6, %v433_v52  ;;  %v2182_v52 = vsel %vm2084_vm5, %v2172_v9, %v2181_v42 }
  0xde   : > { %5046 = vmatmul.msk.bf16.gmra.mxu3 %vm342_vm2, %v1671_v2 }
  0xdf   : > { %5135 = vmatmul.msk.bf16.gmra.mxu0 %vm342_vm2, %v2164_v53  ;;  %v483_v60 = vpop.f32.mrf.mxu2  ;;  %v5628_v53 = vld [vmem:[%s5953_s11 + $0x60] sm:$0xff] }
  0xe0   : > { %532 = vst.msk [vmem:[#allocation2 + $0xe0] sm:$0xff] %vm503_vm6, %v483_v60  ;;  %v2187_v63 = vshll.u32 %v5628_v53, 16 }
  0xe1   : > { %v460_v62 = vpop.f32.mrf.mxu1  ;;  %v6162_v10 = vpop.f32.mrf.mxu3 }
  0xe2   : > { %523 = vst.msk [vmem:[#allocation2 + $0x98] sm:$0xff] %vm503_vm6, %v460_v62  ;;  %v2184_v62 = vshrl.u32 %v5628_v53, 16 }
  0xe4   : > { %v435_v3 = vpop.f32.mrf.mxu0  ;;  %v2186_v9 = vrot.slane %v2184_v62, 1 }
  0xe5   : > { %513 = vst.msk [vmem:[#allocation2 + $0x48] sm:$0xff] %vm503_vm6, %v435_v3  ;;  %v980_v3 = vld [vmem:[#allocation2 + $0x18] sm:$0xff] }
  0xe7   : > { %v485_v11 = vpop.f32.mrf.mxu2 }
  0xe8   : > { %533 = vst.msk [vmem:[#allocation2 + $0xe8] sm:$0xff] %vm503_vm6, %v485_v11  ;;  %v2189_v11 = vrot.slane %v2187_v63, 2 }
  0xe9   : > { %v887_v12 = vpop.f32.mrf.mxu1  ;;  %v6179_v22 = vpop.f32.mrf.mxu3 }
  0xea   : > { %v1013_v16 = vadd.f32 %v977_v13, %v887_v12  ;;  %v6229_v20 = vor.u32 %v2189_v11, %v2186_v9  ;;  %v983_v9 = vld [vmem:[#allocation2 + $0x30] sm:$0xff] }
  0xec   : > { %v6167_v17 = vpop.f32.mrf.mxu0  ;;  %1049 = vst.msk [vmem:[#allocation2] sm:$0xff] %vm503_vm6, %v1013_v16  ;;  %4863 = vmatmul.msk.bf16.gmra.mxu1 %vm342_vm2, %v748_v14  ;;  %4954 = vmatmul.msk.bf16.gmra.mxu2 %vm342_vm2, %v1236_v15  ;;  %v759_v15 = vor.u32 %v757_v4, %v755_v40  ;;  %v763_v16 = vrot.slane %v761_v6, 1  ;;  %v2191_v31 = vsel %vm2084_vm5, %v2181_v42, %v6229_v20 }
  0xee   : > { %5047 = vmatmul.msk.bf16.gmra.mxu3 %vm342_vm2, %v1673_v32  ;;  %v5629_v32 = vld [vmem:[%s5953_s11 + $0x68] sm:$0xff] }
  0xef   : > { %5136 = vmatmul.msk.bf16.gmra.mxu0 %vm342_vm2, %v2173_v18  ;;  %v1321_v25 = vpop.f32.mrf.mxu2  ;;  %v1239_v18 = vrot.slane %v6219_v7, 1  ;;  %v2193_v40 = vshrl.u32 %v5629_v32, 16 }
  0xf1   : > { %v889_v27 = vpop.f32.mrf.mxu1  ;;  %v6192_v43 = vpop.f32.mrf.mxu3 }
  0xf2   : > { %v1014_v33 = vadd.f32 %v978_v28, %v889_v27  ;;  %v981_v27 = vld [vmem:[#allocation2 + $0x20] sm:$0xff]  ;;  %v764_v28 = vsel %vm672_vm4, %v759_v15, %v763_v16 }
  0xf3   : > { %v1411_v37 = vld [vmem:[#allocation2] sm:$0xff] }
  0xf4   : > { %v6186_v34 = vpop.f32.mrf.mxu0  ;;  %v1447_v38 = vadd.f32 %v1411_v37, %v1321_v25  ;;  %1050 = vst.msk [vmem:[#allocation2 + $0x8] sm:$0xff] %vm503_vm6, %v1014_v33  ;;  %v6253_v37 = vld [vmem:[%s5953_s11 + $0x70] sm:$0xff] }
  0xf6   : > { %1483 = vst.msk [vmem:[#allocation2] sm:$0xff] %vm503_vm6, %v1447_v38 }
  0xf7   : > { %v1323_v44 = vpop.f32.mrf.mxu2 }
  0xf9   : > { %v892_v45 = vpop.f32.mrf.mxu1  ;;  %v6212_v61 = vpop.f32.mrf.mxu3 }
  0xfa   : > { %v1015_v50 = vadd.f32 %v979_v46, %v892_v45  ;;  %v1676_v45 = vrot.slane %v6253_v37, 1 }
  0xfb   : > { %v1412_v54 = vld [vmem:[#allocation2 + $0x8] sm:$0xff] }
  0xfc   : > { %v6196_v51 = vpop.f32.mrf.mxu0  ;;  %v1448_v55 = vadd.f32 %v1412_v54, %v1323_v44  ;;  %1051 = vst.msk [vmem:[#allocation2 + $0x10] sm:$0xff] %vm503_vm6, %v1015_v50  ;;  %4864 = vmatmul.msk.bf16.gmra.mxu1 %vm342_vm2, %v756_v48  ;;  %4955 = vmatmul.msk.bf16.gmra.mxu2 %vm342_vm2, %v1238_v49  ;;  %v982_v49 = vld [vmem:[#allocation2 + $0x28] sm:$0xff]  ;;  %v765_v50 = vshrl.u32 %v6204_v58, 16  ;;  %v1677_v53 = vsel %vm1217_vm3, %v1674_v1, %v1676_v45 }
  0xfd   : > { %v1844_v56 = vld [vmem:[#allocation2] sm:$0xff] }
  0xfe   : > { %v1880_v60 = vadd.f32 %v1844_v56, %v6140_v47  ;;  %1484 = vst.msk [vmem:[#allocation2 + $0x8] sm:$0xff] %vm503_vm6, %v1448_v55  ;;  %v1675_v47 = vsel %vm1217_vm3, %v1672_v26, %v1674_v1  ;;  %v2195_v56 = vrot.slane %v2193_v40, 1  ;;  %v767_v62 = vor.u32 %v765_v50, %v763_v16 }
  0xff   : > { %5137 = vmatmul.msk.bf16.gmra.mxu0 %vm342_vm2, %v2182_v52  ;;  %v1326_v0 = vpop.f32.mrf.mxu2  ;;  %5048 = vmatmul.msk.bf16.gmra.mxu3 %vm342_vm2, %v1675_v47  ;;  %v6265_v52 = vld [vmem:[%s5953_s11 + $0x60] sm:$0xff] }
 0x100   : > { %1916 = vst.msk [vmem:[#allocation2] sm:$0xff] %vm503_vm6, %v1880_v60 }
 0x101   : > { %v894_v2 = vpop.f32.mrf.mxu1  ;;  %v6231_v21 = vpop.f32.mrf.mxu3 }
 0x102   : > { %v1016_v5 = vadd.f32 %v980_v3, %v894_v2 }
 0x103   : > { %v1413_v12 = vld [vmem:[#allocation2 + $0x10] sm:$0xff] }
 0x104   : > { %v6222_v8 = vpop.f32.mrf.mxu0  ;;  %v1449_v13 = vadd.f32 %v1413_v12, %v1326_v0  ;;  %1052 = vst.msk [vmem:[#allocation2 + $0x18] sm:$0xff] %vm503_vm6, %v1016_v5  ;;  %v1241_v0 = vrot.slane %v6265_v52, 1 }
 0x105   : > { %v1845_v14 = vld [vmem:[#allocation2 + $0x8] sm:$0xff] }
 0x106   : > { %v1881_v19 = vadd.f32 %v1845_v14, %v6154_v57  ;;  %1485 = vst.msk [vmem:[#allocation2 + $0x10] sm:$0xff] %vm503_vm6, %v1449_v13  ;;  %v1240_v57 = vsel %vm1217_vm3, %v1237_v41, %v1239_v18  ;;  %v2196_v41 = vshll.u32 %v5629_v32, 16  ;;  %v5630_v14 = vld [vmem:[%s5953_s11 + $0x70] sm:$0xff]  ;;  %v773_v32 = vshrl.u32 %v6249_v36, 16 }
 0x107   : > { %v2411_v23 = vld [vmem:[#allocation2] sm:$0xff]  ;;  %v1328_v24 = vpop.f32.mrf.mxu2 }
 0x108   : > { %1917 = vst.msk [vmem:[#allocation2 + $0x8] sm:$0xff] %vm503_vm6, %v1881_v19  ;;  %v2447_v25 = vadd.f32 %v2411_v23, %v6167_v17  ;;  %v2198_v59 = vrot.slane %v2196_v41, 2  ;;  %v6305_v19 = vld [vmem:[%s5953_s11 + $0x78] sm:$0xff] }
 0x109   : > { %v897_v26 = vpop.f32.mrf.mxu1  ;;  %v6257_v39 = vpop.f32.mrf.mxu3 }
 0x10a   : > { %2483 = vst.msk [vmem:[#allocation2] sm:$0xff] %vm503_vm6, %v2447_v25  ;;  %v1017_v29 = vadd.f32 %v981_v27, %v897_v26  ;;  %v6278_v2 = vor.u32 %v2198_v59, %v2195_v56  ;;  %v2205_v25 = vshll.u32 %v5630_v14, 16  ;;  %v985_v56 = vld [vmem:[#allocation2 + $0x40] sm:$0xff] }
 0x10b   : > { %v1414_v17 = vld [vmem:[#allocation2 + $0x18] sm:$0xff] }
 0x10c   : > { %v6240_v30 = vpop.f32.mrf.mxu0  ;;  %v1450_v33 = vadd.f32 %v1414_v17, %v1328_v24  ;;  %1053 = vst.msk [vmem:[#allocation2 + $0x20] sm:$0xff] %vm503_vm6, %v1017_v29  ;;  %4865 = vmatmul.msk.bf16.gmra.mxu1 %vm342_vm2, %v764_v28  ;;  %4956 = vmatmul.msk.bf16.gmra.mxu2 %vm342_vm2, %v1240_v57  ;;  %v2202_v24 = vshrl.u32 %v5630_v14, 16  ;;  %v1678_v28 = vrot.slane %v6305_v19, 1  ;;  %v6317_v17 = vld [vmem:[%s5953_s11 + $0x68] sm:$0xff]  ;;  %v2207_v40 = vrot.slane %v2205_v25, 2 }
 0x10d   : > { %v1846_v35 = vld [vmem:[#allocation2 + $0x10] sm:$0xff]  ;;  %v1243_v37 = vrot.slane %v6317_v17, 1 }
 0x10e   : > { %v1882_v38 = vadd.f32 %v1846_v35, %v6162_v10  ;;  %1486 = vst.msk [vmem:[#allocation2 + $0x18] sm:$0xff] %vm503_vm6, %v1450_v33  ;;  %v769_v10 = vshll.u32 %v6249_v36, 16  ;;  %v1679_v33 = vsel %vm1217_vm3, %v1676_v45, %v1678_v28 }
 0x10f   : > { %5138 = vmatmul.msk.bf16.gmra.mxu0 %vm342_vm2, %v2191_v31  ;;  %v2412_v42 = vld [vmem:[#allocation2 + $0x8] sm:$0xff]  ;;  %v1331_v44 = vpop.f32.mrf.mxu2  ;;  %5049 = vmatmul.msk.bf16.gmra.mxu3 %vm342_vm2, %v1677_v53  ;;  %v984_v31 = vld [vmem:[#allocation2 + $0x38] sm:$0xff] }
 0x110   : > { %1918 = vst.msk [vmem:[#allocation2 + $0x10] sm:$0xff] %vm503_vm6, %v1882_v38  ;;  %v2448_v46 = vadd.f32 %v2412_v42, %v6186_v34  ;;  %v771_v63 = vrot.slane %v769_v10, 1 }
 0x111   : > { %v899_v48 = vpop.f32.mrf.mxu1  ;;  %v6280_v3 = vpop.f32.mrf.mxu3 }
 0x112   : > { %2484 = vst.msk [vmem:[#allocation2 + $0x8] sm:$0xff] %vm503_vm6, %v2448_v46  ;;  %v1018_v54 = vadd.f32 %v982_v49, %v899_v48  ;;  %v772_v11 = vsel %vm672_vm4, %v767_v62, %v771_v63 }
 0x113   : > { %v1415_v34 = vld [vmem:[#allocation2 + $0x20] sm:$0xff] }
 0x114   : > { %v6271_v55 = vpop.f32.mrf.mxu0  ;;  %v1451_v60 = vadd.f32 %v1415_v34, %v1331_v44  ;;  %1054 = vst.msk [vmem:[#allocation2 + $0x28] sm:$0xff] %vm503_vm6, %v1018_v54  ;;  %v775_v44 = vor.u32 %v773_v32, %v771_v63 }
 0x115   : > { %v1847_v58 = vld [vmem:[#allocation2 + $0x18] sm:$0xff] }
 0x116   : > { %v1883_v1 = vadd.f32 %v1847_v58, %v6179_v22  ;;  %1487 = vst.msk [vmem:[#allocation2 + $0x20] sm:$0xff] %vm503_vm6, %v1451_v60  ;;  %v1242_v22 = vsel %vm1217_vm3, %v1239_v18, %v1241_v0  ;;  %v6301_v18 = vld [vmem:[%s5953_s11 + $0x68] sm:$0xff]  ;;  %v5631_v58 = vld [vmem:[%s5953_s11 + $0x78] sm:$0xff] }
 0x117   : > { %v2413_v4 = vld [vmem:[#allocation2 + $0x10] sm:$0xff]  ;;  %v1333_v6 = vpop.f32.mrf.mxu2  ;;  %v781_v14 = vshrl.u32 %v6301_v18, 16 }
 0x118   : > { %1919 = vst.msk [vmem:[#allocation2 + $0x18] sm:$0xff] %vm503_vm6, %v1883_v1  ;;  %v2449_v47 = vadd.f32 %v2413_v4, %v6196_v51  ;;  %v2200_v51 = vsel %vm2084_vm5, %v6229_v20, %v6278_v2  ;;  %v6359_v1 = vld [vmem:[%s5953_s11 + $0x80] sm:$0xff] }
 0x119   : > { %v902_v5 = vpop.f32.mrf.mxu1  ;;  %v6309_v20 = vpop.f32.mrf.mxu3 }
 0x11a   : > { %2485 = vst.msk [vmem:[#allocation2 + $0x10] sm:$0xff] %vm503_vm6, %v2449_v47  ;;  %v1019_v12 = vadd.f32 %v983_v9, %v902_v5  ;;  %v2214_v47 = vshll.u32 %v5631_v58, 16 }
 0x11b   : > { %v1416_v15 = vld [vmem:[#allocation2 + $0x28] sm:$0xff] }
 0x11c   : > { %v6291_v13 = vpop.f32.mrf.mxu0  ;;  %v1452_v16 = vadd.f32 %v1416_v15, %v1333_v6  ;;  %1055 = vst.msk [vmem:[#allocation2 + $0x30] sm:$0xff] %vm503_vm6, %v1019_v12  ;;  %4866 = vmatmul.msk.bf16.gmra.mxu1 %vm342_vm2, %v772_v11  ;;  %4957 = vmatmul.msk.bf16.gmra.mxu2 %vm342_vm2, %v1242_v22  ;;  %v2211_v6 = vshrl.u32 %v5631_v58, 16  ;;  %v1680_v11 = vrot.slane %v6359_v1, 1  ;;  %v6371_v15 = vld [vmem:[%s5953_s11 + $0x70] sm:$0xff] }
 0x11d   : > { %v1848_v7 = vld [vmem:[#allocation2 + $0x20] sm:$0xff]  ;;  %v1245_v19 = vrot.slane %v6371_v15, 1 }
 0x11e   : > { %v1884_v23 = vadd.f32 %v1848_v7, %v6192_v43  ;;  %1488 = vst.msk [vmem:[#allocation2 + $0x28] sm:$0xff] %vm503_vm6, %v1452_v16  ;;  %v777_v43 = vshll.u32 %v6301_v18, 16  ;;  %v1681_v16 = vsel %vm1217_vm3, %v1678_v28, %v1680_v11 }
 0x11f   : > { %5139 = vmatmul.msk.bf16.gmra.mxu0 %vm342_vm2, %v2200_v51  ;;  %v2414_v26 = vld [vmem:[#allocation2 + $0x18] sm:$0xff]  ;;  %v1336_v27 = vpop.f32.mrf.mxu2  ;;  %5050 = vmatmul.msk.bf16.gmra.mxu3 %vm342_vm2, %v1679_v33  ;;  %v986_v51 = vld [vmem:[#allocation2 + $0x48] sm:$0xff] }
 0x120   : > { %1920 = vst.msk [vmem:[#allocation2 + $0x20] sm:$0xff] %vm503_vm6, %v1884_v23  ;;  %v2450_v57 = vadd.f32 %v2414_v26, %v6222_v8  ;;  %v2204_v8 = vrot.slane %v2202_v24, 1  ;;  %v779_v46 = vrot.slane %v777_v43, 1  ;;  %v2216_v24 = vrot.slane %v2214_v47, 2 }
 0x121   : > { %v904_v29 = vpop.f32.mrf.mxu1  ;;  %v6334_v49 = vpop.f32.mrf.mxu3 }
 0x122   : > { %2486 = vst.msk [vmem:[#allocation2 + $0x18] sm:$0xff] %vm503_vm6, %v2450_v57  ;;  %v1020_v35 = vadd.f32 %v984_v31, %v904_v29  ;;  %v6332_v48 = vor.u32 %v2207_v40, %v2204_v8  ;;  %v780_v59 = vsel %vm672_vm4, %v775_v44, %v779_v46  ;;  %v987_v8 = vld [vmem:[#allocation2 + $0x50] sm:$0xff] }
 0x123   : > { %v1417_v41 = vld [vmem:[#allocation2 + $0x30] sm:$0xff] }
 0x124   : > { %v6325_v38 = vpop.f32.mrf.mxu0  ;;  %v1453_v36 = vadd.f32 %v1417_v41, %v1336_v27  ;;  %1056 = vst.msk [vmem:[#allocation2 + $0x38] sm:$0xff] %vm503_vm6, %v1020_v35  ;;  %v783_v27 = vor.u32 %v781_v14, %v779_v46 }
 0x125   : > { %v1849_v42 = vld [vmem:[#allocation2 + $0x28] sm:$0xff] }
 0x126   : > { %v1885_v45 = vadd.f32 %v1849_v42, %v6212_v61  ;;  %1489 = vst.msk [vmem:[#allocation2 + $0x30] sm:$0xff] %vm503_vm6, %v1453_v36  ;;  %v1244_v61 = vsel %vm1217_vm3, %v1241_v0, %v1243_v37  ;;  %v6355_v0 = vld [vmem:[%s5953_s11 + $0x70] sm:$0xff]  ;;  %v5632_v42 = vld [vmem:[%s5953_s11 + $0x80] sm:$0xff] }
 0x127   : > { %v2415_v50 = vld [vmem:[#allocation2 + $0x20] sm:$0xff]  ;;  %v1338_v10 = vpop.f32.mrf.mxu2  ;;  %v789_v58 = vshrl.u32 %v6355_v0, 16 }
 0x128   : > { %1921 = vst.msk [vmem:[#allocation2 + $0x28] sm:$0xff] %vm503_vm6, %v1885_v45  ;;  %v2451_v53 = vadd.f32 %v2415_v50, %v6240_v30  ;;  %v2209_v30 = vsel %vm2084_vm5, %v6278_v2, %v6332_v48  ;;  %v6413_v45 = vld [vmem:[%s5953_s11 + $0x88] sm:$0xff] }
 0x129   : > { %v907_v54 = vpop.f32.mrf.mxu1  ;;  %v6363_v2 = vpop.f32.mrf.mxu3 }
 0x12a   : > { %2487 = vst.msk [vmem:[#allocation2 + $0x20] sm:$0xff] %vm503_vm6, %v2451_v53  ;;  %v1021_v34 = vadd.f32 %v985_v56, %v907_v54  ;;  %v2223_v53 = vshll.u32 %v5632_v42, 16 }
 0x12b   : > { %v1418_v62 = vld [vmem:[#allocation2 + $0x38] sm:$0xff] }
 0x12c   : > { %v6345_v60 = vpop.f32.mrf.mxu0  ;;  %v1454_v63 = vadd.f32 %v1418_v62, %v1338_v10  ;;  %1057 = vst.msk [vmem:[#allocation2 + $0x40] sm:$0xff] %vm503_vm6, %v1021_v34  ;;  %4867 = vmatmul.msk.bf16.gmra.mxu1 %vm342_vm2, %v780_v59  ;;  %4958 = vmatmul.msk.bf16.gmra.mxu2 %vm342_vm2, %v1244_v61  ;;  %v2220_v10 = vshrl.u32 %v5632_v42, 16  ;;  %v1682_v59 = vrot.slane %v6413_v45, 1  ;;  %v6425_v62 = vld [vmem:[%s5953_s11 + $0x78] sm:$0xff] }
 0x12d   : > { %v1850_v52 = vld [vmem:[#allocation2 + $0x30] sm:$0xff]  ;;  %v1247_v1 = vrot.slane %v6425_v62, 1 }
 0x12e   : > { %v1886_v4 = vadd.f32 %v1850_v52, %v6231_v21  ;;  %1490 = vst.msk [vmem:[#allocation2 + $0x38] sm:$0xff] %vm503_vm6, %v1454_v63  ;;  %v785_v21 = vshll.u32 %v6355_v0, 16  ;;  %v1683_v63 = vsel %vm1217_vm3, %v1680_v11, %v1682_v59 }
 0x12f   : > { %5140 = vmatmul.msk.bf16.gmra.mxu0 %vm342_vm2, %v2209_v30  ;;  %v2416_v5 = vld [vmem:[#allocation2 + $0x28] sm:$0xff]  ;;  %v1341_v9 = vpop.f32.mrf.mxu2  ;;  %5051 = vmatmul.msk.bf16.gmra.mxu3 %vm342_vm2, %v1681_v16  ;;  %v988_v30 = vld [vmem:[#allocation2 + $0x58] sm:$0xff] }
 0x130   : > { %1922 = vst.msk [vmem:[#allocation2 + $0x30] sm:$0xff] %vm503_vm6, %v1886_v4  ;;  %v2452_v22 = vadd.f32 %v2416_v5, %v6271_v55  ;;  %v2213_v55 = vrot.slane %v2211_v6, 1  ;;  %v787_v57 = vrot.slane %v785_v21, 1  ;;  %v2225_v6 = vrot.slane %v2223_v53, 2 }
 0x131   : > { %v909_v12 = vpop.f32.mrf.mxu1  ;;  %v6388_v31 = vpop.f32.mrf.mxu3 }
 0x132   : > { %2488 = vst.msk [vmem:[#allocation2 + $0x28] sm:$0xff] %vm503_vm6, %v2452_v22  ;;  %v1022_v7 = vadd.f32 %v986_v51, %v909_v12  ;;  %v6386_v29 = vor.u32 %v2216_v24, %v2213_v55  ;;  %v788_v40 = vsel %vm672_vm4, %v783_v27, %v787_v57  ;;  %v989_v55 = vld [vmem:[#allocation2 + $0x60] sm:$0xff] }
 0x133   : > { %v1419_v25 = vld [vmem:[#allocation2 + $0x40] sm:$0xff] }
 0x134   : > { %v6379_v23 = vpop.f32.mrf.mxu0  ;;  %v1455_v18 = vadd.f32 %v1419_v25, %v1341_v9  ;;  %1058 = vst.msk [vmem:[#allocation2 + $0x48] sm:$0xff] %vm503_vm6, %v1022_v7  ;;  %v791_v9 = vor.u32 %v789_v58, %v787_v57 }
 0x135   : > { %v1851_v26 = vld [vmem:[#allocation2 + $0x38] sm:$0xff] }
 0x136   : > { %v1887_v28 = vadd.f32 %v1851_v26, %v6257_v39  ;;  %1491 = vst.msk [vmem:[#allocation2 + $0x40] sm:$0xff] %vm503_vm6, %v1455_v18  ;;  %v1246_v39 = vsel %vm1217_vm3, %v1243_v37, %v1245_v19  ;;  %v6409_v37 = vld [vmem:[%s5953_s11 + $0x78] sm:$0xff]  ;;  %v5633_v26 = vld [vmem:[%s5953_s11 + $0x88] sm:$0xff] }
 0x137   : > { %v2417_v32 = vld [vmem:[#allocation2 + $0x30] sm:$0xff]  ;;  %v1343_v43 = vpop.f32.mrf.mxu2  ;;  %v797_v42 = vshrl.u32 %v6409_v37, 16 }
 0x138   : > { %1923 = vst.msk [vmem:[#allocation2 + $0x38] sm:$0xff] %vm503_vm6, %v1887_v28  ;;  %v2453_v33 = vadd.f32 %v2417_v32, %v6291_v13  ;;  %v2218_v13 = vsel %vm2084_vm5, %v6332_v48, %v6386_v29  ;;  %v6467_v28 = vld [vmem:[%s5953_s11 + $0x90] sm:$0xff] }
 0x139   : > { %v912_v35 = vpop.f32.mrf.mxu1  ;;  %v6417_v48 = vpop.f32.mrf.mxu3 }
 0x13a   : > { %2489 = vst.msk [vmem:[#allocation2 + $0x30] sm:$0xff] %vm503_vm6, %v2453_v33  ;;  %v1023_v41 = vadd.f32 %v987_v8, %v912_v35  ;;  %v2232_v33 = vshll.u32 %v5633_v26, 16 }
 0x13b   : > { %v1420_v44 = vld [vmem:[#allocation2 + $0x48] sm:$0xff] }
 0x13c   : > { %v6399_v36 = vpop.f32.mrf.mxu0  ;;  %v1456_v46 = vadd.f32 %v1420_v44, %v1343_v43  ;;  %1059 = vst.msk [vmem:[#allocation2 + $0x50] sm:$0xff] %vm503_vm6, %v1023_v41  ;;  %4868 = vmatmul.msk.bf16.gmra.mxu1 %vm342_vm2, %v788_v40  ;;  %4959 = vmatmul.msk.bf16.gmra.mxu2 %vm342_vm2, %v1246_v39  ;;  %v2229_v43 = vshrl.u32 %v5633_v26, 16  ;;  %v1684_v40 = vrot.slane %v6467_v28, 1  ;;  %v6479_v44 = vld [vmem:[%s5953_s11 + $0x80] sm:$0xff] }
 0x13d   : > { %v1852_v17 = vld [vmem:[#allocation2 + $0x40] sm:$0xff]  ;;  %v1249_v45 = vrot.slane %v6479_v44, 1 }
 0x13e   : > { %v1888_v50 = vadd.f32 %v1852_v17, %v6280_v3  ;;  %1492 = vst.msk [vmem:[#allocation2 + $0x48] sm:$0xff] %vm503_vm6, %v1456_v46  ;;  %v793_v3 = vshll.u32 %v6409_v37, 16  ;;  %v1685_v46 = vsel %vm1217_vm3, %v1682_v59, %v1684_v40 }
 0x13f   : > { %5141 = vmatmul.msk.bf16.gmra.mxu0 %vm342_vm2, %v2218_v13  ;;  %v2418_v54 = vld [vmem:[#allocation2 + $0x38] sm:$0xff]  ;;  %v1346_v56 = vpop.f32.mrf.mxu2  ;;  %5052 = vmatmul.msk.bf16.gmra.mxu3 %vm342_vm2, %v1683_v63  ;;  %v990_v13 = vld [vmem:[#allocation2 + $0x68] sm:$0xff] }
 0x140   : > { %1924 = vst.msk [vmem:[#allocation2 + $0x40] sm:$0xff] %vm503_vm6, %v1888_v50  ;;  %v2454_v61 = vadd.f32 %v2418_v54, %v6325_v38  ;;  %v2222_v38 = vrot.slane %v2220_v10, 1  ;;  %v795_v22 = vrot.slane %v793_v3, 1  ;;  %v2234_v10 = vrot.slane %v2232_v33, 2 }
 0x141   : > { %v914_v34 = vpop.f32.mrf.mxu1  ;;  %v6442_v51 = vpop.f32.mrf.mxu3 }
 0x142   : > { %2490 = vst.msk [vmem:[#allocation2 + $0x38] sm:$0xff] %vm503_vm6, %v2454_v61  ;;  %v1024_v52 = vadd.f32 %v988_v30, %v914_v34  ;;  %v6440_v12 = vor.u32 %v2225_v6, %v2222_v38  ;;  %v796_v24 = vsel %vm672_vm4, %v791_v9, %v795_v22  ;;  %v991_v38 = vld [vmem:[#allocation2 + $0x70] sm:$0xff] }
 0x143   : > { %v1421_v47 = vld [vmem:[#allocation2 + $0x50] sm:$0xff] }
 0x144   : > { %v6433_v4 = vpop.f32.mrf.mxu0  ;;  %v1457_v0 = vadd.f32 %v1421_v47, %v1346_v56  ;;  %1060 = vst.msk [vmem:[#allocation2 + $0x58] sm:$0xff] %vm503_vm6, %v1024_v52  ;;  %v799_v56 = vor.u32 %v797_v42, %v795_v22  ;;  %v5634_v9 = vld [vmem:[%s5953_s11 + $0x90] sm:$0xff] }
 0x145   : > { %v1853_v5 = vld [vmem:[#allocation2 + $0x48] sm:$0xff] }
 0x146   : > { %v1889_v11 = vadd.f32 %v1853_v5, %v6309_v20  ;;  %1493 = vst.msk [vmem:[#allocation2 + $0x50] sm:$0xff] %vm503_vm6, %v1457_v0  ;;  %v1248_v20 = vsel %vm1217_vm3, %v1245_v19, %v1247_v1  ;;  %v6463_v19 = vld [vmem:[%s5953_s11 + $0x80] sm:$0xff]  ;;  %v1555_v5 = vld [vmem:[%s5953_s11 + $0x98] sm:$0x1] }
 0x147   : > { %v2419_v14 = vld [vmem:[#allocation2 + $0x40] sm:$0xff]  ;;  %v1348_v21 = vpop.f32.mrf.mxu2 }
 0x148   : > { %1925 = vst.msk [vmem:[#allocation2 + $0x48] sm:$0xff] %vm503_vm6, %v1889_v11  ;;  %v2455_v16 = vadd.f32 %v2419_v14, %v6345_v60  ;;  %v2227_v60 = vsel %vm2084_vm5, %v6386_v29, %v6440_v12  ;;  %v1631_v11 = vunpack.c.l.b16 %v1555_v5 }
 0x149   : > { %v917_v7 = vpop.f32.mrf.mxu1  ;;  %v6471_v29 = vpop.f32.mrf.mxu3 }
 0x14a   : > { %2491 = vst.msk [vmem:[#allocation2 + $0x40] sm:$0xff] %vm503_vm6, %v2455_v16  ;;  %v1025_v25 = vadd.f32 %v989_v55, %v917_v7  ;;  %v2238_v7 = vshrl.u32 %v5634_v9, 16  ;;  %v2241_v55 = vshll.u32 %v5634_v9, 16 }
 0x14b   : > { %v1422_v27 = vld [vmem:[#allocation2 + $0x58] sm:$0xff] }
 0x14c   : > { %v6453_v18 = vpop.f32.mrf.mxu0  ;;  %v1458_v57 = vadd.f32 %v1422_v27, %v1348_v21  ;;  %1061 = vst.msk [vmem:[#allocation2 + $0x60] sm:$0xff] %vm503_vm6, %v1025_v25  ;;  %4869 = vmatmul.msk.bf16.gmra.mxu1 %vm342_vm2, %v796_v24  ;;  %4960 = vmatmul.msk.bf16.gmra.mxu2 %vm342_vm2, %v1248_v20  ;;  %v1650_v21 = vpack.c.b16 %v1631_v11, %v1631_v11  ;;  %v992_v27 = vld [vmem:[#allocation2 + $0x78] sm:$0xff] }
 0x14d   : > { %v1854_v15 = vld [vmem:[#allocation2 + $0x50] sm:$0xff] }
 0x14e   : > { %v1890_v32 = vadd.f32 %v1854_v15, %v6334_v49  ;;  %1494 = vst.msk [vmem:[#allocation2 + $0x58] sm:$0xff] %vm503_vm6, %v1458_v57  ;;  %v801_v49 = vshll.u32 %v6463_v19, 16  ;;  %v1686_v25 = vrot.slane %v1650_v21, 1  ;;  %v805_v57 = vshrl.u32 %v6463_v19, 16  ;;  %v6530_v15 = vld [vmem:[%s5953_s11 + $0x88] sm:$0xff] }
 0x14f   : > { %5142 = vmatmul.msk.bf16.gmra.mxu0 %vm342_vm2, %v2227_v60  ;;  %v2420_v35 = vld [vmem:[#allocation2 + $0x48] sm:$0xff]  ;;  %v1351_v8 = vpop.f32.mrf.mxu2  ;;  %5053 = vmatmul.msk.bf16.gmra.mxu3 %vm342_vm2, %v1685_v46  ;;  %v576_v19 = vld [vmem:[%s5953_s11 + $0x90] sm:$0x1] }
 0x150   : > { %1926 = vst.msk [vmem:[#allocation2 + $0x50] sm:$0xff] %vm503_vm6, %v1890_v32  ;;  %v2456_v39 = vadd.f32 %v2420_v35, %v6379_v23  ;;  %v2231_v23 = vrot.slane %v2229_v43, 1  ;;  %v803_v61 = vrot.slane %v801_v49, 1  ;;  %v1687_v32 = vsel %vm1217_vm3, %v1684_v40, %v1686_v25 }
 0x151   : > { %v919_v41 = vpop.f32.mrf.mxu1  ;;  %v6496_v30 = vpop.f32.mrf.mxu3  ;;  %v2240_v35 = vrot.slane %v2238_v7, 1  ;;  %v1251_v40 = vrot.slane %v6530_v15, 1  ;;  %v5149_v15 = vld [vmem:[%s5953_s11 + $0x8] sm:$0xc] }
 0x152   : > { %2492 = vst.msk [vmem:[#allocation2 + $0x48] sm:$0xff] %vm503_vm6, %v2456_v39  ;;  %v1026_v17 = vadd.f32 %v990_v13, %v919_v41  ;;  %v6494_v34 = vor.u32 %v2234_v10, %v2231_v23  ;;  %v804_v6 = vsel %vm672_vm4, %v799_v56, %v803_v61  ;;  %v807_v13 = vor.u32 %v805_v57, %v803_v61  ;;  %v993_v56 = vld [vmem:[#allocation2 + $0x80] sm:$0xff] }
 0x153   : > { %v1423_v53 = vld [vmem:[#allocation2 + $0x60] sm:$0xff]  ;;  %v652_v10 = vunpack.c.l.b16 %v576_v19  ;;  %v1252_v61 = vsel %vm1217_vm3, %v1249_v45, %v1251_v40 }
 0x154   : > { %v6487_v50 = vpop.f32.mrf.mxu0  ;;  %v1459_v37 = vadd.f32 %v1423_v53, %v1351_v8  ;;  %1062 = vst.msk [vmem:[#allocation2 + $0x68] sm:$0xff] %vm503_vm6, %v1026_v17 }
 0x155   : > { %v1855_v54 = vld [vmem:[#allocation2 + $0x58] sm:$0xff] }
 0x156   : > { %v1891_v59 = vadd.f32 %v1855_v54, %v6363_v2  ;;  %1495 = vst.msk [vmem:[#allocation2 + $0x60] sm:$0xff] %vm503_vm6, %v1459_v37  ;;  %v1250_v2 = vsel %vm1217_vm3, %v1247_v1, %v1249_v45  ;;  %v6518_v1 = vld [vmem:[%s5953_s11 + $0x88] sm:$0xff]  ;;  %v1988_v37 = vld [vmem:[%s5953_s11 + $0x98] sm:$0x3] }
 0x157   : > { %v2421_v58 = vld [vmem:[#allocation2 + $0x50] sm:$0xff]  ;;  %v1353_v3 = vpop.f32.mrf.mxu2 }
 0x158   : > { %1927 = vst.msk [vmem:[#allocation2 + $0x58] sm:$0xff] %vm503_vm6, %v1891_v59  ;;  %v2457_v63 = vadd.f32 %v2421_v58, %v6399_v36  ;;  %v2236_v36 = vsel %vm2084_vm5, %v6440_v12, %v6494_v34  ;;  %v2064_v59 = vunpack.c.l.b16 %v1988_v37  ;;  %v5331_v58 = vld [vmem:[%s5953_s11 + $0x10] sm:$0xc] }
 0x159   : > { %v922_v52 = vpop.f32.mrf.mxu1  ;;  %v6523_v16 = vpop.f32.mrf.mxu3 }
 0x15a   : > { %2493 = vst.msk [vmem:[#allocation2 + $0x50] sm:$0xff] %vm503_vm6, %v2457_v63  ;;  %v1027_v47 = vadd.f32 %v991_v38, %v922_v52  ;;  %v1121_v52 = vld [vmem:[%s5953_s11 + $0x90] sm:$0x1]  ;;  %v2083_v44 = vpack.c.b16 %v2064_v59, %v2064_v59 }
 0x15b   : > { %v1424_v22 = vld [vmem:[#allocation2 + $0x68] sm:$0xff] }
 0x15c   : > { %v6507_v0 = vpop.f32.mrf.mxu0  ;;  %v1460_v14 = vadd.f32 %v1424_v22, %v1353_v3  ;;  %1063 = vst.msk [vmem:[#allocation2 + $0x70] sm:$0xff] %vm503_vm6, %v1027_v47  ;;  %4870 = vmatmul.msk.bf16.gmra.mxu1 %vm342_vm2, %v804_v6  ;;  %4961 = vmatmul.msk.bf16.gmra.mxu2 %vm342_vm2, %v1250_v2  ;;  %v5671_v3 = vld [vmem:[%s5953_s11 + $0x10] sm:$0xf0]  ;;  %v5672_v6 = vld [vmem:[%s5953_s11 + $0x18] sm:$0xff] }
 0x15d   : > { %v1856_v62 = vld [vmem:[#allocation2 + $0x60] sm:$0xff]  ;;  %v5332_v2 = vor.u32 %v5671_v3, %v5331_v58  ;;  %v3528_v22 = vshrl.u32 %v5672_v6, 16  ;;  %v3531_v21 = vshll.u32 %v5672_v6, 16  ;;  %v995_v58 = vld [vmem:[#allocation2 + $0x90] sm:$0xff] }
 0x15e   : > { %v1892_v12 = vadd.f32 %v1856_v62, %v6388_v31  ;;  %1496 = vst.msk [vmem:[#allocation2 + $0x68] sm:$0xff] %vm503_vm6, %v1460_v14  ;;  %v809_v31 = vshll.u32 %v6518_v1, 16  ;;  %v1197_v14 = vunpack.c.l.b16 %v1121_v52  ;;  %v2250_v62 = vshll.u32 %v2083_v44, 16  ;;  %v5673_v3 = vld [vmem:[%s5953_s11 + $0x20] sm:$0xff] }
 0x15f   : > { %5143 = vmatmul.msk.bf16.gmra.mxu0 %vm342_vm2, %v2236_v36  ;;  %v2422_v24 = vld [vmem:[#allocation2 + $0x58] sm:$0xff]  ;;  %v1356_v20 = vpop.f32.mrf.mxu2  ;;  %5054 = vmatmul.msk.bf16.gmra.mxu3 %vm342_vm2, %v1687_v32  ;;  %v671_v36 = vpack.c.b16 %v652_v10, %v652_v10  ;;  %v3520_v45 = vshrl.u32 %v5332_v2, 16  ;;  %v3523_v9 = vshll.u32 %v5332_v2, 16  ;;  %v994_v32 = vld [vmem:[#allocation2 + $0x88] sm:$0xff]  ;;  %v3537_v6 = vshrl.u32 %v5673_v3, 16 }
 0x160   : > { %1928 = vst.msk [vmem:[#allocation2 + $0x60] sm:$0xff] %vm503_vm6, %v1892_v12  ;;  %v2458_v60 = vadd.f32 %v2422_v24, %v6433_v4  ;;  %v2243_v4 = vrot.slane %v2241_v55, 2  ;;  %v6541_v28 = vrot.slane %v809_v31, 1  ;;  %v3540_v2 = vshll.u32 %v5673_v3, 16 }
 0x161   : > { %v924_v26 = vpop.f32.mrf.mxu1  ;;  %v6548_v46 = vpop.f32.mrf.mxu3  ;;  %v3522_v55 = vrot.slane %v3520_v45, 2  ;;  %v3525_v24 = vrot.slane %v3523_v9, 3  ;;  %v5240_v45 = vld [vmem:[%s5953_s11 + $0x10] sm:$0xc]  ;;  %v5653_v9 = vld [vmem:[%s5953_s11 + $0x10] sm:$0xf0] }
 0x162   : > { %2494 = vst.msk [vmem:[#allocation2 + $0x58] sm:$0xff] %vm503_vm6, %v2458_v60  ;;  %v1028_v43 = vadd.f32 %v992_v27, %v924_v26  ;;  %v6546_v49 = vor.u32 %v2243_v4, %v2240_v35  ;;  %v3533_v26 = vrot.slane %v3531_v21, 3  ;;  %v1216_v35 = vpack.c.b16 %v1197_v14, %v1197_v14  ;;  %v5689_v21 = vld [vmem:[%s5953_s11 + $0x10] sm:$0xf0] }
 0x163   : > { %v1425_v8 = vld [vmem:[#allocation2 + $0x70] sm:$0xff]  ;;  %v3526_v57 = vor.u32 %v3525_v24, %v3522_v55 }
 0x164   : > { %v6536_v33 = vpop.f32.mrf.mxu0  ;;  %v1461_v39 = vadd.f32 %v1425_v8, %v1356_v20  ;;  %1064 = vst.msk [vmem:[#allocation2 + $0x78] sm:$0xff] %vm503_vm6, %v1028_v43  ;;  %v2245_v38 = vsel %vm2084_vm5, %v6494_v34, %v6546_v49  ;;  %v2247_v34 = vshrl.u32 %v2083_v44, 16  ;;  %v3530_v20 = vrot.slane %v3528_v22, 2  ;;  %v6626_v24 = vld [vmem:[%s5953_s11 + $0x10] sm:$0xff] }
 0x165   : > { %v1857_v41 = vld [vmem:[#allocation2 + $0x68] sm:$0xff]  ;;  %v817_v43 = vshll.u32 %v671_v36, 16  ;;  %v1253_v10 = vrot.slane %v1216_v35, 1  ;;  %v3542_v44 = vrot.slane %v3540_v2, 3 }
 0x166   : > { %v1893_v42 = vadd.f32 %v1857_v41, %v6417_v48  ;;  %1497 = vst.msk [vmem:[#allocation2 + $0x70] sm:$0xff] %vm503_vm6, %v1461_v39  ;;  %v812_v48 = vsel %vm672_vm4, %v807_v13, %v6541_v28  ;;  %v6581_v4 = vor.u32 %v3533_v26, %v3530_v20  ;;  %v2249_v19 = vrot.slane %v2247_v34, 1  ;;  %v5635_v36 = vld [vmem:[%s5953_s11 + $0x8] sm:$0xf0] }
 0x167   : > { %v2423_v17 = vld [vmem:[#allocation2 + $0x60] sm:$0xff]  ;;  %v1358_v23 = vpop.f32.mrf.mxu2  ;;  %v2252_v41 = vrot.slane %v2250_v62, 2  ;;  %v5422_v62 = vld [vmem:[%s5953_s11 + $0x10] sm:$0x8]  ;;  %v5150_v20 = vor.u32 %v5635_v36, %v5149_v15 }
 0x168   : > { %1929 = vst.msk [vmem:[#allocation2 + $0x68] sm:$0xff] %vm503_vm6, %v1893_v42  ;;  %v2459_v53 = vadd.f32 %v2423_v17, %v6453_v18 }
 0x169   : > { %v927_v54 = vpop.f32.mrf.mxu1  ;;  %v6576_v7 = vpop.f32.mrf.mxu3  ;;  %v2253_v37 = vor.u32 %v2252_v41, %v2249_v19  ;;  %v2652_v35 = vrot.slane %v5150_v20, 2 }
 0x16a   : > { %2495 = vst.msk [vmem:[#allocation2 + $0x60] sm:$0xff] %vm503_vm6, %v2459_v53  ;;  %v1029_v63 = vadd.f32 %v993_v56, %v927_v54 }
 0x16b   : > { %v1426_v47 = vld [vmem:[#allocation2 + $0x78] sm:$0xff] }
 0x16c   : > { %v6564_v18 = vpop.f32.mrf.mxu0  ;;  %v1462_v5 = vadd.f32 %v1426_v47, %v1358_v23  ;;  %1065 = vst.msk [vmem:[#allocation2 + $0x80] sm:$0xff] %vm503_vm6, %v1029_v63  ;;  %4871 = vmatmul.msk.bf16.gmra.mxu1 %vm342_vm2, %v812_v48  ;;  %4962 = vmatmul.msk.bf16.gmra.mxu2 %vm342_vm2, %v1252_v61  ;;  %v819_v23 = vrot.slane %v817_v43, 1 }
 0x16d   : > { %v1858_v11 = vld [vmem:[#allocation2 + $0x70] sm:$0xff] }
 0x16e   : > { %v1894_v12 = vadd.f32 %v1858_v11, %v6442_v51  ;;  %1498 = vst.msk [vmem:[#allocation2 + $0x78] sm:$0xff] %vm503_vm6, %v1462_v5  ;;  %v813_v51 = vshrl.u32 %v6518_v1, 16 }
 0x16f   : > { %5144 = vmatmul.msk.bf16.gmra.mxu0 %vm342_vm2, %v2245_v38  ;;  %v2424_v25 = vld [vmem:[#allocation2 + $0x68] sm:$0xff]  ;;  %v1361_v60 = vpop.f32.mrf.mxu2  ;;  %v2254_v38 = vsel %vm2084_vm5, %v6546_v49, %v2253_v37  ;;  %v3539_v49 = vrot.slane %v3537_v6, 2 }
 0x170   : > { %1930 = vst.msk [vmem:[#allocation2 + $0x70] sm:$0xff] %vm503_vm6, %v1894_v12  ;;  %v2460_v27 = vadd.f32 %v2424_v25, %v6487_v50  ;;  %v3535_v50 = vsel %vm3518_vm7, %v3526_v57, %v6581_v4  ;;  %v815_v17 = vor.u32 %v813_v51, %v6541_v28  ;;  %v6629_v25 = vld [vmem:[%s5953_s11 + $0x18] sm:$0xff] }
 0x171   : > { %v929_v31 = vpop.f32.mrf.mxu1  ;;  %5401 = vmatmul.msk.bf16.vlgmr.msra.gmra.mxu3 %vm342_vm2, %v3535_v50  ;;  %v6593_v54 = vpop.f32.mrf.mxu3  ;;  %v6619_v34 = vor.u32 %v3542_v44, %v3539_v49  ;;  %v998_v49 = vld [vmem:[#allocation2 + $0xa8] sm:$0xff]  ;;  %v6675_v44 = vld [vmem:[%s5953_s11 + $0x18] sm:$0xff] }
 0x172   : > { %2496 = vst.msk [vmem:[#allocation2 + $0x68] sm:$0xff] %vm503_vm6, %v2460_v27  ;;  %v1030_v8 = vadd.f32 %v994_v32, %v929_v31  ;;  %v820_v28 = vsel %vm672_vm4, %v815_v17, %v819_v23  ;;  %v6638_v31 = vld [vmem:[%s5953_s11 + $0x18] sm:$0xff] }
 0x173   : > { %v1427_v13 = vld [vmem:[#allocation2 + $0x80] sm:$0xff]  ;;  %v3544_v26 = vsel %vm3518_vm7, %v6581_v4, %v6619_v34  ;;  %v3086_v4 = vrot.slane %v6629_v25, 2  ;;  %v4087_v50 = vrot.slane %v6638_v31, 3 }
 0x174   : > { %v6584_v39 = vpop.f32.mrf.mxu0  ;;  %v1463_v42 = vadd.f32 %v1427_v13, %v1361_v60  ;;  %1066 = vst.msk [vmem:[#allocation2 + $0x88] sm:$0xff] %vm503_vm6, %v1030_v8  ;;  %v5241_v60 = vor.u32 %v5653_v9, %v5240_v45  ;;  %v2653_v8 = vrot.slane %v6626_v24, 2 }
 0x175   : > { %v1859_v1 = vld [vmem:[#allocation2 + $0x78] sm:$0xff] }
 0x176   : > { %v1895_v53 = vadd.f32 %v1859_v1, %v6471_v29  ;;  %1499 = vst.msk [vmem:[#allocation2 + $0x80] sm:$0xff] %vm503_vm6, %v1463_v42  ;;  %v1254_v29 = vsel %vm1217_vm3, %v1251_v40, %v1253_v10  ;;  %v3085_v19 = vrot.slane %v5241_v60, 2 }
 0x177   : > { %v2425_v56 = vld [vmem:[#allocation2 + $0x70] sm:$0xff]  ;;  %v1363_v48 = vpop.f32.mrf.mxu2 }
 0x178   : > { %1931 = vst.msk [vmem:[#allocation2 + $0x78] sm:$0xff] %vm503_vm6, %v1895_v53  ;;  %v2461_v61 = vadd.f32 %v2425_v56, %v6507_v0  ;;  %v997_v53 = vld [vmem:[#allocation2 + $0xa0] sm:$0xff]  ;;  %v3087_v37 = vsel %vm2651_vm8, %v3085_v19, %v3086_v4  ;;  %v5674_v56 = vld [vmem:[%s5953_s11 + $0x28] sm:$0xff] }
 0x179   : > { %v932_v59 = vpop.f32.mrf.mxu1  ;;  %v6617_v22 = vpop.f32.mrf.mxu3 }
 0x17a   : > { %2497 = vst.msk [vmem:[#allocation2 + $0x70] sm:$0xff] %vm503_vm6, %v2461_v61  ;;  %v1031_v63 = vadd.f32 %v995_v58, %v932_v59  ;;  %v3546_v58 = vshrl.u32 %v5674_v56, 16 }
 0x17b   : > { %v1428_v0 = vld [vmem:[#allocation2 + $0x88] sm:$0xff] }
 0x17c   : > { %v6603_v52 = vpop.f32.mrf.mxu0  ;;  %v1464_v47 = vadd.f32 %v1428_v0, %v1363_v48  ;;  %1067 = vst.msk [vmem:[#allocation2 + $0x90] sm:$0xff] %vm503_vm6, %v1031_v63  ;;  %4872 = vmatmul.msk.bf16.gmra.mxu1 %vm342_vm2, %v820_v28  ;;  %4963 = vmatmul.msk.bf16.gmra.mxu2 %vm342_vm2, %v1254_v29  ;;  %v3549_v28 = vshll.u32 %v5674_v56, 16  ;;  %v3548_v63 = vrot.slane %v3546_v58, 2  ;;  %v6732_v56 = vld [vmem:[%s5953_s11 + $0x28] sm:$0xff] }
 0x17d   : > { %v1860_v40 = vld [vmem:[#allocation2 + $0x80] sm:$0xff] }
 0x17e   : > { %v1896_v5 = vadd.f32 %v1860_v40, %v6496_v30  ;;  %1500 = vst.msk [vmem:[#allocation2 + $0x88] sm:$0xff] %vm503_vm6, %v1464_v47  ;;  %v996_v30 = vld [vmem:[#allocation2 + $0x98] sm:$0xff] }
 0x17f   : > { %5145 = vmatmul.msk.bf16.gmra.mxu0 %vm342_vm2, %v2254_v38  ;;  %v2426_v11 = vld [vmem:[#allocation2 + $0x78] sm:$0xff]  ;;  %v1366_v14 = vpop.f32.mrf.mxu2  ;;  %v3551_v38 = vrot.slane %v3549_v28, 3 }
 0x180   : > { %1932 = vst.msk [vmem:[#allocation2 + $0x80] sm:$0xff] %vm503_vm6, %v1896_v5  ;;  %v2462_v12 = vadd.f32 %v2426_v11, %v6536_v33  ;;  %v5423_v33 = vor.u32 %v5689_v21, %v5422_v62  ;;  %v6678_v5 = vld [vmem:[%s5953_s11 + $0x20] sm:$0xff]  ;;  %v2655_v21 = vrot.slane %v6675_v44, 2 }
 0x181   : > { %v934_v55 = vpop.f32.mrf.mxu1  ;;  %5402 = vmatmul.msk.bf16.gmra.mxu3 %vm342_vm2, %v3544_v26  ;;  %v3552_v15 = vor.u32 %v3551_v38, %v3548_v63  ;;  %v6686_v11 = vld [vmem:[%s5953_s11 + $0x20] sm:$0xff] }
 0x182   : > { %2498 = vst.msk [vmem:[#allocation2 + $0x78] sm:$0xff] %vm503_vm6, %v2462_v12  ;;  %v1032_v27 = vadd.f32 %v996_v30, %v934_v55  ;;  %v4086_v13 = vrot.slane %v5423_v33, 3  ;;  %v6647_v42 = vpop.f32.mrf.mxu3  ;;  %v3088_v12 = vrot.slane %v6678_v5, 2  ;;  %v4089_v55 = vrot.slane %v6686_v11, 3  ;;  %v999_v33 = vld [vmem:[#allocation2 + $0xb0] sm:$0xff] }
 0x183   : > { %v1429_v32 = vld [vmem:[#allocation2 + $0x90] sm:$0xff] }
 0x184   : > { %v6635_v57 = vpop.f32.mrf.mxu0  ;;  %v1465_v51 = vadd.f32 %v1429_v32, %v1366_v14  ;;  %1068 = vst.msk [vmem:[#allocation2 + $0x98] sm:$0xff] %vm503_vm6, %v1032_v27  ;;  %v3089_v32 = vsel %vm2651_vm8, %v3086_v4, %v3088_v12 }
 0x185   : > { %v1861_v43 = vld [vmem:[#allocation2 + $0x88] sm:$0xff] }
 0x186   : > { %v1897_v41 = vadd.f32 %v1861_v43, %v6523_v16  ;;  %1501 = vst.msk [vmem:[#allocation2 + $0x90] sm:$0xff] %vm503_vm6, %v1465_v51  ;;  %v2654_v16 = vsel %vm2651_vm8, %v2652_v35, %v2653_v8  ;;  %v5675_v51 = vld [vmem:[%s5953_s11 + $0x30] sm:$0xff] }
 0x187   : > { %v2427_v1 = vld [vmem:[#allocation2 + $0x80] sm:$0xff]  ;;  %v1368_v17 = vpop.f32.mrf.mxu2  ;;  %v3558_v19 = vshll.u32 %v5675_v51, 16 }
 0x188   : > { %1933 = vst.msk [vmem:[#allocation2 + $0x88] sm:$0xff] %vm503_vm6, %v1897_v41  ;;  %v2463_v23 = vadd.f32 %v2427_v1, %v6564_v18  ;;  %v4088_v18 = vsel %vm4085_vm9, %v4086_v13, %v4087_v50 }
 0x189   : > { %v937_v10 = vpop.f32.mrf.mxu1  ;;  %v3560_v13 = vrot.slane %v3558_v19, 3 }
 0x18a   : > { %2499 = vst.msk [vmem:[#allocation2 + $0x80] sm:$0xff] %vm503_vm6, %v2463_v23  ;;  %v1033_v48 = vadd.f32 %v997_v53, %v937_v10  ;;  %v6670_v6 = vpop.f32.mrf.mxu3 }
 0x18b   : > { %v1430_v59 = vld [vmem:[#allocation2 + $0x98] sm:$0xff] }
 0x18c   : > { %v6659_v61 = vpop.f32.mrf.mxu0  ;;  %v1466_v29 = vadd.f32 %v1430_v59, %v1368_v17  ;;  %1069 = vst.msk [vmem:[#allocation2 + $0xa0] sm:$0xff] %vm503_vm6, %v1033_v48  ;;  %5219 = vmatmul.msk.bf16.vlgmr.msra.gmra.mxu1 %vm342_vm2, %v2654_v16  ;;  %5310 = vmatmul.msk.bf16.vlgmr.msra.gmra.mxu2 %vm342_vm2, %v3087_v37  ;;  %v1000_v16 = vld [vmem:[#allocation2 + $0xb8] sm:$0xff]  ;;  %v6729_v37 = vld [vmem:[%s5953_s11 + $0x20] sm:$0xff]  ;;  %v6739_v59 = vld [vmem:[%s5953_s11 + $0x28] sm:$0xff] }
 0x18d   : > { %v1862_v3 = vld [vmem:[#allocation2 + $0x90] sm:$0xff]  ;;  %v4091_v38 = vrot.slane %v6739_v59, 3 }
 0x18e   : > { %v1898_v0 = vadd.f32 %v1862_v3, %v6548_v46  ;;  %1502 = vst.msk [vmem:[#allocation2 + $0x98] sm:$0xff] %vm503_vm6, %v1466_v29  ;;  %v3553_v46 = vsel %vm3518_vm7, %v6619_v34, %v3552_v15  ;;  %v2657_v29 = vrot.slane %v6729_v37, 2  ;;  %v3090_v3 = vrot.slane %v6732_v56, 2 }
 0x18f   : > { %5492 = vmatmul.msk.bf16.vlgmr.msra.gmra.mxu0 %vm342_vm2, %v4088_v18  ;;  %v2428_v2 = vld [vmem:[#allocation2 + $0x88] sm:$0xff]  ;;  %v1371_v47 = vpop.f32.mrf.mxu2 }
 0x190   : > { %1934 = vst.msk [vmem:[#allocation2 + $0x90] sm:$0xff] %vm503_vm6, %v1898_v0  ;;  %v2464_v40 = vadd.f32 %v2428_v2, %v6584_v39 }
 0x191   : > { %v939_v36 = vpop.f32.mrf.mxu1  ;;  %5403 = vmatmul.msk.bf16.gmra.mxu3 %vm342_vm2, %v3553_v46  ;;  %v5676_v46 = vld [vmem:[%s5953_s11 + $0x38] sm:$0xff] }
 0x192   : > { %2500 = vst.msk [vmem:[#allocation2 + $0x88] sm:$0xff] %vm503_vm6, %v2464_v40  ;;  %v1034_v45 = vadd.f32 %v998_v49, %v939_v36  ;;  %v6695_v30 = vpop.f32.mrf.mxu3  ;;  %v1001_v36 = vld [vmem:[#allocation2 + $0xc0] sm:$0xff]  ;;  %v3091_v49 = vsel %vm2651_vm8, %v3088_v12, %v3090_v3 }
 0x193   : > { %v1431_v14 = vld [vmem:[#allocation2 + $0xa0] sm:$0xff] }
 0x194   : > { %v6683_v9 = vpop.f32.mrf.mxu0  ;;  %v1467_v62 = vadd.f32 %v1431_v14, %v1371_v47  ;;  %1070 = vst.msk [vmem:[#allocation2 + $0xa8] sm:$0xff] %vm503_vm6, %v1034_v45 }
 0x195   : > { %v1863_v39 = vld [vmem:[#allocation2 + $0x98] sm:$0xff] }
 0x196   : > { %v1899_v34 = vadd.f32 %v1863_v39, %v6576_v7  ;;  %1503 = vst.msk [vmem:[#allocation2 + $0xa0] sm:$0xff] %vm503_vm6, %v1467_v62  ;;  %v2656_v7 = vsel %vm2651_vm8, %v2653_v8, %v2655_v21  ;;  %v3555_v8 = vshrl.u32 %v5675_v51, 16  ;;  %v3564_v62 = vshrl.u32 %v5676_v46, 16  ;;  %v6785_v51 = vld [vmem:[%s5953_s11 + $0x30] sm:$0xff] }
 0x197   : > { %v2429_v20 = vld [vmem:[#allocation2 + $0x90] sm:$0xff]  ;;  %v1373_v60 = vpop.f32.mrf.mxu2  ;;  %v3567_v39 = vshll.u32 %v5676_v46, 16  ;;  %v6838_v46 = vld [vmem:[%s5953_s11 + $0x38] sm:$0xff] }
 0x198   : > { %1935 = vst.msk [vmem:[#allocation2 + $0x98] sm:$0xff] %vm503_vm6, %v1899_v34  ;;  %v2465_v26 = vadd.f32 %v2429_v20, %v6603_v52  ;;  %v4090_v52 = vsel %vm4085_vm9, %v4087_v50, %v4089_v55  ;;  %v3557_v4 = vrot.slane %v3555_v8, 2  ;;  %v3566_v12 = vrot.slane %v3564_v62, 2 }
 0x199   : > { %v942_v27 = vpop.f32.mrf.mxu1  ;;  %v3569_v34 = vrot.slane %v3567_v39, 3 }
 0x19a   : > { %2501 = vst.msk [vmem:[#allocation2 + $0x90] sm:$0xff] %vm503_vm6, %v2465_v26  ;;  %v1035_v43 = vadd.f32 %v999_v33, %v942_v27  ;;  %v6724_v50 = vpop.f32.mrf.mxu3  ;;  %v3561_v23 = vor.u32 %v3560_v13, %v3557_v4 }
 0x19b   : > { %v1432_v24 = vld [vmem:[#allocation2 + $0xa8] sm:$0xff]  ;;  %v3570_v26 = vor.u32 %v3569_v34, %v3566_v12 }
 0x19c   : > { %v6711_v35 = vpop.f32.mrf.mxu0  ;;  %v1468_v41 = vadd.f32 %v1432_v24, %v1373_v60  ;;  %1071 = vst.msk [vmem:[#allocation2 + $0xb0] sm:$0xff] %vm503_vm6, %v1035_v43  ;;  %5220 = vmatmul.msk.bf16.gmra.mxu1 %vm342_vm2, %v2656_v7  ;;  %5311 = vmatmul.msk.bf16.gmra.mxu2 %vm342_vm2, %v3089_v32  ;;  %v1002_v7 = vld [vmem:[#allocation2 + $0xc8] sm:$0xff]  ;;  %v6792_v24 = vld [vmem:[%s5953_s11 + $0x30] sm:$0xff] }
 0x19d   : > { %v1864_v25 = vld [vmem:[#allocation2 + $0xa0] sm:$0xff]  ;;  %v6782_v32 = vld [vmem:[%s5953_s11 + $0x28] sm:$0xff]  ;;  %v4093_v13 = vrot.slane %v6792_v24, 3 }
 0x19e   : > { %v1900_v31 = vadd.f32 %v1864_v25, %v6593_v54  ;;  %1504 = vst.msk [vmem:[#allocation2 + $0xa8] sm:$0xff] %vm503_vm6, %v1468_v41  ;;  %v3562_v54 = vsel %vm3518_vm7, %v3552_v15, %v3561_v23  ;;  %v2659_v41 = vrot.slane %v6782_v32, 2  ;;  %v3092_v25 = vrot.slane %v6785_v51, 2 }
 0x19f   : > { %5493 = vmatmul.msk.bf16.gmra.mxu0 %vm342_vm2, %v4090_v52  ;;  %v2430_v1 = vld [vmem:[#allocation2 + $0x98] sm:$0xff]  ;;  %v1376_v17 = vpop.f32.mrf.mxu2 }
 0x1a0   : > { %1936 = vst.msk [vmem:[#allocation2 + $0xa0] sm:$0xff] %vm503_vm6, %v1900_v31  ;;  %v2466_v10 = vadd.f32 %v2430_v1, %v6635_v57 }
 0x1a1   : > { %v944_v53 = vpop.f32.mrf.mxu1  ;;  %5404 = vmatmul.msk.bf16.gmra.mxu3 %vm342_vm2, %v3562_v54  ;;  %v5677_v54 = vld [vmem:[%s5953_s11 + $0x40] sm:$0xff] }
 0x1a2   : > { %2502 = vst.msk [vmem:[#allocation2 + $0x98] sm:$0xff] %vm503_vm6, %v2466_v10  ;;  %v1036_v48 = vadd.f32 %v1000_v16, %v944_v53  ;;  %v6748_v0 = vpop.f32.mrf.mxu3  ;;  %v1003_v53 = vld [vmem:[#allocation2 + $0xd0] sm:$0xff]  ;;  %v3093_v16 = vsel %vm2651_vm8, %v3090_v3, %v3092_v25 }
 0x1a3   : > { %v1433_v58 = vld [vmem:[#allocation2 + $0xb0] sm:$0xff] }
 0x1a4   : > { %v6736_v18 = vpop.f32.mrf.mxu0  ;;  %v1469_v28 = vadd.f32 %v1433_v58, %v1376_v17  ;;  %1072 = vst.msk [vmem:[#allocation2 + $0xb8] sm:$0xff] %vm503_vm6, %v1036_v48 }
 0x1a5   : > { %v1865_v57 = vld [vmem:[#allocation2 + $0xa8] sm:$0xff] }
 0x1a6   : > { %v1901_v63 = vadd.f32 %v1865_v57, %v6617_v22  ;;  %1505 = vst.msk [vmem:[#allocation2 + $0xb0] sm:$0xff] %vm503_vm6, %v1469_v28  ;;  %v2658_v22 = vsel %vm2651_vm8, %v2655_v21, %v2657_v29  ;;  %v3573_v28 = vshrl.u32 %v5677_v54, 16  ;;  %v3576_v57 = vshll.u32 %v5677_v54, 16  ;;  %v6891_v54 = vld [vmem:[%s5953_s11 + $0x40] sm:$0xff] }
 0x1a7   : > { %v2431_v2 = vld [vmem:[#allocation2 + $0xa0] sm:$0xff]  ;;  %v1378_v47 = vpop.f32.mrf.mxu2 }
 0x1a8   : > { %1937 = vst.msk [vmem:[#allocation2 + $0xa8] sm:$0xff] %vm503_vm6, %v1901_v63  ;;  %v2467_v15 = vadd.f32 %v2431_v2, %v6659_v61  ;;  %v4092_v61 = vsel %vm4085_vm9, %v4089_v55, %v4091_v38  ;;  %v3575_v3 = vrot.slane %v3573_v28, 2  ;;  %v3578_v63 = vrot.slane %v3576_v57, 3 }
 0x1a9   : > { %v947_v40 = vpop.f32.mrf.mxu1 }
 0x1aa   : > { %2503 = vst.msk [vmem:[#allocation2 + $0xa0] sm:$0xff] %vm503_vm6, %v2467_v15  ;;  %v1037_v45 = vadd.f32 %v1001_v36, %v947_v40  ;;  %v6777_v55 = vpop.f32.mrf.mxu3  ;;  %v3579_v15 = vor.u32 %v3578_v63, %v3575_v3 }
 0x1ab   : > { %v1434_v44 = vld [vmem:[#allocation2 + $0xb8] sm:$0xff] }
 0x1ac   : > { %v6764_v14 = vpop.f32.mrf.mxu0  ;;  %v1470_v21 = vadd.f32 %v1434_v44, %v1378_v47  ;;  %1073 = vst.msk [vmem:[#allocation2 + $0xc0] sm:$0xff] %vm503_vm6, %v1037_v45  ;;  %5221 = vmatmul.msk.bf16.gmra.mxu1 %vm342_vm2, %v2658_v22  ;;  %5312 = vmatmul.msk.bf16.gmra.mxu2 %vm342_vm2, %v3091_v49  ;;  %v1004_v22 = vld [vmem:[#allocation2 + $0xd8] sm:$0xff]  ;;  %v6835_v49 = vld [vmem:[%s5953_s11 + $0x30] sm:$0xff] }
 0x1ad   : > { %v1866_v5 = vld [vmem:[#allocation2 + $0xb0] sm:$0xff]  ;;  %v6845_v44 = vld [vmem:[%s5953_s11 + $0x38] sm:$0xff] }
 0x1ae   : > { %v1902_v11 = vadd.f32 %v1866_v5, %v6647_v42  ;;  %1506 = vst.msk [vmem:[#allocation2 + $0xb8] sm:$0xff] %vm503_vm6, %v1470_v21  ;;  %v3571_v42 = vsel %vm3518_vm7, %v3561_v23, %v3570_v26  ;;  %v2661_v21 = vrot.slane %v6835_v49, 2  ;;  %v3094_v5 = vrot.slane %v6838_v46, 2 }
 0x1af   : > { %5494 = vmatmul.msk.bf16.gmra.mxu0 %vm342_vm2, %v4092_v61  ;;  %v2432_v20 = vld [vmem:[#allocation2 + $0xa8] sm:$0xff]  ;;  %v1381_v60 = vpop.f32.mrf.mxu2  ;;  %v4095_v34 = vrot.slane %v6845_v44, 3 }
 0x1b0   : > { %1938 = vst.msk [vmem:[#allocation2 + $0xb0] sm:$0xff] %vm503_vm6, %v1902_v11  ;;  %v2468_v27 = vadd.f32 %v2432_v20, %v6683_v9 }
 0x1b1   : > { %v949_v33 = vpop.f32.mrf.mxu1  ;;  %5405 = vmatmul.msk.bf16.gmra.mxu3 %vm342_vm2, %v3571_v42  ;;  %v5678_v42 = vld [vmem:[%s5953_s11 + $0x48] sm:$0xff] }
 0x1b2   : > { %2504 = vst.msk [vmem:[#allocation2 + $0xa8] sm:$0xff] %vm503_vm6, %v2468_v27  ;;  %v1038_v43 = vadd.f32 %v1002_v7, %v949_v33  ;;  %v6801_v31 = vpop.f32.mrf.mxu3  ;;  %v1005_v33 = vld [vmem:[#allocation2 + $0xe0] sm:$0xff]  ;;  %v3095_v7 = vsel %vm2651_vm8, %v3092_v25, %v3094_v5 }
 0x1b3   : > { %v1435_v8 = vld [vmem:[#allocation2 + $0xc0] sm:$0xff] }
 0x1b4   : > { %v6789_v52 = vpop.f32.mrf.mxu0  ;;  %v1471_v19 = vadd.f32 %v1435_v8, %v1381_v60  ;;  %1074 = vst.msk [vmem:[#allocation2 + $0xc8] sm:$0xff] %vm503_vm6, %v1038_v43 }
 0x1b5   : > { %v1867_v9 = vld [vmem:[#allocation2 + $0xb8] sm:$0xff] }
 0x1b6   : > { %v1903_v4 = vadd.f32 %v1867_v9, %v6670_v6  ;;  %1507 = vst.msk [vmem:[#allocation2 + $0xc0] sm:$0xff] %vm503_vm6, %v1471_v19  ;;  %v2660_v6 = vsel %vm2651_vm8, %v2657_v29, %v2659_v41  ;;  %v3582_v19 = vshrl.u32 %v5678_v42, 16  ;;  %v3585_v9 = vshll.u32 %v5678_v42, 16  ;;  %v6944_v42 = vld [vmem:[%s5953_s11 + $0x48] sm:$0xff] }
 0x1b7   : > { %v2433_v1 = vld [vmem:[#allocation2 + $0xb0] sm:$0xff]  ;;  %v1383_v17 = vpop.f32.mrf.mxu2 }
 0x1b8   : > { %1939 = vst.msk [vmem:[#allocation2 + $0xb8] sm:$0xff] %vm503_vm6, %v1903_v4  ;;  %v2469_v23 = vadd.f32 %v2433_v1, %v6711_v35  ;;  %v4094_v35 = vsel %vm4085_vm9, %v4091_v38, %v4093_v13  ;;  %v3584_v25 = vrot.slane %v3582_v19, 2  ;;  %v3587_v4 = vrot.slane %v3585_v9, 3 }
 0x1b9   : > { %v952_v10 = vpop.f32.mrf.mxu1 }
 0x1ba   : > { %2505 = vst.msk [vmem:[#allocation2 + $0xb0] sm:$0xff] %vm503_vm6, %v2469_v23  ;;  %v1039_v48 = vadd.f32 %v1003_v53, %v952_v10  ;;  %v6830_v38 = vpop.f32.mrf.mxu3  ;;  %v3588_v23 = vor.u32 %v3587_v4, %v3584_v25 }
 0x1bb   : > { %v1436_v37 = vld [vmem:[#allocation2 + $0xc8] sm:$0xff] }
 0x1bc   : > { %v6817_v58 = vpop.f32.mrf.mxu0  ;;  %v1472_v29 = vadd.f32 %v1436_v37, %v1383_v17  ;;  %1075 = vst.msk [vmem:[#allocation2 + $0xd0] sm:$0xff] %vm503_vm6, %v1039_v48  ;;  %5222 = vmatmul.msk.bf16.gmra.mxu1 %vm342_vm2, %v2660_v6  ;;  %5313 = vmatmul.msk.bf16.gmra.mxu2 %vm342_vm2, %v3093_v16  ;;  %v1006_v6 = vld [vmem:[#allocation2 + $0xe8] sm:$0xff]  ;;  %v6888_v16 = vld [vmem:[%s5953_s11 + $0x38] sm:$0xff]  ;;  %v6898_v37 = vld [vmem:[%s5953_s11 + $0x40] sm:$0xff] }
 0x1bd   : > { %v1868_v56 = vld [vmem:[#allocation2 + $0xc0] sm:$0xff]  ;;  %v4097_v63 = vrot.slane %v6898_v37, 3 }
 0x1be   : > { %v1904_v59 = vadd.f32 %v1868_v56, %v6695_v30  ;;  %1508 = vst.msk [vmem:[#allocation2 + $0xc8] sm:$0xff] %vm503_vm6, %v1472_v29  ;;  %v3580_v30 = vsel %vm3518_vm7, %v3570_v26, %v3579_v15  ;;  %v2663_v29 = vrot.slane %v6888_v16, 2  ;;  %v3096_v56 = vrot.slane %v6891_v54, 2 }
 0x1bf   : > { %5495 = vmatmul.msk.bf16.gmra.mxu0 %vm342_vm2, %v4094_v35  ;;  %v2434_v2 = vld [vmem:[#allocation2 + $0xb8] sm:$0xff]  ;;  %v1386_v47 = vpop.f32.mrf.mxu2 }
 0x1c0   : > { %1940 = vst.msk [vmem:[#allocation2 + $0xc0] sm:$0xff] %vm503_vm6, %v1904_v59  ;;  %v2470_v40 = vadd.f32 %v2434_v2, %v6736_v18 }
 0x1c1   : > { %v954_v36 = vpop.f32.mrf.mxu1  ;;  %5406 = vmatmul.msk.bf16.gmra.mxu3 %vm342_vm2, %v3580_v30  ;;  %v5679_v30 = vld [vmem:[%s5953_s11 + $0x50] sm:$0xff] }
 0x1c2   : > { %2506 = vst.msk [vmem:[#allocation2 + $0xb8] sm:$0xff] %vm503_vm6, %v2470_v40  ;;  %v1040_v45 = vadd.f32 %v1004_v22, %v954_v36  ;;  %v6854_v11 = vpop.f32.mrf.mxu3  ;;  %v1007_v36 = vld [vmem:[#allocation2 + $0xf0] sm:$0xff]  ;;  %v3097_v22 = vsel %vm2651_vm8, %v3094_v5, %v3096_v56 }
 0x1c3   : > { %v1437_v62 = vld [vmem:[#allocation2 + $0xd0] sm:$0xff] }
 0x1c4   : > { %v6842_v61 = vpop.f32.mrf.mxu0  ;;  %v1473_v39 = vadd.f32 %v1437_v62, %v1386_v47  ;;  %1076 = vst.msk [vmem:[#allocation2 + $0xd8] sm:$0xff] %vm503_vm6, %v1040_v45 }
 0x1c5   : > { %v1869_v18 = vld [vmem:[#allocation2 + $0xc8] sm:$0xff] }
 0x1c6   : > { %v1905_v12 = vadd.f32 %v1869_v18, %v6724_v50  ;;  %1509 = vst.msk [vmem:[#allocation2 + $0xd0] sm:$0xff] %vm503_vm6, %v1473_v39  ;;  %v2662_v50 = vsel %vm2651_vm8, %v2659_v41, %v2661_v21  ;;  %v3591_v39 = vshrl.u32 %v5679_v30, 16  ;;  %v3594_v18 = vshll.u32 %v5679_v30, 16  ;;  %v6997_v30 = vld [vmem:[%s5953_s11 + $0x50] sm:$0xff] }
 0x1c7   : > { %v2435_v20 = vld [vmem:[#allocation2 + $0xc0] sm:$0xff]  ;;  %v1388_v60 = vpop.f32.mrf.mxu2 }
 0x1c8   : > { %1941 = vst.msk [vmem:[#allocation2 + $0xc8] sm:$0xff] %vm503_vm6, %v1905_v12  ;;  %v2471_v26 = vadd.f32 %v2435_v20, %v6764_v14  ;;  %v4096_v14 = vsel %vm4085_vm9, %v4093_v13, %v4095_v34  ;;  %v3593_v5 = vrot.slane %v3591_v39, 2  ;;  %v3596_v12 = vrot.slane %v3594_v18, 3 }
 0x1c9   : > { %v957_v27 = vpop.f32.mrf.mxu1 }
 0x1ca   : > { %2507 = vst.msk [vmem:[#allocation2 + $0xc0] sm:$0xff] %vm503_vm6, %v2471_v26  ;;  %v1041_v43 = vadd.f32 %v1005_v33, %v957_v27  ;;  %v6883_v13 = vpop.f32.mrf.mxu3  ;;  %v3597_v26 = vor.u32 %v3596_v12, %v3593_v5 }
 0x1cb   : > { %v1438_v32 = vld [vmem:[#allocation2 + $0xd8] sm:$0xff] }
 0x1cc   : > { %v6870_v8 = vpop.f32.mrf.mxu0  ;;  %v1474_v41 = vadd.f32 %v1438_v32, %v1388_v60  ;;  %1077 = vst.msk [vmem:[#allocation2 + $0xe0] sm:$0xff] %vm503_vm6, %v1041_v43  ;;  %5223 = vmatmul.msk.bf16.gmra.mxu1 %vm342_vm2, %v2662_v50  ;;  %5314 = vmatmul.msk.bf16.gmra.mxu2 %vm342_vm2, %v3095_v7  ;;  %v1008_v50 = vld [vmem:[#allocation2 + $0xf8] sm:$0xff]  ;;  %v6941_v7 = vld [vmem:[%s5953_s11 + $0x40] sm:$0xff]  ;;  %v6951_v32 = vld [vmem:[%s5953_s11 + $0x48] sm:$0xff] }
 0x1cd   : > { %v1870_v51 = vld [vmem:[#allocation2 + $0xd0] sm:$0xff]  ;;  %v4099_v4 = vrot.slane %v6951_v32, 3 }
 0x1ce   : > { %v1906_v24 = vadd.f32 %v1870_v51, %v6748_v0  ;;  %1510 = vst.msk [vmem:[#allocation2 + $0xd8] sm:$0xff] %vm503_vm6, %v1474_v41  ;;  %v3589_v0 = vsel %vm3518_vm7, %v3579_v15, %v3588_v23  ;;  %v2665_v41 = vrot.slane %v6941_v7, 2  ;;  %v3098_v51 = vrot.slane %v6944_v42, 2 }
 0x1cf   : > { %5496 = vmatmul.msk.bf16.gmra.mxu0 %vm342_vm2, %v4096_v14  ;;  %v2436_v1 = vld [vmem:[#allocation2 + $0xc8] sm:$0xff]  ;;  %v1391_v17 = vpop.f32.mrf.mxu2 }
 0x1d0   : > { %1942 = vst.msk [vmem:[#allocation2 + $0xd0] sm:$0xff] %vm503_vm6, %v1906_v24  ;;  %v2472_v10 = vadd.f32 %v2436_v1, %v6789_v52 }
 0x1d1   : > { %v959_v53 = vpop.f32.mrf.mxu1  ;;  %5407 = vmatmul.msk.bf16.gmra.mxu3 %vm342_vm2, %v3589_v0  ;;  %v5680_v0 = vld [vmem:[%s5953_s11 + $0x58] sm:$0xff] }
 0x1d2   : > { %2508 = vst.msk [vmem:[#allocation2 + $0xc8] sm:$0xff] %vm503_vm6, %v2472_v10  ;;  %v1042_v48 = vadd.f32 %v1006_v6, %v959_v53  ;;  %v6907_v59 = vpop.f32.mrf.mxu3  ;;  %v1009_v53 = vld [vmem:[#allocation2 + $0x100] sm:$0xff]  ;;  %v3099_v6 = vsel %vm2651_vm8, %v3096_v56, %v3098_v51 }
 0x1d3   : > { %v1439_v28 = vld [vmem:[#allocation2 + $0xe0] sm:$0xff] }
 0x1d4   : > { %v6895_v35 = vpop.f32.mrf.mxu0  ;;  %v1475_v57 = vadd.f32 %v1439_v28, %v1391_v17  ;;  %1078 = vst.msk [vmem:[#allocation2 + $0xe8] sm:$0xff] %vm503_vm6, %v1042_v48 }
 0x1d5   : > { %v1871_v52 = vld [vmem:[#allocation2 + $0xd8] sm:$0xff] }
 0x1d6   : > { %v1907_v3 = vadd.f32 %v1871_v52, %v6777_v55  ;;  %1511 = vst.msk [vmem:[#allocation2 + $0xe0] sm:$0xff] %vm503_vm6, %v1475_v57  ;;  %v2664_v55 = vsel %vm2651_vm8, %v2661_v21, %v2663_v29  ;;  %v3600_v57 = vshrl.u32 %v5680_v0, 16  ;;  %v3603_v52 = vshll.u32 %v5680_v0, 16  ;;  %v7052_v0 = vld [vmem:[%s5953_s11 + $0x58] sm:$0xff] }
 0x1d7   : > { %v2437_v2 = vld [vmem:[#allocation2 + $0xd0] sm:$0xff]  ;;  %v1393_v47 = vpop.f32.mrf.mxu2 }
 0x1d8   : > { %1943 = vst.msk [vmem:[#allocation2 + $0xd8] sm:$0xff] %vm503_vm6, %v1907_v3  ;;  %v2473_v15 = vadd.f32 %v2437_v2, %v6817_v58  ;;  %v4098_v58 = vsel %vm4085_vm9, %v4095_v34, %v4097_v63  ;;  %v3602_v56 = vrot.slane %v3600_v57, 2  ;;  %v3605_v3 = vrot.slane %v3603_v52, 3 }
 0x1d9   : > { %v962_v40 = vpop.f32.mrf.mxu1 }
 0x1da   : > { %2509 = vst.msk [vmem:[#allocation2 + $0xd0] sm:$0xff] %vm503_vm6, %v2473_v15  ;;  %v1043_v45 = vadd.f32 %v1007_v36, %v962_v40  ;;  %v6936_v34 = vpop.f32.mrf.mxu3  ;;  %v3606_v15 = vor.u32 %v3605_v3, %v3602_v56 }
 0x1db   : > { %v1440_v49 = vld [vmem:[#allocation2 + $0xe8] sm:$0xff] }
 0x1dc   : > { %v6923_v62 = vpop.f32.mrf.mxu0  ;;  %v1476_v21 = vadd.f32 %v1440_v49, %v1393_v47  ;;  %1079 = vst.msk [vmem:[#allocation2 + $0xf0] sm:$0xff] %vm503_vm6, %v1043_v45  ;;  %5224 = vmatmul.msk.bf16.gmra.mxu1 %vm342_vm2, %v2664_v55  ;;  %5315 = vmatmul.msk.bf16.gmra.mxu2 %vm342_vm2, %v3097_v22  ;;  %v1010_v55 = vld [vmem:[#allocation2 + $0x108] sm:$0xff]  ;;  %v7004_v49 = vld [vmem:[%s5953_s11 + $0x50] sm:$0xff] }
 0x1dd   : > { %v1872_v46 = vld [vmem:[#allocation2 + $0xe0] sm:$0xff]  ;;  %v6994_v22 = vld [vmem:[%s5953_s11 + $0x48] sm:$0xff]  ;;  %v4101_v12 = vrot.slane %v7004_v49, 3 }
 0x1de   : > { %v1908_v44 = vadd.f32 %v1872_v46, %v6801_v31  ;;  %1512 = vst.msk [vmem:[#allocation2 + $0xe8] sm:$0xff] %vm503_vm6, %v1476_v21  ;;  %v3598_v31 = vsel %vm3518_vm7, %v3588_v23, %v3597_v26  ;;  %v2667_v21 = vrot.slane %v6994_v22, 2  ;;  %v3100_v46 = vrot.slane %v6997_v30, 2  ;;  %v5682_v22 = vld [vmem:[%s5953_s11 + $0x68] sm:$0xff] }
 0x1df   : > { %5497 = vmatmul.msk.bf16.gmra.mxu0 %vm342_vm2, %v4098_v58  ;;  %v2438_v20 = vld [vmem:[#allocation2 + $0xd8] sm:$0xff]  ;;  %v1396_v60 = vpop.f32.mrf.mxu2  ;;  %v3618_v30 = vshrl.u32 %v5682_v22, 16 }
 0x1e0   : > { %1944 = vst.msk [vmem:[#allocation2 + $0xe0] sm:$0xff] %vm503_vm6, %v1908_v44  ;;  %v2474_v27 = vadd.f32 %v2438_v20, %v6842_v61 }
 0x1e1   : > { %v964_v33 = vpop.f32.mrf.mxu1  ;;  %5408 = vmatmul.msk.bf16.gmra.mxu3 %vm342_vm2, %v3598_v31  ;;  %v5681_v31 = vld [vmem:[%s5953_s11 + $0x60] sm:$0xff] }
 0x1e2   : > { %2510 = vst.msk [vmem:[#allocation2 + $0xd8] sm:$0xff] %vm503_vm6, %v2474_v27  ;;  %v1044_v43 = vadd.f32 %v1008_v50, %v964_v33  ;;  %v6960_v24 = vpop.f32.mrf.mxu3  ;;  %v1011_v33 = vld [vmem:[#allocation2 + $0x110] sm:$0xff]  ;;  %v3101_v50 = vsel %vm2651_vm8, %v3098_v51, %v3100_v46 }
 0x1e3   : > { %v1441_v19 = vld [vmem:[#allocation2 + $0xf0] sm:$0xff] }
 0x1e4   : > { %v6948_v14 = vpop.f32.mrf.mxu0  ;;  %v1477_v9 = vadd.f32 %v1441_v19, %v1396_v60  ;;  %1080 = vst.msk [vmem:[#allocation2 + $0xf8] sm:$0xff] %vm503_vm6, %v1044_v43 }
 0x1e5   : > { %v1873_v61 = vld [vmem:[#allocation2 + $0xe8] sm:$0xff] }
 0x1e6   : > { %v1909_v25 = vadd.f32 %v1873_v61, %v6830_v38  ;;  %1513 = vst.msk [vmem:[#allocation2 + $0xf0] sm:$0xff] %vm503_vm6, %v1477_v9  ;;  %v2666_v38 = vsel %vm2651_vm8, %v2663_v29, %v2665_v41  ;;  %v3609_v9 = vshrl.u32 %v5681_v31, 16  ;;  %v3612_v61 = vshll.u32 %v5681_v31, 16 }
 0x1e7   : > { %v2439_v1 = vld [vmem:[#allocation2 + $0xe0] sm:$0xff]  ;;  %v1398_v17 = vpop.f32.mrf.mxu2 }
 0x1e8   : > { %1945 = vst.msk [vmem:[#allocation2 + $0xe8] sm:$0xff] %vm503_vm6, %v1909_v25  ;;  %v2475_v23 = vadd.f32 %v2439_v1, %v6870_v8  ;;  %v4100_v8 = vsel %vm4085_vm9, %v4097_v63, %v4099_v4  ;;  %v3611_v51 = vrot.slane %v3609_v9, 2  ;;  %v3614_v25 = vrot.slane %v3612_v61, 3 }
 0x1e9   : > { %v967_v10 = vpop.f32.mrf.mxu1 }
 0x1ea   : > { %2511 = vst.msk [vmem:[#allocation2 + $0xe0] sm:$0xff] %vm503_vm6, %v2475_v23  ;;  %v1045_v48 = vadd.f32 %v1009_v53, %v967_v10  ;;  %v6989_v63 = vpop.f32.mrf.mxu3  ;;  %v7044_v23 = vor.u32 %v3614_v25, %v3611_v51 }
 0x1eb   : > { %v1442_v16 = vld [vmem:[#allocation2 + $0xf8] sm:$0xff] }
 0x1ec   : > { %v6976_v28 = vpop.f32.mrf.mxu0  ;;  %v1478_v29 = vadd.f32 %v1442_v16, %v1398_v17  ;;  %1081 = vst.msk [vmem:[#allocation2 + $0x100] sm:$0xff] %vm503_vm6, %v1045_v48  ;;  %5225 = vmatmul.msk.bf16.gmra.mxu1 %vm342_vm2, %v2666_v38  ;;  %5316 = vmatmul.msk.bf16.gmra.mxu2 %vm342_vm2, %v3099_v6  ;;  %v1012_v38 = vld [vmem:[#allocation2 + $0x118] sm:$0xff]  ;;  %v7049_v6 = vld [vmem:[%s5953_s11 + $0x50] sm:$0xff] }
 0x1ed   : > { %v1874_v54 = vld [vmem:[#allocation2 + $0xf0] sm:$0xff]  ;;  %v7060_v16 = vld [vmem:[%s5953_s11 + $0x58] sm:$0xff] }
 0x1ee   : > { %v1910_v37 = vadd.f32 %v1874_v54, %v6854_v11  ;;  %1514 = vst.msk [vmem:[#allocation2 + $0xf8] sm:$0xff] %vm503_vm6, %v1478_v29  ;;  %v3607_v11 = vsel %vm3518_vm7, %v3597_v26, %v3606_v15  ;;  %v2669_v29 = vrot.slane %v7049_v6, 2  ;;  %v3102_v54 = vrot.slane %v7052_v0, 2  ;;  %v5683_v6 = vld [vmem:[%s5953_s11 + $0x70] sm:$0xff] }
 0x1ef   : > { %5498 = vmatmul.msk.bf16.gmra.mxu0 %vm342_vm2, %v4100_v8  ;;  %v2440_v2 = vld [vmem:[#allocation2 + $0xe8] sm:$0xff]  ;;  %v1401_v47 = vpop.f32.mrf.mxu2  ;;  %v4103_v3 = vrot.slane %v7060_v16, 3 }
 0x1f0   : > { %1946 = vst.msk [vmem:[#allocation2 + $0xf0] sm:$0xff] %vm503_vm6, %v1910_v37  ;;  %v2476_v40 = vadd.f32 %v2440_v2, %v6895_v35 }
 0x1f1   : > { %v969_v36 = vpop.f32.mrf.mxu1  ;;  %5409 = vmatmul.msk.bf16.gmra.mxu3 %vm342_vm2, %v3607_v11 }
 0x1f2   : > { %2512 = vst.msk [vmem:[#allocation2 + $0xe8] sm:$0xff] %vm503_vm6, %v2476_v40  ;;  %v1046_v45 = vadd.f32 %v1010_v55, %v969_v36  ;;  %v2845_v36 = vld [vmem:[#allocation2] sm:$0xff]  ;;  %v3103_v55 = vsel %vm2651_vm8, %v3100_v46, %v3102_v54  ;;  %v3620_v46 = vrot.slane %v3618_v30, 2 }
 0x1f3   : > { %v1443_v39 = vld [vmem:[#allocation2 + $0x100] sm:$0xff] }
 0x1f4   : > { %v7001_v58 = vpop.f32.mrf.mxu0  ;;  %v1479_v18 = vadd.f32 %v1443_v39, %v1401_v47  ;;  %1082 = vst.msk [vmem:[#allocation2 + $0x108] sm:$0xff] %vm503_vm6, %v1046_v45  ;;  %v7013_v60 = vpop.f32.mrf.mxu3 }
 0x1f5   : > { %v1875_v35 = vld [vmem:[#allocation2 + $0xf8] sm:$0xff] }
 0x1f6   : > { %v1911_v5 = vadd.f32 %v1875_v35, %v6883_v13  ;;  %1515 = vst.msk [vmem:[#allocation2 + $0x100] sm:$0xff] %vm503_vm6, %v1479_v18  ;;  %v2668_v13 = vsel %vm2651_vm8, %v2665_v41, %v2667_v21  ;;  %v3621_v35 = vshll.u32 %v5682_v22, 16  ;;  %v7171_v22 = vld [vmem:[%s5953_s11 + $0x68] sm:$0xff] }
 0x1f7   : > { %v2441_v44 = vld [vmem:[#allocation2 + $0xf0] sm:$0xff]  ;;  %v1403_v20 = vpop.f32.mrf.mxu2 }
 0x1f8   : > { %1947 = vst.msk [vmem:[#allocation2 + $0xf8] sm:$0xff] %vm503_vm6, %v1911_v5  ;;  %v2477_v26 = vadd.f32 %v2441_v44, %v6923_v62  ;;  %v4102_v62 = vsel %vm4085_vm9, %v4099_v4, %v4101_v12  ;;  %v3623_v5 = vrot.slane %v3621_v35, 3 }
 0x1f9   : > { %v972_v27 = vpop.f32.mrf.mxu1 }
 0x1fa   : > { %2513 = vst.msk [vmem:[#allocation2 + $0xf0] sm:$0xff] %vm503_vm6, %v2477_v26  ;;  %v1047_v43 = vadd.f32 %v1011_v33, %v972_v27  ;;  %v7102_v27 = vor.u32 %v3623_v5, %v3620_v46  ;;  %v4107_v46 = vrot.slane %v7171_v22, 3 }
 0x1fb   : > { %v1444_v7 = vld [vmem:[#allocation2 + $0x108] sm:$0xff] }
 0x1fc   : > { %v7029_v19 = vpop.f32.mrf.mxu0  ;;  %v1480_v41 = vadd.f32 %v1444_v7, %v1403_v20  ;;  %1083 = vst.msk [vmem:[#allocation2 + $0x110] sm:$0xff] %vm503_vm6, %v1047_v43  ;;  %5226 = vmatmul.msk.bf16.gmra.mxu1 %vm342_vm2, %v2668_v13  ;;  %5317 = vmatmul.msk.bf16.gmra.mxu2 %vm342_vm2, %v3101_v50  ;;  %v7042_v17 = vpop.f32.mrf.mxu3  ;;  %v2846_v13 = vld [vmem:[#allocation2 + $0x8] sm:$0xff]  ;;  %v7105_v50 = vld [vmem:[%s5953_s11 + $0x58] sm:$0xff]  ;;  %v7117_v7 = vld [vmem:[%s5953_s11 + $0x60] sm:$0xff] }
 0x1fd   : > { %v1876_v42 = vld [vmem:[#allocation2 + $0x100] sm:$0xff]  ;;  %v4105_v25 = vrot.slane %v7117_v7, 3 }
 0x1fe   : > { %v1912_v32 = vadd.f32 %v1876_v42, %v6907_v59  ;;  %1516 = vst.msk [vmem:[#allocation2 + $0x108] sm:$0xff] %vm503_vm6, %v1480_v41  ;;  %v3616_v59 = vsel %vm3518_vm7, %v3606_v15, %v7044_v23  ;;  %v2671_v41 = vrot.slane %v7105_v50, 2  ;;  %v5684_v50 = vld [vmem:[%s5953_s11 + $0x78] sm:$0xff]  ;;  %v7213_v7 = vld [vmem:[%s7842_s2] ss:$0 sm:$0xff] }
 0x1ff   : > { %5499 = vmatmul.msk.bf16.gmra.mxu0 %vm342_vm2, %v4102_v62  ;;  %v2442_v4 = vld [vmem:[#allocation2 + $0xf8] sm:$0xff]  ;;  %v1406_v1 = vpop.f32.mrf.mxu2  ;;  %v3625_v62 = vsel %vm3518_vm7, %v7044_v23, %v7102_v27 }
 0x200   : > { %1948 = vst.msk [vmem:[#allocation2 + $0x100] sm:$0xff] %vm503_vm6, %v1912_v32  ;;  %v2478_v10 = vadd.f32 %v2442_v4, %v6948_v14 }
 0x201   : > { %v974_v53 = vpop.f32.mrf.mxu1  ;;  %5410 = vmatmul.msk.bf16.gmra.mxu3 %vm342_vm2, %v3616_v59 }
 0x202   : > { %2514 = vst.msk [vmem:[#allocation2 + $0xf8] sm:$0xff] %vm503_vm6, %v2478_v10  ;;  %v1048_v48 = vadd.f32 %v1012_v38, %v974_v53  ;;  %v2847_v53 = vld [vmem:[#allocation2 + $0x10] sm:$0xff] }
 0x203   : > { %v1445_v57 = vld [vmem:[#allocation2 + $0x110] sm:$0xff] }
 0x204   : > { %v7057_v8 = vpop.f32.mrf.mxu0  ;;  %v1481_v52 = vadd.f32 %v1445_v57, %v1406_v1  ;;  %1084 = vst.msk [vmem:[#allocation2 + $0x118] sm:$0xff] %vm503_vm6, %v1048_v48  ;;  %v7069_v47 = vpop.f32.mrf.mxu3 }
 0x205   : > { %v1877_v14 = vld [vmem:[#allocation2 + $0x108] sm:$0xff] }
 0x206   : > { %v1913_v56 = vadd.f32 %v1877_v14, %v6936_v34  ;;  %1517 = vst.msk [vmem:[#allocation2 + $0x110] sm:$0xff] %vm503_vm6, %v1481_v52  ;;  %v2670_v34 = vsel %vm2651_vm8, %v2667_v21, %v2669_v29  ;;  %v3627_v14 = vshrl.u32 %v5683_v6, 16 }
 0x207   : > { %v2443_v37 = vld [vmem:[#allocation2 + $0x100] sm:$0xff]  ;;  %v1408_v2 = vpop.f32.mrf.mxu2 }
 0x208   : > { %1949 = vst.msk [vmem:[#allocation2 + $0x108] sm:$0xff] %vm503_vm6, %v1913_v56  ;;  %v2479_v15 = vadd.f32 %v2443_v37, %v6976_v28  ;;  %v4104_v28 = vsel %vm4085_vm9, %v4101_v12, %v4103_v3  ;;  %v3629_v37 = vrot.slane %v3627_v14, 2 }
 0x209   : > { %v2755_v40 = vpop.f32.mrf.mxu1 }
 0x20a   : > { %2515 = vst.msk [vmem:[#allocation2 + $0x100] sm:$0xff] %vm503_vm6, %v2479_v15  ;;  %v2881_v11 = vadd.f32 %v2845_v36, %v2755_v40  ;;  %v2848_v36 = vld [vmem:[#allocation2 + $0x18] sm:$0xff] }
 0x20b   : > { %v1446_v39 = vld [vmem:[#allocation2 + $0x118] sm:$0xff] }
 0x20c   : > { %v7084_v45 = vpop.f32.mrf.mxu0  ;;  %v1482_v18 = vadd.f32 %v1446_v39, %v1408_v2  ;;  %2917 = vst.msk [vmem:[#allocation2] sm:$0xff] %vm503_vm6, %v2881_v11  ;;  %5227 = vmatmul.msk.bf16.gmra.mxu1 %vm342_vm2, %v2670_v34  ;;  %5318 = vmatmul.msk.bf16.gmra.mxu2 %vm342_vm2, %v3103_v55  ;;  %v7098_v20 = vpop.f32.mrf.mxu3  ;;  %v7160_v34 = vld [vmem:[%s5953_s11 + $0x60] sm:$0xff]  ;;  %v7163_v55 = vld [vmem:[%s5953_s11 + $0x68] sm:$0xff] }
 0x20d   : > { %v1878_v21 = vld [vmem:[#allocation2 + $0x110] sm:$0xff]  ;;  %v2673_v35 = vrot.slane %v7160_v34, 2 }
 0x20e   : > { %v1914_v49 = vadd.f32 %v1878_v21, %v6960_v24  ;;  %1518 = vst.msk [vmem:[#allocation2 + $0x118] sm:$0xff] %vm503_vm6, %v1482_v18  ;;  %v7108_v24 = vld [vmem:[%s5953_s11 + $0x60] sm:$0xff]  ;;  %v3106_v21 = vrot.slane %v7163_v55, 2 }
 0x20f   : > { %5500 = vmatmul.msk.bf16.gmra.mxu0 %vm342_vm2, %v4104_v28  ;;  %v2444_v12 = vld [vmem:[#allocation2 + $0x108] sm:$0xff]  ;;  %v3188_v44 = vpop.f32.mrf.mxu2  ;;  %v3104_v42 = vrot.slane %v7108_v24, 2 }
 0x210   : > { %1950 = vst.msk [vmem:[#allocation2 + $0x110] sm:$0xff] %vm503_vm6, %v1914_v49  ;;  %v2480_v26 = vadd.f32 %v2444_v12, %v7001_v58 }
 0x211   : > { %v2757_v33 = vpop.f32.mrf.mxu1  ;;  %5411 = vmatmul.msk.bf16.gmra.mxu3 %vm342_vm2, %v3625_v62  ;;  %v3105_v38 = vsel %vm2651_vm8, %v3102_v54, %v3104_v42 }
 0x212   : > { %2516 = vst.msk [vmem:[#allocation2 + $0x108] sm:$0xff] %vm503_vm6, %v2480_v26  ;;  %v2882_v31 = vadd.f32 %v2846_v13, %v2757_v33  ;;  %v2849_v33 = vld [vmem:[#allocation2 + $0x20] sm:$0xff]  ;;  %v3107_v13 = vsel %vm2651_vm8, %v3104_v42, %v3106_v21 }
 0x213   : > { %v3278_v58 = vld [vmem:[#allocation2] sm:$0xff] }
 0x214   : > { %v7111_v43 = vpop.f32.mrf.mxu0  ;;  %v3314_v9 = vadd.f32 %v3278_v58, %v3188_v44  ;;  %2918 = vst.msk [vmem:[#allocation2 + $0x8] sm:$0xff] %vm503_vm6, %v2882_v31  ;;  %v7126_v1 = vpop.f32.mrf.mxu3 }
 0x215   : > { %v1879_v61 = vld [vmem:[#allocation2 + $0x118] sm:$0xff] }
 0x216   : > { %v1915_v51 = vadd.f32 %v1879_v61, %v6989_v63  ;;  %3350 = vst.msk [vmem:[#allocation2] sm:$0xff] %vm503_vm6, %v3314_v9  ;;  %v2672_v63 = vsel %vm2651_vm8, %v2669_v29, %v2671_v41  ;;  %v3630_v29 = vshll.u32 %v5683_v6, 16  ;;  %v3636_v61 = vshrl.u32 %v5684_v50, 16 }
 0x217   : > { %v2445_v32 = vld [vmem:[#allocation2 + $0x110] sm:$0xff]  ;;  %v3190_v4 = vpop.f32.mrf.mxu2 }
 0x218   : > { %1951 = vst.msk [vmem:[#allocation2 + $0x118] sm:$0xff] %vm503_vm6, %v1915_v51  ;;  %v2481_v23 = vadd.f32 %v2445_v32, %v7029_v19  ;;  %v4106_v19 = vsel %vm4085_vm9, %v4103_v3, %v4105_v25  ;;  %v3632_v2 = vrot.slane %v3630_v29, 3 }
 0x219   : > { %v2760_v10 = vpop.f32.mrf.mxu1 }
 0x21a   : > { %2517 = vst.msk [vmem:[#allocation2 + $0x110] sm:$0xff] %vm503_vm6, %v2481_v23  ;;  %v2883_v59 = vadd.f32 %v2847_v53, %v2760_v10  ;;  %v2850_v53 = vld [vmem:[#allocation2 + $0x28] sm:$0xff] }
 0x21b   : > { %v3279_v57 = vld [vmem:[#allocation2 + $0x8] sm:$0xff] }
 0x21c   : > { %v7141_v48 = vpop.f32.mrf.mxu0  ;;  %v3315_v52 = vadd.f32 %v3279_v57, %v3190_v4  ;;  %2919 = vst.msk [vmem:[#allocation2 + $0x10] sm:$0xff] %vm503_vm6, %v2883_v59  ;;  %5228 = vmatmul.msk.bf16.gmra.mxu1 %vm342_vm2, %v2672_v63  ;;  %5319 = vmatmul.msk.bf16.gmra.mxu2 %vm342_vm2, %v3105_v38  ;;  %v7155_v3 = vpop.f32.mrf.mxu3  ;;  %v3638_v4 = vrot.slane %v3636_v61, 2  ;;  %v7223_v59 = vld [vmem:[%s5953_s11 + $0x68] sm:$0xff]  ;;  %v2852_v61 = vld [vmem:[#allocation2 + $0x38] sm:$0xff] }
 0x21d   : > { %v3845_v0 = vld [vmem:[#allocation2] sm:$0xff] }
 0x21e   : > { %v3881_v16 = vadd.f32 %v3845_v0, %v7013_v60  ;;  %3351 = vst.msk [vmem:[#allocation2 + $0x8] sm:$0xff] %vm503_vm6, %v3315_v52  ;;  %v7165_v60 = vor.u32 %v3632_v2, %v3629_v37  ;;  %v7237_v0 = vld [vmem:[%s5953_s11 + $0x70] sm:$0xff] }
 0x21f   : > { %5501 = vmatmul.msk.bf16.gmra.mxu0 %vm342_vm2, %v4106_v19  ;;  %v2446_v54 = vld [vmem:[#allocation2 + $0x118] sm:$0xff]  ;;  %v3193_v56 = vpop.f32.mrf.mxu2 }
 0x220   : > { %3917 = vst.msk [vmem:[#allocation2] sm:$0xff] %vm503_vm6, %v3881_v16  ;;  %v2482_v15 = vadd.f32 %v2446_v54, %v7057_v8  ;;  %v3634_v8 = vsel %vm3518_vm7, %v7102_v27, %v7165_v60 }
 0x221   : > { %v2762_v40 = vpop.f32.mrf.mxu1  ;;  %5412 = vmatmul.msk.bf16.gmra.mxu3 %vm342_vm2, %v3634_v8 }
 0x222   : > { %2518 = vst.msk [vmem:[#allocation2 + $0x118] sm:$0xff] %vm503_vm6, %v2482_v15  ;;  %v2884_v11 = vadd.f32 %v2848_v36, %v2762_v40  ;;  %v4109_v40 = vrot.slane %v7237_v0, 3 }
 0x223   : > { %v3280_v39 = vld [vmem:[#allocation2 + $0x10] sm:$0xff] }
 0x224   : > { %v7168_v28 = vpop.f32.mrf.mxu0  ;;  %v3316_v18 = vadd.f32 %v3280_v39, %v3193_v56  ;;  %2920 = vst.msk [vmem:[#allocation2 + $0x18] sm:$0xff] %vm503_vm6, %v2884_v11  ;;  %v7183_v44 = vpop.f32.mrf.mxu3  ;;  %v2675_v56 = vrot.slane %v7223_v59, 2  ;;  %v4110_v34 = vsel %vm4085_vm9, %v4107_v46, %v4109_v40 }
 0x225   : > { %v3846_v30 = vld [vmem:[#allocation2 + $0x8] sm:$0xff] }
 0x226   : > { %v3882_v49 = vadd.f32 %v3846_v30, %v7042_v17  ;;  %3352 = vst.msk [vmem:[#allocation2 + $0x10] sm:$0xff] %vm503_vm6, %v3316_v18  ;;  %v2674_v17 = vsel %vm2651_vm8, %v2671_v41, %v2673_v35  ;;  %v3639_v41 = vshll.u32 %v5684_v50, 16  ;;  %v2851_v18 = vld [vmem:[#allocation2 + $0x30] sm:$0xff]  ;;  %v2676_v30 = vsel %vm2651_vm8, %v2673_v35, %v2675_v56  ;;  %v5685_v35 = vld [vmem:[%s5953_s11 + $0x80] sm:$0xff] }
 0x227   : > { %v4279_v5 = vld [vmem:[#allocation2] sm:$0xff]  ;;  %v3195_v12 = vpop.f32.mrf.mxu2  ;;  %v3648_v22 = vshll.u32 %v5685_v35, 16 }
 0x228   : > { %3918 = vst.msk [vmem:[#allocation2 + $0x8] sm:$0xff] %vm503_vm6, %v3882_v49  ;;  %v4315_v26 = vadd.f32 %v4279_v5, %v7084_v45  ;;  %v4108_v45 = vsel %vm4085_vm9, %v4105_v25, %v4107_v46  ;;  %v3641_v23 = vrot.slane %v3639_v41, 3  ;;  %v7290_v41 = vld [vmem:[%s5953_s11 + $0x70] sm:$0xff] }
 0x229   : > { %v2765_v27 = vpop.f32.mrf.mxu1  ;;  %v3650_v50 = vrot.slane %v3648_v22, 3 }
 0x22a   : > { %4351 = vst.msk [vmem:[#allocation2] sm:$0xff] %vm503_vm6, %v4315_v26  ;;  %v2885_v31 = vadd.f32 %v2849_v33, %v2765_v27  ;;  %v7228_v19 = vor.u32 %v3641_v23, %v3638_v4  ;;  %v7300_v4 = vld [vmem:[%s5953_s11 + $0x78] sm:$0xff] }
 0x22b   : > { %v3281_v58 = vld [vmem:[#allocation2 + $0x18] sm:$0xff] }
 0x22c   : > { %v7198_v62 = vpop.f32.mrf.mxu0  ;;  %v3317_v9 = vadd.f32 %v3281_v58, %v3195_v12  ;;  %2921 = vst.msk [vmem:[#allocation2 + $0x20] sm:$0xff] %vm503_vm6, %v2885_v31  ;;  %5229 = vmatmul.msk.bf16.gmra.mxu1 %vm342_vm2, %v2674_v17  ;;  %5320 = vmatmul.msk.bf16.gmra.mxu2 %vm342_vm2, %v3107_v13  ;;  %v7218_v32 = vpop.f32.mrf.mxu3  ;;  %v3643_v14 = vsel %vm3518_vm7, %v7165_v60, %v7228_v19 }
 0x22d   : > { %v3847_v24 = vld [vmem:[#allocation2 + $0x10] sm:$0xff] }
 0x22e   : > { %v3883_v42 = vadd.f32 %v3847_v24, %v7069_v47  ;;  %3353 = vst.msk [vmem:[#allocation2 + $0x18] sm:$0xff] %vm503_vm6, %v3317_v9  ;;  %v7226_v47 = vld [vmem:[%s5953_s11 + $0x70] sm:$0xff] }
 0x22f   : > { %5502 = vmatmul.msk.bf16.gmra.mxu0 %vm342_vm2, %v4108_v45  ;;  %v4280_v51 = vld [vmem:[#allocation2 + $0x8] sm:$0xff]  ;;  %v3198_v25 = vpop.f32.mrf.mxu2  ;;  %v3108_v37 = vrot.slane %v7226_v47, 2 }
 0x230   : > { %3919 = vst.msk [vmem:[#allocation2 + $0x10] sm:$0xff] %vm503_vm6, %v3883_v42  ;;  %v4316_v10 = vadd.f32 %v4280_v51, %v7111_v43 }
 0x231   : > { %v4388_v63 = vld [vmem:[#allocation2] sm:$0xff]  ;;  %v2767_v38 = vpop.f32.mrf.mxu1  ;;  %5413 = vmatmul.msk.bf16.gmra.mxu3 %vm342_vm2, %v3643_v14  ;;  %v3109_v49 = vsel %vm2651_vm8, %v3106_v21, %v3108_v37  ;;  %v3645_v21 = vshrl.u32 %v5685_v35, 16 }
 0x232   : > { %v4393_v6 = vadd.f32 %v7213_v7, %v4388_v63  ;;  %4352 = vst.msk [vmem:[#allocation2 + $0x8] sm:$0xff] %vm503_vm6, %v4316_v10  ;;  %v2886_v57 = vadd.f32 %v2850_v53, %v2767_v38  ;;  %v2677_v63 = vrot.slane %v7290_v41, 2 }
 0x233   : > { %v3282_v43 = vld [vmem:[#allocation2 + $0x20] sm:$0xff]  ;;  %v3647_v13 = vrot.slane %v3645_v21, 2 }
 0x234   : > { %v7234_v52 = vpop.f32.mrf.mxu0  ;;  %v4395_v29 = vmax.f32 %v4393_v6, 0.0  ;;  %v3318_v16 = vadd.f32 %v3282_v43, %v3198_v25  ;;  %2922 = vst.msk [vmem:[#allocation2 + $0x28] sm:$0xff] %vm503_vm6, %v2886_v57  ;;  %v7249_v11 = vpop.f32.mrf.mxu3  ;;  %v4111_v57 = vrot.slane %v7300_v4, 3 }
 0x235   : > { %v3848_v54 = vld [vmem:[#allocation2 + $0x18] sm:$0xff]  ;;  %v7295_v42 = vor.u32 %v3650_v50, %v3647_v13 }
 0x236   : > { %v4397_v2 = vpack.c.bf16 %v4395_v29, %v4395_v29  ;;  %v3884_v15 = vadd.f32 %v3848_v54, %v7098_v20  ;;  %3354 = vst.msk [vmem:[#allocation2 + $0x20] sm:$0xff] %vm503_vm6, %v3318_v16  ;;  %v2853_v54 = vld [vmem:[#allocation2 + $0x40] sm:$0xff] }
 0x237   : > { %v4281_v36 = vld [vmem:[#allocation2 + $0x10] sm:$0xff]  ;;  %v3200_v60 = vpop.f32.mrf.mxu2 }
 0x238   : > { %4400 = vst.msk [vmem:[%s7251_s9] sm:$0xf] %vm4399_vm10, %v4397_v2  ;;  %v4317_v39 = vadd.f32 %v4281_v36, %v7141_v48 }
 0x239   : > { %v4389_v8 = vld [vmem:[#allocation2 + $0x8] sm:$0xff]  ;;  %3920 = vst.msk [vmem:[#allocation2 + $0x18] sm:$0xff] %vm503_vm6, %v3884_v15  ;;  %v2770_v20 = vpop.f32.mrf.mxu1 }
 0x23a   : > { %v4394_v5 = vadd.f32 %v7213_v7, %v4389_v8  ;;  %4353 = vst.msk [vmem:[#allocation2 + $0x10] sm:$0xff] %vm503_vm6, %v4317_v39  ;;  %v2887_v48 = vadd.f32 %v2851_v18, %v2770_v20  ;;  %v5686_v39 = vld [vmem:[%s5953_s11 + $0x88] sm:$0xff] }
 0x23b   : > { %v3283_v26 = vld [vmem:[#allocation2 + $0x28] sm:$0xff]  ;;  %v3654_v0 = vshrl.u32 %v5686_v39, 16 }
 0x23c   : > { %v7269_v12 = vpop.f32.mrf.mxu0  ;;  %v4396_v27 = vmax.f32 %v4394_v5, 0.0  ;;  %v3319_v55 = vadd.f32 %v3283_v26, %v3200_v60  ;;  %2923 = vst.msk [vmem:[#allocation2 + $0x30] sm:$0xff] %vm503_vm6, %v2887_v48  ;;  %5230 = vmatmul.msk.bf16.gmra.mxu1 %vm342_vm2, %v2676_v30  ;;  %5321 = vmatmul.msk.bf16.gmra.mxu2 %vm342_vm2, %v3109_v49  ;;  %v7283_v45 = vpop.f32.mrf.mxu3 }
 0x23d   : > { %v3849_v33 = vld [vmem:[#allocation2 + $0x20] sm:$0xff]  ;;  %v3656_v48 = vrot.slane %v3654_v0, 2  ;;  %v2856_v0 = vld [vmem:[#allocation2 + $0x58] sm:$0xff] }
 0x23e   : > { %v4398_v17 = vpack.c.bf16 %v4396_v27, %v4396_v27  ;;  %v3885_v46 = vadd.f32 %v3849_v33, %v7126_v1  ;;  %3355 = vst.msk [vmem:[#allocation2 + $0x28] sm:$0xff] %vm503_vm6, %v3319_v55  ;;  %v7293_v1 = vld [vmem:[%s5953_s11 + $0x78] sm:$0xff]  ;;  %v2854_v27 = vld [vmem:[#allocation2 + $0x48] sm:$0xff] }
 0x23f   : > { %5503 = vmatmul.msk.bf16.gmra.mxu0 %vm342_vm2, %v4110_v34  ;;  %v3203_v31 = vpop.f32.mrf.mxu2  ;;  %v3110_v38 = vrot.slane %v7293_v1, 2  ;;  %v7350_v55 = vld [vmem:[%s5953_s11 + $0x78] sm:$0xff] }
 0x240   : > { %4401 = vst.msk [vmem:[%s7251_s9 + $0x4] sm:$0xf] %vm4399_vm10, %v4398_v17  ;;  %v4282_v58 = vld [vmem:[#allocation2 + $0x18] sm:$0xff] }
 0x241   : > { %3921 = vst.msk [vmem:[#allocation2 + $0x20] sm:$0xff] %vm503_vm6, %v3885_v46  ;;  %v4318_v9 = vadd.f32 %v4282_v58, %v7168_v28  ;;  %v2772_v24 = vpop.f32.mrf.mxu1  ;;  %v3652_v28 = vsel %vm3518_vm7, %v7228_v19, %v7295_v42  ;;  %v3111_v2 = vsel %vm2651_vm8, %v3108_v37, %v3110_v38  ;;  %v7361_v46 = vld [vmem:[%s5953_s11 + $0x80] sm:$0xff] }
 0x242   : > { %v2888_v51 = vadd.f32 %v2852_v61, %v2772_v24  ;;  %5414 = vmatmul.msk.bf16.gmra.mxu3 %vm342_vm2, %v3652_v28  ;;  %v2679_v24 = vrot.slane %v7350_v55, 2  ;;  %v5688_v55 = vld [vmem:[%s5953_s11 + $0x98] sm:$0xff] }
 0x243   : > { %4354 = vst.msk [vmem:[#allocation2 + $0x18] sm:$0xff] %vm503_vm6, %v4318_v9  ;;  %v3284_v23 = vld [vmem:[#allocation2 + $0x30] sm:$0xff] }
 0x244   : > { %v7297_v25 = vpop.f32.mrf.mxu0  ;;  %v3320_v10 = vadd.f32 %v3284_v23, %v3203_v31  ;;  %2924 = vst.msk [vmem:[#allocation2 + $0x38] sm:$0xff] %vm503_vm6, %v2888_v51  ;;  %v7313_v14 = vpop.f32.mrf.mxu3  ;;  %v4113_v23 = vrot.slane %v7361_v46, 3  ;;  %v3675_v46 = vshll.u32 %v5688_v55, 16 }
 0x245   : > { %v3850_v53 = vld [vmem:[#allocation2 + $0x28] sm:$0xff] }
 0x246   : > { %v3886_v6 = vadd.f32 %v3850_v53, %v7155_v3  ;;  %3356 = vst.msk [vmem:[#allocation2 + $0x30] sm:$0xff] %vm503_vm6, %v3320_v10  ;;  %v2678_v3 = vsel %vm2651_vm8, %v2675_v56, %v2677_v63  ;;  %v4114_v41 = vsel %vm4085_vm9, %v4111_v57, %v4113_v23 }
 0x247   : > { %v3205_v43 = vpop.f32.mrf.mxu2 }
 0x248   : > { %3922 = vst.msk [vmem:[#allocation2 + $0x28] sm:$0xff] %vm503_vm6, %v3886_v6  ;;  %v4283_v19 = vld [vmem:[#allocation2 + $0x20] sm:$0xff] }
 0x249   : > { %v4319_v29 = vadd.f32 %v4283_v19, %v7198_v62  ;;  %v2775_v16 = vpop.f32.mrf.mxu1  ;;  %v4112_v62 = vsel %vm4085_vm9, %v4109_v40, %v4111_v57  ;;  %v3657_v40 = vshll.u32 %v5686_v39, 16 }
 0x24a   : > { %v4402_v15 = vld [vmem:[#allocation2 + $0x12] sm:$0xff]  ;;  %v2889_v36 = vadd.f32 %v2853_v54, %v2775_v16 }
 0x24b   : > { %v4404_v59 = vadd.f32 %v7213_v7, %v4402_v15  ;;  %4355 = vst.msk [vmem:[#allocation2 + $0x20] sm:$0xff] %vm503_vm6, %v4319_v29  ;;  %v3285_v56 = vld [vmem:[#allocation2 + $0x38] sm:$0xff]  ;;  %v3659_v34 = vrot.slane %v3657_v40, 3  ;;  %v2855_v29 = vld [vmem:[#allocation2 + $0x50] sm:$0xff] }
 0x24c   : > { %v7327_v60 = vpop.f32.mrf.mxu0  ;;  %v3321_v8 = vadd.f32 %v3285_v56, %v3205_v43  ;;  %2925 = vst.msk [vmem:[#allocation2 + $0x40] sm:$0xff] %vm503_vm6, %v2889_v36  ;;  %5231 = vmatmul.msk.bf16.gmra.mxu1 %vm342_vm2, %v2678_v3  ;;  %5322 = vmatmul.msk.bf16.gmra.mxu2 %vm342_vm2, %v3111_v2  ;;  %v7343_v5 = vpop.f32.mrf.mxu3 }
 0x24d   : > { %v4406_v47 = vmax.f32 %v4404_v59, 0.0  ;;  %v3851_v37 = vld [vmem:[#allocation2 + $0x30] sm:$0xff]  ;;  %v7355_v21 = vor.u32 %v3659_v34, %v3656_v48 }
 0x24e   : > { %v3887_v20 = vadd.f32 %v3851_v37, %v7183_v44  ;;  %3357 = vst.msk [vmem:[#allocation2 + $0x38] sm:$0xff] %vm503_vm6, %v3321_v8  ;;  %v7353_v44 = vld [vmem:[%s5953_s11 + $0x80] sm:$0xff] }
 0x24f   : > { %5504 = vmatmul.msk.bf16.gmra.mxu0 %vm342_vm2, %v4112_v62  ;;  %v4408_v18 = vpack.c.bf16 %v4406_v47, %v4406_v47  ;;  %v4284_v30 = vld [vmem:[#allocation2 + $0x28] sm:$0xff]  ;;  %v3208_v49 = vpop.f32.mrf.mxu2  ;;  %v3661_v31 = vsel %vm3518_vm7, %v7295_v42, %v7355_v21  ;;  %v3112_v61 = vrot.slane %v7353_v44, 2 }
 0x250   : > { %3923 = vst.msk [vmem:[#allocation2 + $0x30] sm:$0xff] %vm503_vm6, %v3887_v20  ;;  %v4320_v35 = vadd.f32 %v4284_v30, %v7234_v52 }
 0x251   : > { %5510 = vst.msk [vmem:[%s7251_s9 + $0x8] sm:$0xf] %vm4399_vm10, %v4408_v18  ;;  %v2777_v26 = vpop.f32.mrf.mxu1  ;;  %v3113_v16 = vsel %vm2651_vm8, %v3110_v38, %v3112_v61  ;;  %v7413_v18 = vld [vmem:[%s5953_s11 + $0x80] sm:$0xff] }
 0x252   : > { %v4403_v33 = vld [vmem:[#allocation2 + $0x1a] sm:$0xff]  ;;  %4356 = vst.msk [vmem:[#allocation2 + $0x28] sm:$0xff] %vm503_vm6, %v4320_v35  ;;  %v2890_v22 = vadd.f32 %v2854_v27, %v2777_v26  ;;  %5415 = vmatmul.msk.bf16.gmra.mxu3 %vm342_vm2, %v3661_v31  ;;  %v7425_v35 = vld [vmem:[%s5953_s11 + $0x88] sm:$0xff] }
 0x253   : > { %v4405_v52 = vadd.f32 %v7213_v7, %v4403_v33  ;;  %v3286_v13 = vld [vmem:[#allocation2 + $0x40] sm:$0xff] }
 0x254   : > { %v7358_v17 = vpop.f32.mrf.mxu0  ;;  %v3322_v50 = vadd.f32 %v3286_v13, %v3208_v49  ;;  %2926 = vst.msk [vmem:[#allocation2 + $0x48] sm:$0xff] %vm503_vm6, %v2890_v22  ;;  %v7374_v53 = vpop.f32.mrf.mxu3 }
 0x255   : > { %v4407_v58 = vmax.f32 %v4405_v52, 0.0  ;;  %v3852_v9 = vld [vmem:[#allocation2 + $0x38] sm:$0xff]  ;;  %v2681_v52 = vrot.slane %v7413_v18, 2 }
 0x256   : > { %v3888_v51 = vadd.f32 %v3852_v9, %v7218_v32  ;;  %3358 = vst.msk [vmem:[#allocation2 + $0x40] sm:$0xff] %vm503_vm6, %v3322_v50  ;;  %v2680_v32 = vsel %vm2651_vm8, %v2677_v63, %v2679_v24  ;;  %v5687_v63 = vld [vmem:[%s5953_s11 + $0x90] sm:$0xff] }
 0x257   : > { %v4409_v28 = vpack.c.bf16 %v4407_v58, %v4407_v58  ;;  %v4285_v42 = vld [vmem:[#allocation2 + $0x30] sm:$0xff]  ;;  %v3210_v10 = vpop.f32.mrf.mxu2  ;;  %v3663_v1 = vshrl.u32 %v5687_v63, 16  ;;  %v3666_v62 = vshll.u32 %v5687_v63, 16  ;;  %v4115_v58 = vrot.slane %v7425_v35, 3 }
 0x258   : > { %3924 = vst.msk [vmem:[#allocation2 + $0x38] sm:$0xff] %vm503_vm6, %v3888_v51  ;;  %v4321_v6 = vadd.f32 %v4285_v42, %v7269_v12 }
 0x259   : > { %5511 = vst.msk [vmem:[%s7251_s9 + $0xc] sm:$0xf] %vm4399_vm10, %v4409_v28  ;;  %v4413_v43 = vld [vmem:[#allocation2 + $0x24] sm:$0xff]  ;;  %v2780_v19 = vpop.f32.mrf.mxu1  ;;  %v3665_v39 = vrot.slane %v3663_v1, 2  ;;  %v3668_v47 = vrot.slane %v3666_v62, 3 }
 0x25a   : > { %v4415_v54 = vadd.f32 %v7213_v7, %v4413_v43  ;;  %4357 = vst.msk [vmem:[#allocation2 + $0x30] sm:$0xff] %vm503_vm6, %v4321_v6  ;;  %v2891_v12 = vadd.f32 %v2855_v29, %v2780_v19  ;;  %v2857_v6 = vld [vmem:[#allocation2 + $0x60] sm:$0xff]  ;;  %v2858_v62 = vld [vmem:[#allocation2 + $0x68] sm:$0xff] }
 0x25b   : > { %v3287_v2 = vld [vmem:[#allocation2 + $0x48] sm:$0xff]  ;;  %v7418_v30 = vor.u32 %v3668_v47, %v3665_v39  ;;  %v7486_v47 = vld [vmem:[%s5953_s11 + $0x90] sm:$0xff] }
 0x25c   : > { %v7392_v3 = vpop.f32.mrf.mxu0  ;;  %v4417_v15 = vmax.f32 %v4415_v54, 0.0  ;;  %v3323_v36 = vadd.f32 %v3287_v2, %v3210_v10  ;;  %2927 = vst.msk [vmem:[#allocation2 + $0x50] sm:$0xff] %vm503_vm6, %v2891_v12  ;;  %5232 = vmatmul.msk.bf16.gmra.mxu1 %vm342_vm2, %v2680_v32  ;;  %5323 = vmatmul.msk.bf16.gmra.mxu2 %vm342_vm2, %v3113_v16  ;;  %v7406_v8 = vpop.f32.mrf.mxu3 }
 0x25d   : > { %v3853_v38 = vld [vmem:[#allocation2 + $0x40] sm:$0xff]  ;;  %v3670_v26 = vsel %vm3518_vm7, %v7355_v21, %v7418_v30 }
 0x25e   : > { %v4419_v4 = vpack.c.bf16 %v4417_v15, %v4417_v15  ;;  %v3889_v57 = vadd.f32 %v3853_v38, %v7249_v11  ;;  %3359 = vst.msk [vmem:[#allocation2 + $0x48] sm:$0xff] %vm503_vm6, %v3323_v36  ;;  %v7416_v11 = vld [vmem:[%s5953_s11 + $0x88] sm:$0xff]  ;;  %v3677_v15 = vrot.slane %v3675_v46, 3 }
 0x25f   : > { %5505 = vmatmul.msk.bf16.gmra.mxu0 %vm342_vm2, %v4114_v41  ;;  %v4286_v59 = vld [vmem:[#allocation2 + $0x38] sm:$0xff]  ;;  %v3213_v56 = vpop.f32.mrf.mxu2  ;;  %v3114_v13 = vrot.slane %v7416_v11, 2 }
 0x260   : > { %5512 = vst.msk [vmem:[%s7251_s9 + $0x10] sm:$0xf] %vm4399_vm10, %v4419_v4  ;;  %v4322_v37 = vadd.f32 %v4286_v59, %v7297_v25  ;;  %v7476_v4 = vld [vmem:[%s5953_s11 + $0x88] sm:$0xff] }
 0x261   : > { %v4414_v40 = vld [vmem:[#allocation2 + $0x2c] sm:$0xff]  ;;  %3925 = vst.msk [vmem:[#allocation2 + $0x40] sm:$0xff] %vm503_vm6, %v3889_v57  ;;  %v2782_v20 = vpop.f32.mrf.mxu1  ;;  %v3115_v43 = vsel %vm2651_vm8, %v3112_v61, %v3114_v13  ;;  %v3672_v61 = vshrl.u32 %v5688_v55, 16 }
 0x262   : > { %v4416_v49 = vadd.f32 %v7213_v7, %v4414_v40  ;;  %4358 = vst.msk [vmem:[#allocation2 + $0x38] sm:$0xff] %vm503_vm6, %v4322_v37  ;;  %v2892_v48 = vadd.f32 %v2856_v0, %v2782_v20  ;;  %5416 = vmatmul.msk.bf16.gmra.mxu3 %vm342_vm2, %v3670_v26 }
 0x263   : > { %v3288_v25 = vld [vmem:[#allocation2 + $0x50] sm:$0xff]  ;;  %v3674_v41 = vrot.slane %v3672_v61, 2 }
 0x264   : > { %v7422_v34 = vpop.f32.mrf.mxu0  ;;  %v4418_v27 = vmax.f32 %v4416_v49, 0.0  ;;  %v3324_v33 = vadd.f32 %v3288_v25, %v3213_v56  ;;  %2928 = vst.msk [vmem:[#allocation2 + $0x58] sm:$0xff] %vm503_vm6, %v2892_v48  ;;  %v7437_v9 = vpop.f32.mrf.mxu3  ;;  %v2683_v48 = vrot.slane %v7476_v4, 2 }
 0x265   : > { %v3854_v22 = vld [vmem:[#allocation2 + $0x48] sm:$0xff]  ;;  %v7481_v57 = vor.u32 %v3677_v15, %v3674_v41  ;;  %v7539_v41 = vld [vmem:[%s5953_s11 + $0x90] sm:$0xff] }
 0x266   : > { %v4420_v31 = vpack.c.bf16 %v4418_v27, %v4418_v27  ;;  %v3890_v50 = vadd.f32 %v3854_v22, %v7283_v45  ;;  %3360 = vst.msk [vmem:[#allocation2 + $0x50] sm:$0xff] %vm503_vm6, %v3324_v33  ;;  %v2682_v45 = vsel %vm2651_vm8, %v2679_v24, %v2681_v52  ;;  %v4117_v27 = vrot.slane %v7486_v47, 3 }
 0x267   : > { %v3215_v21 = vpop.f32.mrf.mxu2  ;;  %v3679_v0 = vsel %vm3518_vm7, %v7418_v30, %v7481_v57 }
 0x268   : > { %5513 = vst.msk [vmem:[%s7251_s9 + $0x14] sm:$0xf] %vm4399_vm10, %v4420_v31  ;;  %v4287_v51 = vld [vmem:[#allocation2 + $0x40] sm:$0xff] }
 0x269   : > { %v4424_v28 = vld [vmem:[#allocation2 + $0x36] sm:$0xff]  ;;  %3926 = vst.msk [vmem:[#allocation2 + $0x48] sm:$0xff] %vm503_vm6, %v3890_v50  ;;  %v4323_v42 = vadd.f32 %v4287_v51, %v7327_v60  ;;  %v2785_v10 = vpop.f32.mrf.mxu1  ;;  %v4116_v60 = vsel %vm4085_vm9, %v4113_v23, %v4115_v58  ;;  %v3422_v31 = vld [vmem:[%s5953_s11 + $0xa0] sm:$0x7] }
 0x26a   : > { %v4426_v19 = vadd.f32 %v7213_v7, %v4424_v28  ;;  %v2893_v29 = vadd.f32 %v2857_v6, %v2785_v10 }
 0x26b   : > { %4359 = vst.msk [vmem:[#allocation2 + $0x40] sm:$0xff] %vm503_vm6, %v4323_v42  ;;  %v3289_v24 = vld [vmem:[#allocation2 + $0x58] sm:$0xff]  ;;  %v2859_v42 = vld [vmem:[#allocation2 + $0x70] sm:$0xff] }
 0x26c   : > { %v7454_v32 = vpop.f32.mrf.mxu0  ;;  %v4428_v16 = vmax.f32 %v4426_v19, 0.0  ;;  %v3325_v44 = vadd.f32 %v3289_v24, %v3215_v21  ;;  %2929 = vst.msk [vmem:[#allocation2 + $0x60] sm:$0xff] %vm503_vm6, %v2893_v29  ;;  %5233 = vmatmul.msk.bf16.gmra.mxu1 %vm342_vm2, %v2682_v45  ;;  %5324 = vmatmul.msk.bf16.gmra.mxu2 %vm342_vm2, %v3115_v43  ;;  %v7469_v2 = vpop.f32.mrf.mxu3  ;;  %v3498_v21 = vunpack.c.l.b16 %v3422_v31 }
 0x26d   : > { %v3855_v54 = vld [vmem:[#allocation2 + $0x50] sm:$0xff] }
 0x26e   : > { %v4430_v23 = vpack.c.bf16 %v4428_v16, %v4428_v16  ;;  %v3891_v12 = vadd.f32 %v3855_v54, %v7313_v14  ;;  %3361 = vst.msk [vmem:[#allocation2 + $0x58] sm:$0xff] %vm503_vm6, %v3325_v44  ;;  %v7479_v14 = vld [vmem:[%s5953_s11 + $0x90] sm:$0xff]  ;;  %v3517_v19 = vpack.c.b16 %v3498_v21, %v3498_v21 }
 0x26f   : > { %5506 = vmatmul.msk.bf16.gmra.mxu0 %vm342_vm2, %v4116_v60  ;;  %v3218_v63 = vpop.f32.mrf.mxu2  ;;  %v3116_v25 = vrot.slane %v7479_v14, 2 }
 0x270   : > { %5514 = vst.msk [vmem:[%s7251_s9 + $0x18] sm:$0xf] %vm4399_vm10, %v4430_v23  ;;  %v4288_v36 = vld [vmem:[#allocation2 + $0x48] sm:$0xff]  ;;  %v3681_v35 = vshrl.u32 %v3517_v19, 16 }
 0x271   : > { %3927 = vst.msk [vmem:[#allocation2 + $0x50] sm:$0xff] %vm503_vm6, %v3891_v12  ;;  %v4324_v1 = vadd.f32 %v4288_v36, %v7358_v17  ;;  %v2787_v38 = vpop.f32.mrf.mxu1  ;;  %v3117_v10 = vsel %vm2651_vm8, %v3114_v13, %v3116_v25  ;;  %v2860_v12 = vld [vmem:[#allocation2 + $0x78] sm:$0xff] }
 0x272   : > { %v4425_v39 = vld [vmem:[#allocation2 + $0x3e] sm:$0xff]  ;;  %v2894_v59 = vadd.f32 %v2858_v62, %v2787_v38  ;;  %5417 = vmatmul.msk.bf16.gmra.mxu3 %vm342_vm2, %v3679_v0  ;;  %v3683_v44 = vrot.slane %v3681_v35, 2  ;;  %v2685_v0 = vrot.slane %v7539_v41, 2 }
 0x273   : > { %v4427_v37 = vadd.f32 %v7213_v7, %v4425_v39  ;;  %4360 = vst.msk [vmem:[#allocation2 + $0x48] sm:$0xff] %vm503_vm6, %v4324_v1  ;;  %v3290_v17 = vld [vmem:[#allocation2 + $0x60] sm:$0xff]  ;;  %v7548_v38 = vld [vmem:[%s5953_s11 + $0x98] sm:$0xff] }
 0x274   : > { %v7483_v56 = vpop.f32.mrf.mxu0  ;;  %v3326_v40 = vadd.f32 %v3290_v17, %v3218_v63  ;;  %2930 = vst.msk [vmem:[#allocation2 + $0x68] sm:$0xff] %vm503_vm6, %v2894_v59  ;;  %v7500_v22 = vpop.f32.mrf.mxu3 }
 0x275   : > { %v4429_v20 = vmax.f32 %v4427_v37, 0.0  ;;  %v3856_v49 = vld [vmem:[#allocation2 + $0x58] sm:$0xff] }
 0x276   : > { %v3892_v26 = vadd.f32 %v3856_v49, %v7343_v5  ;;  %3362 = vst.msk [vmem:[#allocation2 + $0x60] sm:$0xff] %vm503_vm6, %v3326_v40  ;;  %v2684_v5 = vsel %vm2651_vm8, %v2681_v52, %v2683_v48 }
 0x277   : > { %v4431_v33 = vpack.c.bf16 %v4429_v20, %v4429_v20  ;;  %v3220_v30 = vpop.f32.mrf.mxu2 }
 0x278   : > { %3928 = vst.msk [vmem:[#allocation2 + $0x58] sm:$0xff] %vm503_vm6, %v3892_v26  ;;  %v4289_v50 = vld [vmem:[#allocation2 + $0x50] sm:$0xff] }
 0x279   : > { %5515 = vst.msk [vmem:[%s7251_s9 + $0x1c] sm:$0xf] %vm4399_vm10, %v4431_v33  ;;  %v4325_v51 = vadd.f32 %v4289_v50, %v7392_v3  ;;  %v2790_v28 = vpop.f32.mrf.mxu1  ;;  %v4118_v3 = vsel %vm4085_vm9, %v4115_v58, %v4117_v27  ;;  %v3684_v58 = vshll.u32 %v3517_v19, 16  ;;  %v2861_v50 = vld [vmem:[#allocation2 + $0x80] sm:$0xff] }
 0x27a   : > { %v4435_v6 = vld [vmem:[#allocation2 + $0x48] sm:$0xff]  ;;  %v2895_v45 = vadd.f32 %v2859_v42, %v2790_v28  ;;  %v2989_v28 = vld [vmem:[%s5953_s11 + $0xa0] sm:$0x3] }
 0x27b   : > { %v4437_v18 = vadd.f32 %v7213_v7, %v4435_v6  ;;  %4361 = vst.msk [vmem:[#allocation2 + $0x50] sm:$0xff] %vm503_vm6, %v4325_v51  ;;  %v3291_v52 = vld [vmem:[#allocation2 + $0x68] sm:$0xff]  ;;  %v3686_v61 = vrot.slane %v3684_v58, 3 }
 0x27c   : > { %v7517_v43 = vpop.f32.mrf.mxu0  ;;  %v3327_v29 = vadd.f32 %v3291_v52, %v3220_v30  ;;  %2931 = vst.msk [vmem:[#allocation2 + $0x70] sm:$0xff] %vm503_vm6, %v2895_v45  ;;  %5234 = vmatmul.msk.bf16.gmra.mxu1 %vm342_vm2, %v2684_v5  ;;  %5325 = vmatmul.msk.bf16.gmra.mxu2 %vm342_vm2, %v3117_v10  ;;  %v7534_v46 = vpop.f32.mrf.mxu3  ;;  %v3989_v10 = vld [vmem:[%s5953_s11 + $0xa0] sm:$0x7]  ;;  %v3065_v45 = vunpack.c.l.b16 %v2989_v28 }
 0x27d   : > { %v4439_v11 = vmax.f32 %v4437_v18, 0.0  ;;  %v3857_v13 = vld [vmem:[#allocation2 + $0x60] sm:$0xff]  ;;  %v3687_v63 = vor.u32 %v3686_v61, %v3683_v44 }
 0x27e   : > { %v3893_v60 = vadd.f32 %v3857_v13, %v7374_v53  ;;  %3363 = vst.msk [vmem:[#allocation2 + $0x68] sm:$0xff] %vm503_vm6, %v3327_v29  ;;  %v7542_v53 = vld [vmem:[%s5953_s11 + $0x98] sm:$0xff]  ;;  %v3084_v35 = vpack.c.b16 %v3065_v45, %v3065_v45 }
 0x27f   : > { %5507 = vmatmul.msk.bf16.gmra.mxu0 %vm342_vm2, %v4118_v3  ;;  %v4441_v55 = vpack.c.bf16 %v4439_v11, %v4439_v11  ;;  %v4290_v24 = vld [vmem:[#allocation2 + $0x58] sm:$0xff]  ;;  %v3223_v16 = vpop.f32.mrf.mxu2  ;;  %v3688_v39 = vsel %vm3518_vm7, %v7481_v57, %v3687_v63  ;;  %v3118_v40 = vrot.slane %v7542_v53, 2  ;;  %v4119_v57 = vrot.slane %v7548_v38, 3  ;;  %v2862_v11 = vld [vmem:[#allocation2 + $0x88] sm:$0xff] }
 0x280   : > { %3929 = vst.msk [vmem:[#allocation2 + $0x60] sm:$0xff] %vm503_vm6, %v3893_v60  ;;  %v4326_v54 = vadd.f32 %v4290_v24, %v7422_v34 }
 0x281   : > { %5516 = vst.msk [vmem:[%s7251_s9 + $0x20] sm:$0xf] %vm4399_vm10, %v4441_v55  ;;  %v2792_v23 = vpop.f32.mrf.mxu1  ;;  %v3119_v21 = vsel %vm2651_vm8, %v3116_v25, %v3118_v40  ;;  %v4120_v4 = vsel %vm4085_vm9, %v4117_v27, %v4119_v57  ;;  %v4065_v27 = vunpack.c.l.b16 %v3989_v10 }
 0x282   : > { %v4436_v15 = vld [vmem:[#allocation2 + $0x50] sm:$0xff]  ;;  %4362 = vst.msk [vmem:[#allocation2 + $0x58] sm:$0xff] %vm503_vm6, %v4326_v54  ;;  %v2896_v36 = vadd.f32 %v2860_v12, %v2792_v23  ;;  %5418 = vmatmul.msk.bf16.gmra.mxu3 %vm342_vm2, %v3688_v39  ;;  %v3120_v23 = vrot.slane %v3084_v35, 2 }
 0x283   : > { %v4438_v34 = vadd.f32 %v7213_v7, %v4436_v15  ;;  %v3292_v62 = vld [vmem:[#allocation2 + $0x70] sm:$0xff]  ;;  %v4084_v55 = vpack.c.b16 %v4065_v27, %v4065_v27 }
 0x284   : > { %v7545_v1 = vpop.f32.mrf.mxu0  ;;  %v3328_v59 = vadd.f32 %v3292_v62, %v3223_v16  ;;  %2932 = vst.msk [vmem:[#allocation2 + $0x78] sm:$0xff] %vm503_vm6, %v2896_v36 }
 0x285   : > { %v4440_v37 = vmax.f32 %v4438_v34, 0.0  ;;  %v3858_v17 = vld [vmem:[#allocation2 + $0x68] sm:$0xff]  ;;  %v4121_v15 = vrot.slane %v4084_v55, 3 }
 0x286   : > { %v3894_v20 = vadd.f32 %v3858_v17, %v7406_v8  ;;  %3364 = vst.msk [vmem:[#allocation2 + $0x70] sm:$0xff] %vm503_vm6, %v3328_v59  ;;  %v2686_v8 = vsel %vm2651_vm8, %v2683_v48, %v2685_v0  ;;  %v7584_v48 = vpop.f32.mrf.mxu3 }
 0x287   : > { %v4442_v49 = vpack.c.bf16 %v4440_v37, %v4440_v37  ;;  %v4291_v26 = vld [vmem:[#allocation2 + $0x60] sm:$0xff]  ;;  %v3225_v33 = vpop.f32.mrf.mxu2  ;;  %v2863_v37 = vld [vmem:[#allocation2 + $0x90] sm:$0xff] }
 0x288   : > { %3930 = vst.msk [vmem:[#allocation2 + $0x68] sm:$0xff] %vm503_vm6, %v3894_v20  ;;  %v4327_v30 = vadd.f32 %v4291_v26, %v7454_v32  ;;  %v2555_v32 = vld [vmem:[%s5953_s11 + $0x98] sm:$0x3]  ;;  %v4122_v26 = vsel %vm4085_vm9, %v4119_v57, %v4121_v15 }
 0x289   : > { %5517 = vst.msk [vmem:[%s7251_s9 + $0x24] sm:$0xf] %vm4399_vm10, %v4442_v49  ;;  %v2795_v31 = vpop.f32.mrf.mxu1  ;;  %v2631_v6 = vunpack.c.l.b16 %v2555_v32 }
 0x28a   : > { %4363 = vst.msk [vmem:[#allocation2 + $0x60] sm:$0xff] %vm503_vm6, %v4327_v30  ;;  %v2897_v51 = vadd.f32 %v2861_v50, %v2795_v31 }
 0x28b   : > { %v3293_v5 = vld [vmem:[#allocation2 + $0x78] sm:$0xff]  ;;  %v2650_v13 = vpack.c.b16 %v2631_v6, %v2631_v6 }
 0x28c   : > { %v7577_v42 = vpop.f32.mrf.mxu0  ;;  %v3329_v14 = vadd.f32 %v3293_v5, %v3225_v33  ;;  %2933 = vst.msk [vmem:[#allocation2 + $0x80] sm:$0xff] %vm503_vm6, %v2897_v51  ;;  %5235 = vmatmul.msk.bf16.gmra.mxu1 %vm342_vm2, %v2686_v8  ;;  %5326 = vmatmul.msk.bf16.gmra.mxu2 %vm342_vm2, %v3119_v21  ;;  %v2864_v51 = vld [vmem:[#allocation2 + $0x98] sm:$0xff] }
 0x28d   : > { %v3859_v25 = vld [vmem:[#allocation2 + $0x70] sm:$0xff]  ;;  %v2687_v54 = vrot.slane %v2650_v13, 2 }
 0x28e   : > { %v3895_v47 = vadd.f32 %v3859_v25, %v7437_v9  ;;  %3365 = vst.msk [vmem:[#allocation2 + $0x78] sm:$0xff] %vm503_vm6, %v3329_v14 }
 0x28f   : > { %5508 = vmatmul.msk.bf16.gmra.mxu0 %vm342_vm2, %v4120_v4  ;;  %v4292_v3 = vld [vmem:[#allocation2 + $0x68] sm:$0xff]  ;;  %v3228_v19 = vpop.f32.mrf.mxu2  ;;  %v2688_v17 = vsel %vm2651_vm8, %v2685_v0, %v2687_v54 }
 0x290   : > { %3931 = vst.msk [vmem:[#allocation2 + $0x70] sm:$0xff] %vm503_vm6, %v3895_v47  ;;  %v4328_v18 = vadd.f32 %v4292_v3, %v7483_v56  ;;  %v7600_v56 = vpop.f32.mrf.mxu3 }
 0x291   : > { %v4446_v52 = vld [vmem:[#allocation2 + $0x5a] sm:$0xff]  ;;  %v2797_v29 = vpop.f32.mrf.mxu1 }
 0x292   : > { %v4448_v58 = vadd.f32 %v7213_v7, %v4446_v52  ;;  %4364 = vst.msk [vmem:[#allocation2 + $0x68] sm:$0xff] %vm503_vm6, %v4328_v18  ;;  %v2898_v60 = vadd.f32 %v2862_v11, %v2797_v29 }
 0x293   : > { %v3294_v24 = vld [vmem:[#allocation2 + $0x80] sm:$0xff] }
 0x294   : > { %v7597_v9 = vpop.f32.mrf.mxu0  ;;  %v4450_v16 = vmax.f32 %v4448_v58, 0.0  ;;  %v3330_v44 = vadd.f32 %v3294_v24, %v3228_v19  ;;  %2934 = vst.msk [vmem:[#allocation2 + $0x88] sm:$0xff] %vm503_vm6, %v2898_v60  ;;  %v2865_v19 = vld [vmem:[#allocation2 + $0xa0] sm:$0xff] }
 0x295   : > { %v3860_v61 = vld [vmem:[#allocation2 + $0x78] sm:$0xff] }
 0x296   : > { %v4452_v12 = vpack.c.bf16 %v4450_v16, %v4450_v16  ;;  %v3896_v63 = vadd.f32 %v3860_v61, %v7469_v2  ;;  %3366 = vst.msk [vmem:[#allocation2 + $0x80] sm:$0xff] %vm503_vm6, %v3330_v44  ;;  %v3121_v2 = vsel %vm2651_vm8, %v3118_v40, %v3120_v23  ;;  %v2866_v61 = vld [vmem:[#allocation2 + $0xa8] sm:$0xff] }
 0x297   : > { %v4293_v36 = vld [vmem:[#allocation2 + $0x70] sm:$0xff]  ;;  %v3230_v34 = vpop.f32.mrf.mxu2 }
 0x298   : > { %5518 = vst.msk [vmem:[%s7251_s9 + $0x28] sm:$0xf] %vm4399_vm10, %v4452_v12  ;;  %v4329_v62 = vadd.f32 %v4293_v36, %v7517_v43  ;;  %v7627_v38 = vpop.f32.mrf.mxu3 }
 0x299   : > { %v4447_v39 = vld [vmem:[#allocation2 + $0x62] sm:$0xff]  ;;  %3932 = vst.msk [vmem:[#allocation2 + $0x78] sm:$0xff] %vm503_vm6, %v3896_v63  ;;  %v2800_v59 = vpop.f32.mrf.mxu1 }
 0x29a   : > { %v4449_v20 = vadd.f32 %v7213_v7, %v4447_v39  ;;  %4365 = vst.msk [vmem:[#allocation2 + $0x70] sm:$0xff] %vm503_vm6, %v4329_v62  ;;  %v2899_v49 = vadd.f32 %v2863_v37, %v2800_v59 }
 0x29b   : > { %v3295_v33 = vld [vmem:[#allocation2 + $0x88] sm:$0xff] }
 0x29c   : > { %v7616_v43 = vpop.f32.mrf.mxu0  ;;  %v4451_v41 = vmax.f32 %v4449_v20, 0.0  ;;  %v3331_v30 = vadd.f32 %v3295_v33, %v3230_v34  ;;  %2935 = vst.msk [vmem:[#allocation2 + $0x90] sm:$0xff] %vm503_vm6, %v2899_v49  ;;  %5236 = vmatmul.msk.bf16.gmra.mxu1 %vm342_vm2, %v2688_v17  ;;  %5327 = vmatmul.msk.bf16.gmra.mxu2 %vm342_vm2, %v3121_v2  ;;  %v2867_v20 = vld [vmem:[#allocation2 + $0xb0] sm:$0xff] }
 0x29d   : > { %v3861_v53 = vld [vmem:[#allocation2 + $0x80] sm:$0xff] }
 0x29e   : > { %v4453_v0 = vpack.c.bf16 %v4451_v41, %v4451_v41  ;;  %v3897_v40 = vadd.f32 %v3861_v53, %v7500_v22  ;;  %3367 = vst.msk [vmem:[#allocation2 + $0x88] sm:$0xff] %vm503_vm6, %v3331_v30 }
 0x29f   : > { %5509 = vmatmul.msk.bf16.gmra.mxu0 %vm342_vm2, %v4122_v26  ;;  %v3233_v57 = vpop.f32.mrf.mxu2 }
 0x2a0   : > { %5519 = vst.msk [vmem:[%s7251_s9 + $0x2c] sm:$0xf] %vm4399_vm10, %v4453_v0  ;;  %v4294_v31 = vld [vmem:[#allocation2 + $0x78] sm:$0xff]  ;;  %v7642_v47 = vpop.f32.mrf.mxu3 }
 0x2a1   : > { %v4457_v50 = vld [vmem:[#allocation2 + $0x6c] sm:$0xff]  ;;  %3933 = vst.msk [vmem:[#allocation2 + $0x80] sm:$0xff] %vm503_vm6, %v3897_v40  ;;  %v4330_v8 = vadd.f32 %v4294_v31, %v7545_v1  ;;  %v2802_v21 = vpop.f32.mrf.mxu1 }
 0x2a2   : > { %v4459_v32 = vadd.f32 %v7213_v7, %v4457_v50  ;;  %v2900_v28 = vadd.f32 %v2864_v51, %v2802_v21  ;;  %v2868_v51 = vld [vmem:[#allocation2 + $0xb8] sm:$0xff] }
 0x2a3   : > { %4366 = vst.msk [vmem:[#allocation2 + $0x78] sm:$0xff] %vm503_vm6, %v4330_v8  ;;  %v3296_v4 = vld [vmem:[#allocation2 + $0x90] sm:$0xff] }
 0x2a4   : > { %v7634_v22 = vpop.f32.mrf.mxu0  ;;  %v4461_v5 = vmax.f32 %v4459_v32, 0.0  ;;  %v3332_v10 = vadd.f32 %v3296_v4, %v3233_v57  ;;  %2936 = vst.msk [vmem:[#allocation2 + $0x98] sm:$0xff] %vm503_vm6, %v2900_v28 }
 0x2a5   : > { %v3862_v14 = vld [vmem:[#allocation2 + $0x88] sm:$0xff] }
 0x2a6   : > { %v4463_v25 = vpack.c.bf16 %v4461_v5, %v4461_v5  ;;  %v3898_v6 = vadd.f32 %v3862_v14, %v7534_v46  ;;  %3368 = vst.msk [vmem:[#allocation2 + $0x90] sm:$0xff] %vm503_vm6, %v3332_v10 }
 0x2a7   : > { %v3235_v1 = vpop.f32.mrf.mxu2 }
 0x2a8   : > { %5520 = vst.msk [vmem:[%s7251_s9 + $0x30] sm:$0xf] %vm4399_vm10, %v4463_v25  ;;  %v4295_v45 = vld [vmem:[#allocation2 + $0x80] sm:$0xff]  ;;  %v7657_v12 = vpop.f32.mrf.mxu3 }
 0x2a9   : > { %3934 = vst.msk [vmem:[#allocation2 + $0x88] sm:$0xff] %vm503_vm6, %v3898_v6  ;;  %v4331_v27 = vadd.f32 %v4295_v45, %v7577_v42  ;;  %v2805_v3 = vpop.f32.mrf.mxu1 }
 0x2aa   : > { %v4458_v18 = vld [vmem:[#allocation2 + $0x74] sm:$0xff]  ;;  %v2901_v52 = vadd.f32 %v2865_v19, %v2805_v3 }
 0x2ab   : > { %v4460_v46 = vadd.f32 %v7213_v7, %v4458_v18  ;;  %4367 = vst.msk [vmem:[#allocation2 + $0x80] sm:$0xff] %vm503_vm6, %v4331_v27  ;;  %v3297_v11 = vld [vmem:[#allocation2 + $0x98] sm:$0xff] }
 0x2ac   : > { %v7646_v29 = vpop.f32.mrf.mxu0  ;;  %v3333_v13 = vadd.f32 %v3297_v11, %v3235_v1  ;;  %2937 = vst.msk [vmem:[#allocation2 + $0xa0] sm:$0xff] %vm503_vm6, %v2901_v52  ;;  %v2869_v52 = vld [vmem:[#allocation2 + $0xc0] sm:$0xff] }
 0x2ad   : > { %v4462_v35 = vmax.f32 %v4460_v46, 0.0  ;;  %v3863_v58 = vld [vmem:[#allocation2 + $0x90] sm:$0xff] }
 0x2ae   : > { %v3899_v60 = vadd.f32 %v3863_v58, %v7584_v48  ;;  %3369 = vst.msk [vmem:[#allocation2 + $0x98] sm:$0xff] %vm503_vm6, %v3333_v13 }
 0x2af   : > { %v4464_v42 = vpack.c.bf16 %v4462_v35, %v4462_v35  ;;  %v3238_v55 = vpop.f32.mrf.mxu2 }
 0x2b0   : > { %3935 = vst.msk [vmem:[#allocation2 + $0x90] sm:$0xff] %vm503_vm6, %v3899_v60  ;;  %v4296_v24 = vld [vmem:[#allocation2 + $0x88] sm:$0xff]  ;;  %v7673_v30 = vpop.f32.mrf.mxu3 }
 0x2b1   : > { %5521 = vst.msk [vmem:[%s7251_s9 + $0x34] sm:$0xf] %vm4399_vm10, %v4464_v42  ;;  %v4332_v16 = vadd.f32 %v4296_v24, %v7597_v9  ;;  %v2807_v44 = vpop.f32.mrf.mxu1 }
 0x2b2   : > { %v4468_v54 = vld [vmem:[#allocation2 + $0x7e] sm:$0xff]  ;;  %v2902_v23 = vadd.f32 %v2866_v61, %v2807_v44  ;;  %v2870_v61 = vld [vmem:[#allocation2 + $0xc8] sm:$0xff] }
 0x2b3   : > { %v4470_v48 = vadd.f32 %v7213_v7, %v4468_v54  ;;  %4368 = vst.msk [vmem:[#allocation2 + $0x88] sm:$0xff] %vm503_vm6, %v4332_v16  ;;  %v3298_v63 = vld [vmem:[#allocation2 + $0xa0] sm:$0xff] }
 0x2b4   : > { %v3334_v15 = vadd.f32 %v3298_v63, %v3238_v55  ;;  %2938 = vst.msk [vmem:[#allocation2 + $0xa8] sm:$0xff] %vm503_vm6, %v2902_v23  ;;  %v7662_v36 = vpop.f32.mrf.mxu0 }
 0x2b5   : > { %v4472_v34 = vmax.f32 %v4470_v48, 0.0  ;;  %v3864_v62 = vld [vmem:[#allocation2 + $0x98] sm:$0xff] }
 0x2b6   : > { %v3900_v9 = vadd.f32 %v3864_v62, %v7600_v56  ;;  %3370 = vst.msk [vmem:[#allocation2 + $0xa0] sm:$0xff] %vm503_vm6, %v3334_v15 }
 0x2b7   : > { %v4474_v39 = vpack.c.bf16 %v4472_v34, %v4472_v34  ;;  %v4297_v59 = vld [vmem:[#allocation2 + $0x90] sm:$0xff]  ;;  %v3240_v37 = vpop.f32.mrf.mxu2 }
 0x2b8   : > { %3936 = vst.msk [vmem:[#allocation2 + $0x98] sm:$0xff] %vm503_vm6, %v3900_v9  ;;  %v4333_v17 = vadd.f32 %v4297_v59, %v7616_v43  ;;  %v3815_v6 = vpop.f32.mrf.mxu3 }
 0x2b9   : > { %5522 = vst.msk [vmem:[%s7251_s9 + $0x38] sm:$0xf] %vm4399_vm10, %v4474_v39  ;;  %v2810_v2 = vpop.f32.mrf.mxu1  ;;  %v2871_v39 = vld [vmem:[#allocation2 + $0xd0] sm:$0xff] }
 0x2ba   : > { %v4469_v49 = vld [vmem:[#allocation2 + $0x86] sm:$0xff]  ;;  %4369 = vst.msk [vmem:[#allocation2 + $0x90] sm:$0xff] %vm503_vm6, %v4333_v17  ;;  %v2903_v26 = vadd.f32 %v2867_v20, %v2810_v2 }
 0x2bb   : > { %v4471_v56 = vadd.f32 %v7213_v7, %v4469_v49  ;;  %v3299_v33 = vld [vmem:[#allocation2 + $0xa8] sm:$0xff] }
 0x2bc   : > { %v3335_v41 = vadd.f32 %v3299_v33, %v3240_v37  ;;  %2939 = vst.msk [vmem:[#allocation2 + $0xb0] sm:$0xff] %vm503_vm6, %v2903_v26  ;;  %v7677_v40 = vpop.f32.mrf.mxu0 }
 0x2bd   : > { %v4473_v53 = vmax.f32 %v4471_v56, 0.0  ;;  %v3865_v0 = vld [vmem:[#allocation2 + $0xa0] sm:$0xff] }
 0x2be   : > { %v3901_v43 = vadd.f32 %v3865_v0, %v7627_v38  ;;  %3371 = vst.msk [vmem:[#allocation2 + $0xa8] sm:$0xff] %vm503_vm6, %v3335_v41  ;;  %v7686_v38 = vld [vmem:[%s7842_s2] ss:$0 sm:$0xff] }
 0x2bf   : > { %v4475_v57 = vpack.c.bf16 %v4473_v53, %v4473_v53  ;;  %v4298_v31 = vld [vmem:[#allocation2 + $0x98] sm:$0xff]  ;;  %v3243_v50 = vpop.f32.mrf.mxu2 }
 0x2c0   : > { %3937 = vst.msk [vmem:[#allocation2 + $0xa0] sm:$0xff] %vm503_vm6, %v3901_v43  ;;  %v4334_v7 = vadd.f32 %v4298_v31, %v7634_v22  ;;  %v3817_v24 = vpop.f32.mrf.mxu3 }
 0x2c1   : > { %5523 = vst.msk [vmem:[%s7251_s9 + $0x3c] sm:$0xf] %vm4399_vm10, %v4475_v57  ;;  %v4479_v8 = vld [vmem:[#allocation2 + $0x90] sm:$0xff]  ;;  %v2812_v21 = vpop.f32.mrf.mxu1  ;;  %v2872_v57 = vld [vmem:[#allocation2 + $0xd8] sm:$0xff] }
 0x2c2   : > { %v4481_v32 = vadd.f32 %v7686_v38, %v4479_v8  ;;  %4370 = vst.msk [vmem:[#allocation2 + $0x98] sm:$0xff] %vm503_vm6, %v4334_v7  ;;  %v2904_v28 = vadd.f32 %v2868_v51, %v2812_v21 }
 0x2c3   : > { %v3300_v4 = vld [vmem:[#allocation2 + $0xb0] sm:$0xff] }
 0x2c4   : > { %v4483_v5 = vmax.f32 %v4481_v32, 0.0  ;;  %v3336_v10 = vadd.f32 %v3300_v4, %v3243_v50  ;;  %2940 = vst.msk [vmem:[#allocation2 + $0xb8] sm:$0xff] %vm503_vm6, %v2904_v28  ;;  %v4246_v3 = vpop.f32.mrf.mxu0 }
 0x2c5   : > { %v3866_v22 = vld [vmem:[#allocation2 + $0xa8] sm:$0xff] }
 0x2c6   : > { %v4485_v14 = vpack.c.bf16 %v4483_v5, %v4483_v5  ;;  %v3902_v25 = vadd.f32 %v3866_v22, %v7642_v47  ;;  %3372 = vst.msk [vmem:[#allocation2 + $0xb0] sm:$0xff] %vm503_vm6, %v3336_v10 }
 0x2c7   : > { %v4299_v1 = vld [vmem:[#allocation2 + $0xa0] sm:$0xff]  ;;  %v3245_v45 = vpop.f32.mrf.mxu2 }
 0x2c8   : > { %5524 = vst.msk [vmem:[%s7251_s9 + $0x40] sm:$0xf] %vm4399_vm10, %v4485_v14  ;;  %v4335_v27 = vadd.f32 %v4299_v1, %v7646_v29  ;;  %v3820_v17 = vpop.f32.mrf.mxu3 }
 0x2c9   : > { %v4480_v19 = vld [vmem:[#allocation2 + $0x98] sm:$0xff]  ;;  %3938 = vst.msk [vmem:[#allocation2 + $0xa8] sm:$0xff] %vm503_vm6, %v3902_v25  ;;  %v2815_v18 = vpop.f32.mrf.mxu1 }
 0x2ca   : > { %v4482_v46 = vadd.f32 %v7686_v38, %v4480_v19  ;;  %4371 = vst.msk [vmem:[#allocation2 + $0xa0] sm:$0xff] %vm503_vm6, %v4335_v27  ;;  %v2905_v47 = vadd.f32 %v2869_v52, %v2815_v18 }
 0x2cb   : > { %v3301_v11 = vld [vmem:[#allocation2 + $0xb8] sm:$0xff] }
 0x2cc   : > { %v4484_v13 = vmax.f32 %v4482_v46, 0.0  ;;  %v3337_v35 = vadd.f32 %v3301_v11, %v3245_v45  ;;  %2941 = vst.msk [vmem:[#allocation2 + $0xc0] sm:$0xff] %vm503_vm6, %v2905_v47  ;;  %v4249_v23 = vpop.f32.mrf.mxu0  ;;  %v2873_v45 = vld [vmem:[#allocation2 + $0xe0] sm:$0xff] }
 0x2cd   : > { %v3867_v58 = vld [vmem:[#allocation2 + $0xb0] sm:$0xff] }
 0x2ce   : > { %v4486_v60 = vpack.c.bf16 %v4484_v13, %v4484_v13  ;;  %v3903_v29 = vadd.f32 %v3867_v58, %v7657_v12  ;;  %3373 = vst.msk [vmem:[#allocation2 + $0xb8] sm:$0xff] %vm503_vm6, %v3337_v35 }
 0x2cf   : > { %v3248_v42 = vpop.f32.mrf.mxu2 }
 0x2d0   : > { %5525 = vst.msk [vmem:[%s7251_s9 + $0x44] sm:$0xf] %vm4399_vm10, %v4486_v60  ;;  %v4300_v55 = vld [vmem:[#allocation2 + $0xa8] sm:$0xff]  ;;  %v3822_v51 = vpop.f32.mrf.mxu3 }
 0x2d1   : > { %3939 = vst.msk [vmem:[#allocation2 + $0xb0] sm:$0xff] %vm503_vm6, %v3903_v29  ;;  %v4336_v16 = vadd.f32 %v4300_v55, %v7662_v36  ;;  %v2817_v44 = vpop.f32.mrf.mxu1 }
 0x2d2   : > { %v2906_v54 = vadd.f32 %v2870_v61, %v2817_v44 }
 0x2d3   : > { %4372 = vst.msk [vmem:[#allocation2 + $0xa8] sm:$0xff] %vm503_vm6, %v4336_v16  ;;  %v3302_v48 = vld [vmem:[#allocation2 + $0xc0] sm:$0xff] }
 0x2d4   : > { %v3338_v63 = vadd.f32 %v3302_v48, %v3248_v42  ;;  %2942 = vst.msk [vmem:[#allocation2 + $0xc8] sm:$0xff] %vm503_vm6, %v2906_v54  ;;  %v4251_v26 = vpop.f32.mrf.mxu0 }
 0x2d5   : > { %v3868_v12 = vld [vmem:[#allocation2 + $0xb8] sm:$0xff] }
 0x2d6   : > { %v3904_v15 = vadd.f32 %v3868_v12, %v7673_v30  ;;  %3374 = vst.msk [vmem:[#allocation2 + $0xc0] sm:$0xff] %vm503_vm6, %v3338_v63 }
 0x2d7   : > { %v3250_v34 = vpop.f32.mrf.mxu2 }
 0x2d8   : > { %3940 = vst.msk [vmem:[#allocation2 + $0xb8] sm:$0xff] %vm503_vm6, %v3904_v15  ;;  %v4301_v62 = vld [vmem:[#allocation2 + $0xb0] sm:$0xff]  ;;  %v3825_v13 = vpop.f32.mrf.mxu3 }
 0x2d9   : > { %v4337_v36 = vadd.f32 %v4301_v62, %v7677_v40  ;;  %v2820_v9 = vpop.f32.mrf.mxu1 }
 0x2da   : > { %v4490_v59 = vld [vmem:[#allocation2 + $0xa2] sm:$0xff]  ;;  %v2907_v37 = vadd.f32 %v2871_v39, %v2820_v9 }
 0x2db   : > { %v4492_v2 = vadd.f32 %v7686_v38, %v4490_v59  ;;  %4373 = vst.msk [vmem:[#allocation2 + $0xb0] sm:$0xff] %vm503_vm6, %v4337_v36  ;;  %v3303_v20 = vld [vmem:[#allocation2 + $0xc8] sm:$0xff]  ;;  %v2875_v59 = vld [vmem:[#allocation2 + $0xf0] sm:$0xff] }
 0x2dc   : > { %v3339_v49 = vadd.f32 %v3303_v20, %v3250_v34  ;;  %2943 = vst.msk [vmem:[#allocation2 + $0xd0] sm:$0xff] %vm503_vm6, %v2907_v37  ;;  %v4254_v5 = vpop.f32.mrf.mxu0 }
 0x2dd   : > { %v4494_v56 = vmax.f32 %v4492_v2, 0.0  ;;  %v3869_v33 = vld [vmem:[#allocation2 + $0xc0] sm:$0xff] }
 0x2de   : > { %v3905_v41 = vadd.f32 %v3869_v33, %v3815_v6  ;;  %3375 = vst.msk [vmem:[#allocation2 + $0xc8] sm:$0xff] %vm503_vm6, %v3339_v49 }
 0x2df   : > { %v4496_v30 = vpack.c.bf16 %v4494_v56, %v4494_v56  ;;  %v4302_v53 = vld [vmem:[#allocation2 + $0xb8] sm:$0xff]  ;;  %v3253_v0 = vpop.f32.mrf.mxu2 }
 0x2e0   : > { %3941 = vst.msk [vmem:[#allocation2 + $0xc0] sm:$0xff] %vm503_vm6, %v3905_v41  ;;  %v4338_v43 = vadd.f32 %v4302_v53, %v4246_v3  ;;  %v3827_v62 = vpop.f32.mrf.mxu3 }
 0x2e1   : > { %5526 = vst.msk [vmem:[%s7251_s9 + $0x48] sm:$0xf] %vm4399_vm10, %v4496_v30  ;;  %v2822_v40 = vpop.f32.mrf.mxu1 }
 0x2e2   : > { %v4491_v31 = vld [vmem:[#allocation2 + $0xaa] sm:$0xff]  ;;  %4374 = vst.msk [vmem:[#allocation2 + $0xb8] sm:$0xff] %vm503_vm6, %v4338_v43  ;;  %v2908_v50 = vadd.f32 %v2872_v57, %v2822_v40  ;;  %v2876_v40 = vld [vmem:[#allocation2 + $0xf8] sm:$0xff] }
 0x2e3   : > { %v4493_v7 = vadd.f32 %v7686_v38, %v4491_v31  ;;  %v3304_v8 = vld [vmem:[#allocation2 + $0xd0] sm:$0xff] }
 0x2e4   : > { %v3340_v21 = vadd.f32 %v3304_v8, %v3253_v0  ;;  %2944 = vst.msk [vmem:[#allocation2 + $0xd8] sm:$0xff] %vm503_vm6, %v2908_v50  ;;  %v4256_v29 = vpop.f32.mrf.mxu0 }
 0x2e5   : > { %v4495_v32 = vmax.f32 %v4493_v7, 0.0  ;;  %v3870_v28 = vld [vmem:[#allocation2 + $0xc8] sm:$0xff] }
 0x2e6   : > { %v3906_v4 = vadd.f32 %v3870_v28, %v3817_v24  ;;  %3376 = vst.msk [vmem:[#allocation2 + $0xd0] sm:$0xff] %vm503_vm6, %v3340_v21  ;;  %v2874_v24 = vld [vmem:[#allocation2 + $0xe8] sm:$0xff] }
 0x2e7   : > { %v4497_v10 = vpack.c.bf16 %v4495_v32, %v4495_v32  ;;  %v4303_v22 = vld [vmem:[#allocation2 + $0xc0] sm:$0xff]  ;;  %v3255_v14 = vpop.f32.mrf.mxu2 }
 0x2e8   : > { %3942 = vst.msk [vmem:[#allocation2 + $0xc8] sm:$0xff] %vm503_vm6, %v3906_v4  ;;  %v4339_v25 = vadd.f32 %v4303_v22, %v4249_v23  ;;  %v3830_v50 = vpop.f32.mrf.mxu3 }
 0x2e9   : > { %5527 = vst.msk [vmem:[%s7251_s9 + $0x4c] sm:$0xf] %vm4399_vm10, %v4497_v10  ;;  %v4501_v6 = vld [vmem:[#allocation2 + $0xb4] sm:$0xff]  ;;  %v2825_v1 = vpop.f32.mrf.mxu1 }
 0x2ea   : > { %v4503_v27 = vadd.f32 %v7686_v38, %v4501_v6  ;;  %4375 = vst.msk [vmem:[#allocation2 + $0xc0] sm:$0xff] %vm503_vm6, %v4339_v25  ;;  %v2909_v3 = vadd.f32 %v2873_v45, %v2825_v1  ;;  %v2877_v6 = vld [vmem:[#allocation2 + $0x100] sm:$0xff] }
 0x2eb   : > { %v3305_v19 = vld [vmem:[#allocation2 + $0xd8] sm:$0xff] }
 0x2ec   : > { %v4505_v18 = vmax.f32 %v4503_v27, 0.0  ;;  %v3341_v52 = vadd.f32 %v3305_v19, %v3255_v14  ;;  %2945 = vst.msk [vmem:[#allocation2 + $0xe0] sm:$0xff] %vm503_vm6, %v2909_v3  ;;  %v4259_v2 = vpop.f32.mrf.mxu0 }
 0x2ed   : > { %v3871_v46 = vld [vmem:[#allocation2 + $0xd0] sm:$0xff] }
 0x2ee   : > { %v4507_v47 = vpack.c.bf16 %v4505_v18, %v4505_v18  ;;  %v3907_v11 = vadd.f32 %v3871_v46, %v3820_v17  ;;  %3377 = vst.msk [vmem:[#allocation2 + $0xd8] sm:$0xff] %vm503_vm6, %v3341_v52 }
 0x2ef   : > { %v4304_v35 = vld [vmem:[#allocation2 + $0xc8] sm:$0xff]  ;;  %v3258_v58 = vpop.f32.mrf.mxu2 }
 0x2f0   : > { %5528 = vst.msk [vmem:[%s7251_s9 + $0x50] sm:$0xf] %vm4399_vm10, %v4507_v47  ;;  %v4340_v60 = vadd.f32 %v4304_v35, %v4251_v26  ;;  %v3832_v18 = vpop.f32.mrf.mxu3 }
 0x2f1   : > { %v4502_v42 = vld [vmem:[#allocation2 + $0xbc] sm:$0xff]  ;;  %3943 = vst.msk [vmem:[#allocation2 + $0xd0] sm:$0xff] %vm503_vm6, %v3907_v11  ;;  %v2827_v55 = vpop.f32.mrf.mxu1 }
 0x2f2   : > { %v4504_v16 = vadd.f32 %v7686_v38, %v4502_v42  ;;  %4376 = vst.msk [vmem:[#allocation2 + $0xc8] sm:$0xff] %vm503_vm6, %v4340_v60  ;;  %v2910_v44 = vadd.f32 %v2874_v24, %v2827_v55  ;;  %v2878_v42 = vld [vmem:[#allocation2 + $0x108] sm:$0xff] }
 0x2f3   : > { %v3306_v61 = vld [vmem:[#allocation2 + $0xe0] sm:$0xff] }
 0x2f4   : > { %v4506_v54 = vmax.f32 %v4504_v16, 0.0  ;;  %v3342_v23 = vadd.f32 %v3306_v61, %v3258_v58  ;;  %2946 = vst.msk [vmem:[#allocation2 + $0xe8] sm:$0xff] %vm503_vm6, %v2910_v44 }
 0x2f5   : > { %v3872_v48 = vld [vmem:[#allocation2 + $0xd8] sm:$0xff] }
 0x2f6   : > { %v4508_v63 = vpack.c.bf16 %v4506_v54, %v4506_v54  ;;  %v3908_v12 = vadd.f32 %v3872_v48, %v3822_v51  ;;  %3378 = vst.msk [vmem:[#allocation2 + $0xe0] sm:$0xff] %vm503_vm6, %v3342_v23  ;;  %v4261_v51 = vpop.f32.mrf.mxu0 }
 0x2f7   : > { %v3260_v15 = vpop.f32.mrf.mxu2 }
 0x2f8   : > { %5529 = vst.msk [vmem:[%s7251_s9 + $0x54] sm:$0xf] %vm4399_vm10, %v4508_v63  ;;  %v4305_v34 = vld [vmem:[#allocation2 + $0xd0] sm:$0xff]  ;;  %v3835_v63 = vpop.f32.mrf.mxu3 }
 0x2f9   : > { %v4512_v36 = vld [vmem:[#allocation2 + $0xc6] sm:$0xff]  ;;  %3944 = vst.msk [vmem:[#allocation2 + $0xd8] sm:$0xff] %vm503_vm6, %v3908_v12  ;;  %v4341_v9 = vadd.f32 %v4305_v34, %v4254_v5  ;;  %v2830_v39 = vpop.f32.mrf.mxu1 }
 0x2fa   : > { %v4514_v37 = vadd.f32 %v7686_v38, %v4512_v36  ;;  %v2911_v17 = vadd.f32 %v2875_v59, %v2830_v39  ;;  %v2879_v39 = vld [vmem:[#allocation2 + $0x110] sm:$0xff] }
 0x2fb   : > { %4377 = vst.msk [vmem:[#allocation2 + $0xd0] sm:$0xff] %vm503_vm6, %v4341_v9  ;;  %v3307_v20 = vld [vmem:[#allocation2 + $0xe8] sm:$0xff] }
 0x2fc   : > { %v4516_v49 = vmax.f32 %v4514_v37, 0.0  ;;  %v3343_v26 = vadd.f32 %v3307_v20, %v3260_v15  ;;  %2947 = vst.msk [vmem:[#allocation2 + $0xf0] sm:$0xff] %vm503_vm6, %v2911_v17 }
 0x2fd   : > { %v3873_v56 = vld [vmem:[#allocation2 + $0xe0] sm:$0xff] }
 0x2fe   : > { %v4518_v33 = vpack.c.bf16 %v4516_v49, %v4516_v49  ;;  %v3909_v41 = vadd.f32 %v3873_v56, %v3825_v13  ;;  %3379 = vst.msk [vmem:[#allocation2 + $0xe8] sm:$0xff] %vm503_vm6, %v3343_v26  ;;  %v4264_v11 = vpop.f32.mrf.mxu0 }
 0x2ff   : > { %v3263_v30 = vpop.f32.mrf.mxu2 }
 0x300   : > { %5530 = vst.msk [vmem:[%s7251_s9 + $0x58] sm:$0xf] %vm4399_vm10, %v4518_v33  ;;  %v4306_v53 = vld [vmem:[#allocation2 + $0xd8] sm:$0xff]  ;;  %v3837_v56 = vpop.f32.mrf.mxu3 }
 0x301   : > { %3945 = vst.msk [vmem:[#allocation2 + $0xe0] sm:$0xff] %vm503_vm6, %v3909_v41  ;;  %v4342_v0 = vadd.f32 %v4306_v53, %v4256_v29  ;;  %v2832_v43 = vpop.f32.mrf.mxu1  ;;  %v2880_v53 = vld [vmem:[#allocation2 + $0x118] sm:$0xff] }
 0x302   : > { %v4513_v57 = vld [vmem:[#allocation2 + $0xce] sm:$0xff]  ;;  %v2912_v31 = vadd.f32 %v2876_v40, %v2832_v43 }
 0x303   : > { %v4515_v7 = vadd.f32 %v7686_v38, %v4513_v57  ;;  %4378 = vst.msk [vmem:[#allocation2 + $0xd8] sm:$0xff] %vm503_vm6, %v4342_v0  ;;  %v3308_v8 = vld [vmem:[#allocation2 + $0xf0] sm:$0xff] }
 0x304   : > { %v3344_v21 = vadd.f32 %v3308_v8, %v3263_v30  ;;  %2948 = vst.msk [vmem:[#allocation2 + $0xf8] sm:$0xff] %vm503_vm6, %v2912_v31 }
 0x305   : > { %v4517_v32 = vmax.f32 %v4515_v7, 0.0  ;;  %v3874_v28 = vld [vmem:[#allocation2 + $0xe8] sm:$0xff] }
 0x306   : > { %v3910_v4 = vadd.f32 %v3874_v28, %v3827_v62  ;;  %3380 = vst.msk [vmem:[#allocation2 + $0xf0] sm:$0xff] %vm503_vm6, %v3344_v21  ;;  %v4266_v36 = vpop.f32.mrf.mxu0 }
 0x307   : > { %v4519_v5 = vpack.c.bf16 %v4517_v32, %v4517_v32  ;;  %v3265_v10 = vpop.f32.mrf.mxu2 }
 0x308   : > { %3946 = vst.msk [vmem:[#allocation2 + $0xe8] sm:$0xff] %vm503_vm6, %v3910_v4  ;;  %v4307_v22 = vld [vmem:[#allocation2 + $0xe0] sm:$0xff] }
 0x309   : > { %5531 = vst.msk [vmem:[%s7251_s9 + $0x5c] sm:$0xf] %vm4399_vm10, %v4519_v5  ;;  %v4343_v14 = vadd.f32 %v4307_v22, %v4259_v2  ;;  %v2835_v25 = vpop.f32.mrf.mxu1  ;;  %v3840_v5 = vpop.f32.mrf.mxu3 }
 0x30a   : > { %v4523_v1 = vld [vmem:[#allocation2 + $0xd8] sm:$0xff]  ;;  %v2913_v45 = vadd.f32 %v2877_v6, %v2835_v25 }
 0x30b   : > { %v4525_v27 = vadd.f32 %v7686_v38, %v4523_v1  ;;  %4379 = vst.msk [vmem:[#allocation2 + $0xe0] sm:$0xff] %vm503_vm6, %v4343_v14  ;;  %v3309_v3 = vld [vmem:[#allocation2 + $0xf8] sm:$0xff] }
 0x30c   : > { %v3345_v19 = vadd.f32 %v3309_v3, %v3265_v10  ;;  %2949 = vst.msk [vmem:[#allocation2 + $0x100] sm:$0xff] %vm503_vm6, %v2913_v45 }
 0x30d   : > { %v4527_v52 = vmax.f32 %v4525_v27, 0.0  ;;  %v3875_v46 = vld [vmem:[#allocation2 + $0xf0] sm:$0xff] }
 0x30e   : > { %v3911_v47 = vadd.f32 %v3875_v46, %v3830_v50  ;;  %3381 = vst.msk [vmem:[#allocation2 + $0xf8] sm:$0xff] %vm503_vm6, %v3345_v19  ;;  %v4269_v43 = vpop.f32.mrf.mxu0 }
 0x30f   : > { %v4529_v13 = vpack.c.bf16 %v4527_v52, %v4527_v52  ;;  %v4308_v35 = vld [vmem:[#allocation2 + $0xe8] sm:$0xff]  ;;  %v3268_v58 = vpop.f32.mrf.mxu2 }
 0x310   : > { %3947 = vst.msk [vmem:[#allocation2 + $0xf0] sm:$0xff] %vm503_vm6, %v3911_v47  ;;  %v4344_v60 = vadd.f32 %v4308_v35, %v4261_v51 }
 0x311   : > { %5532 = vst.msk [vmem:[%s7251_s9 + $0x60] sm:$0xf] %vm4399_vm10, %v4529_v13  ;;  %v2837_v29 = vpop.f32.mrf.mxu1  ;;  %v3842_v47 = vpop.f32.mrf.mxu3 }
 0x312   : > { %v4524_v55 = vld [vmem:[#allocation2 + $0xe0] sm:$0xff]  ;;  %4380 = vst.msk [vmem:[#allocation2 + $0xe8] sm:$0xff] %vm503_vm6, %v4344_v60  ;;  %v2914_v24 = vadd.f32 %v2878_v42, %v2837_v29 }
 0x313   : > { %v4526_v16 = vadd.f32 %v7686_v38, %v4524_v55  ;;  %v3310_v44 = vld [vmem:[#allocation2 + $0x100] sm:$0xff] }
 0x314   : > { %v3346_v61 = vadd.f32 %v3310_v44, %v3268_v58  ;;  %2950 = vst.msk [vmem:[#allocation2 + $0x108] sm:$0xff] %vm503_vm6, %v2914_v24 }
 0x315   : > { %v4528_v54 = vmax.f32 %v4526_v16, 0.0  ;;  %v3876_v23 = vld [vmem:[#allocation2 + $0xf8] sm:$0xff] }
 0x316   : > { %v3912_v48 = vadd.f32 %v3876_v23, %v3832_v18  ;;  %3382 = vst.msk [vmem:[#allocation2 + $0x100] sm:$0xff] %vm503_vm6, %v3346_v61  ;;  %v4271_v6 = vpop.f32.mrf.mxu0 }
 0x317   : > { %v4530_v12 = vpack.c.bf16 %v4528_v54, %v4528_v54  ;;  %v4309_v15 = vld [vmem:[#allocation2 + $0xf0] sm:$0xff]  ;;  %v3270_v34 = vpop.f32.mrf.mxu2 }
 0x318   : > { %3948 = vst.msk [vmem:[#allocation2 + $0xf8] sm:$0xff] %vm503_vm6, %v3912_v48  ;;  %v4345_v62 = vadd.f32 %v4309_v15, %v4264_v11 }
 0x319   : > { %5533 = vst.msk [vmem:[%s7251_s9 + $0x64] sm:$0xf] %vm4399_vm10, %v4530_v12  ;;  %v2840_v9 = vpop.f32.mrf.mxu1 }
 0x31a   : > { %4381 = vst.msk [vmem:[#allocation2 + $0xf0] sm:$0xff] %vm503_vm6, %v4345_v62  ;;  %v2915_v59 = vadd.f32 %v2879_v39, %v2840_v9 }
 0x31b   : > { %v3311_v37 = vld [vmem:[#allocation2 + $0x108] sm:$0xff] }
 0x31c   : > { %v3347_v17 = vadd.f32 %v3311_v37, %v3270_v34  ;;  %2951 = vst.msk [vmem:[#allocation2 + $0x110] sm:$0xff] %vm503_vm6, %v2915_v59 }
 0x31d   : > { %v3877_v2 = vld [vmem:[#allocation2 + $0x100] sm:$0xff] }
 0x31e   : > { %v3913_v20 = vadd.f32 %v3877_v2, %v3835_v63  ;;  %3383 = vst.msk [vmem:[#allocation2 + $0x108] sm:$0xff] %vm503_vm6, %v3347_v17  ;;  %v4274_v58 = vpop.f32.mrf.mxu0 }
 0x31f   : > { %v4310_v49 = vld [vmem:[#allocation2 + $0xf8] sm:$0xff]  ;;  %v3273_v41 = vpop.f32.mrf.mxu2 }
 0x320   : > { %3949 = vst.msk [vmem:[#allocation2 + $0x100] sm:$0xff] %vm503_vm6, %v3913_v20  ;;  %v4346_v26 = vadd.f32 %v4310_v49, %v4266_v36 }
 0x321   : > { %v4534_v33 = vld [vmem:[#allocation2 + $0xea] sm:$0xff]  ;;  %v2842_v30 = vpop.f32.mrf.mxu1 }
 0x322   : > { %v4536_v0 = vadd.f32 %v7686_v38, %v4534_v33  ;;  %4382 = vst.msk [vmem:[#allocation2 + $0xf8] sm:$0xff] %vm503_vm6, %v4346_v26  ;;  %v2916_v40 = vadd.f32 %v2880_v53, %v2842_v30 }
 0x323   : > { %v3312_v57 = vld [vmem:[#allocation2 + $0x110] sm:$0xff] }
 0x324   : > { %v4538_v31 = vmax.f32 %v4536_v0, 0.0  ;;  %v3348_v50 = vadd.f32 %v3312_v57, %v3273_v41  ;;  %2952 = vst.msk [vmem:[#allocation2 + $0x118] sm:$0xff] %vm503_vm6, %v2916_v40 }
 0x325   : > { %v3878_v7 = vld [vmem:[#allocation2 + $0x108] sm:$0xff] }
 0x326   : > { %v4540_v8 = vpack.c.bf16 %v4538_v31, %v4538_v31  ;;  %v3914_v21 = vadd.f32 %v3878_v7, %v3837_v56  ;;  %3384 = vst.msk [vmem:[#allocation2 + $0x110] sm:$0xff] %vm503_vm6, %v3348_v50  ;;  %v4276_v44 = vpop.f32.mrf.mxu0 }
 0x327   : > { %v4311_v51 = vld [vmem:[#allocation2 + $0x100] sm:$0xff]  ;;  %v3275_v10 = vpop.f32.mrf.mxu2 }
 0x328   : > { %5534 = vst.msk [vmem:[%s7251_s9 + $0x68] sm:$0xf] %vm4399_vm10, %v4540_v8  ;;  %v4347_v32 = vadd.f32 %v4311_v51, %v4269_v43 }
 0x329   : > { %v4535_v28 = vld [vmem:[#allocation2 + $0xf2] sm:$0xff]  ;;  %3950 = vst.msk [vmem:[#allocation2 + $0x108] sm:$0xff] %vm503_vm6, %v3914_v21 }
 0x32a   : > { %v4537_v4 = vadd.f32 %v7686_v38, %v4535_v28  ;;  %4383 = vst.msk [vmem:[#allocation2 + $0x100] sm:$0xff] %vm503_vm6, %v4347_v32 }
 0x32b   : > { %v3313_v22 = vld [vmem:[#allocation2 + $0x118] sm:$0xff] }
 0x32c   : > { %v4539_v14 = vmax.f32 %v4537_v4, 0.0  ;;  %v3349_v25 = vadd.f32 %v3313_v22, %v3275_v10 }
 0x32d   : > { %v3879_v1 = vld [vmem:[#allocation2 + $0x110] sm:$0xff] }
 0x32e   : > { %v4541_v45 = vpack.c.bf16 %v4539_v14, %v4539_v14  ;;  %v3915_v27 = vadd.f32 %v3879_v1, %v3840_v5  ;;  %3385 = vst.msk [vmem:[#allocation2 + $0x118] sm:$0xff] %vm503_vm6, %v3349_v25 }
 0x330   : > { %5535 = vst.msk [vmem:[%s7251_s9 + $0x6c] sm:$0xf] %vm4399_vm10, %v4541_v45  ;;  %v4312_v3 = vld [vmem:[#allocation2 + $0x108] sm:$0xff] }
 0x331   : > { %v4545_v19 = vld [vmem:[#allocation2 + $0xfc] sm:$0xff]  ;;  %3951 = vst.msk [vmem:[#allocation2 + $0x110] sm:$0xff] %vm503_vm6, %v3915_v27  ;;  %v4348_v18 = vadd.f32 %v4312_v3, %v4271_v6 }
 0x332   : > { %v4547_v52 = vadd.f32 %v7686_v38, %v4545_v19 }
 0x333   : > { %4384 = vst.msk [vmem:[#allocation2 + $0x108] sm:$0xff] %vm503_vm6, %v4348_v18 }
 0x334   : > { %v4549_v46 = vmax.f32 %v4547_v52, 0.0 }
 0x335   : > { %v3880_v11 = vld [vmem:[#allocation2 + $0x118] sm:$0xff] }
 0x336   : > { %v4551_v13 = vpack.c.bf16 %v4549_v46, %v4549_v46  ;;  %v3916_v35 = vadd.f32 %v3880_v11, %v3842_v47 }
 0x338   : > { %5536 = vst.msk [vmem:[%s7251_s9 + $0x70] sm:$0xf] %vm4399_vm10, %v4551_v13  ;;  %v4313_v60 = vld [vmem:[#allocation2 + $0x110] sm:$0xff] }
 0x339   : > { %3952 = vst.msk [vmem:[#allocation2 + $0x118] sm:$0xff] %vm503_vm6, %v3916_v35  ;;  %v4349_v29 = vadd.f32 %v4313_v60, %v4274_v58 }
 0x33a   : > { %v4546_v42 = vld [vmem:[#allocation2 + $0x104] sm:$0xff] }
 0x33b   : > { %v4548_v55 = vadd.f32 %v7686_v38, %v4546_v42  ;;  %4385 = vst.msk [vmem:[#allocation2 + $0x110] sm:$0xff] %vm503_vm6, %v4349_v29 }
 0x33d   : > { %v4550_v24 = vmax.f32 %v4548_v55, 0.0 }
 0x33f   : > { %v4552_v16 = vpack.c.bf16 %v4550_v24, %v4550_v24 }
 0x340   : > { %v4314_v61 = vld [vmem:[#allocation2 + $0x118] sm:$0xff] }
 0x341   : > { %5537 = vst.msk [vmem:[%s7251_s9 + $0x74] sm:$0xf] %vm4399_vm10, %v4552_v16  ;;  %v4350_v54 = vadd.f32 %v4314_v61, %v4276_v44 }
 0x342   : > { %v4556_v23 = vld [vmem:[#allocation2 + $0x10e] sm:$0xff] }
 0x343   : > { %v4558_v48 = vadd.f32 %v7686_v38, %v4556_v23  ;;  %4386 = vst.msk [vmem:[#allocation2 + $0x118] sm:$0xff] %vm503_vm6, %v4350_v54 }
 0x345   : > { %v4560_v63 = vmax.f32 %v4558_v48, 0.0 }
 0x347   : > { %v4562_v12 = vpack.c.bf16 %v4560_v63, %v4560_v63 }
 0x349   : > { %5538 = vst.msk [vmem:[%s7251_s9 + $0x78] sm:$0xf] %vm4399_vm10, %v4562_v12 }
 0x34a   : > { %v4557_v15 = vld [vmem:[#allocation2 + $0x116] sm:$0xff] }
 0x34b   : > { %v4559_v34 = vadd.f32 %v7686_v38, %v4557_v15 }
 0x34d   : > { %v4561_v62 = vmax.f32 %v4559_v34, 0.0 }
 0x34f   : > { %v4563_v36 = vpack.c.bf16 %v4561_v62, %v4561_v62 }
 0x351   : > { %5539 = vst.msk [vmem:[%s7251_s9 + $0x7c] sm:$0xf] %vm4399_vm10, %v4563_v36 }
 0x352   : > { %5799 = shalt.err (!%p5796_p5)
}
 0x353   : > { %s5853_s7 = smov 64   ;;  %s5854_s9 = smov 4  }
 0x354   : > { %5712 = dma.vmem_to_hbm [thread:$0]  (%p5915_p4), %s4582_s26, 2048, %s4584_s27, %s4568_s15, %s5853_s7, %s5853_s7, %s5854_s9  }
 0x355 PF: > { %p5718_p6 = scmp.ge.s32.totalorder %s5850_s17, 2  ;;  %s4598_s10 = sand.u32 1, %s5830_s12  }
 0x356   : > { %s4599_s11 = scalar_lea.sflag [#allocation4], %s4598_s10 }
 0x357   : > { %p5715_p7 = pnand %p5718_p6, %p5922_p8 }
 0x359   : > { %p5716_p9 = pneg %p5715_p7 }
 0x35b   : > { %5825 = dma.done.wait (%p5716_p9), %s4599_s11, 2048  }
 0x35c   : > { %5827 = vsyncadd (%p5716_p9), %s4599_s11, 4294965248  ;;  %s16_s17 = sadd.s32 1, %s5850_s17   ;;  %s7846_s12 = smov %s5834_s13 }
 0x35d   : > { %p13_p10 = scmp.ge.s32.totalorder %s16_s17, 4   ;;  %s7847_s13 = smov %s5838_s14 }
 0x35e   : > { %s7848_s14 = smov %s5928_s25  ;;  %s7849_s15 = smov %s5846_s16 }
 0x35f   : > { %s7850_s16 = smov %s7852_s20  ;;  %15 = sbr.rel (!%p13_p10) target bundleno = 4 (0x4), region = 96 }
 0x364   :  { %4605 = vsyncpa [#allocation4], 1 }
 0x365   :  { %4607 = vsyncpa [#allocation4 + $0x1], 1 }

</bundles_post_ra>
